<compile_context>
chip_gen: v6e
topology: v6e:2x2x1
jax: 0.10.0
libtpu: 0.0.40
codegen_flags: <defaults>
</compile_context>

<pallas_src>
import functools
import math

import jax
import jax.numpy as jnp
import numpy as np
from jax import lax
from jax.experimental import pallas as pl
from jax.experimental.pallas import tpu as pltpu

LN_EPS = 1e-5
NEG_INF = float("-inf")


# ----------------------------- in-kernel helpers -----------------------------

def _layernorm(r, gamma, beta, eps):
    mean = jnp.mean(r, axis=-1, keepdims=True)
    var = jnp.mean((r - mean) ** 2, axis=-1, keepdims=True)
    return gamma * (r - mean) * lax.rsqrt(var + eps) + beta


def _softmax_last(s):
    m = jnp.max(s, axis=-1, keepdims=True)
    e = jnp.exp(s - m)
    return e / jnp.sum(e, axis=-1, keepdims=True)   # exact denominator (review)


def _proj(a_f32, w_ref, b_ref):
    # bf16 operands, f32 MXU accumulation, bias add in f32.
    return jnp.dot(a_f32.astype(jnp.bfloat16), w_ref[...],
                   preferred_element_type=jnp.float32) + b_ref[...]


def _mha(q, k, v, num_heads, head_dim, causal_mask):
    # q: (Sq, D) f32, k/v: (Sk, D) f32 — columns are head-major, so a simple reshape
    # splits heads with no lane shuffles. All heads in one batched dot_general.
    Sq, D = q.shape
    Sk = k.shape[0]
    qh = q.reshape(Sq, num_heads, head_dim).astype(jnp.bfloat16)
    kh = k.reshape(Sk, num_heads, head_dim).astype(jnp.bfloat16)
    vh = v.reshape(Sk, num_heads, head_dim).astype(jnp.bfloat16)
    s = jnp.einsum("qhd,khd->hqk", qh, kh,
                   preferred_element_type=jnp.float32) * (1.0 / math.sqrt(head_dim))
    if causal_mask is not None:
        s = jnp.where(causal_mask[None, :, :], NEG_INF, s)
    p = _softmax_last(s).astype(jnp.bfloat16)                      # (H, Sq, Sk)
    o = jnp.einsum("hqk,khd->qhd", p, vh,
                   preferred_element_type=jnp.float32)             # (Sq, H, hd)
    return o.reshape(Sq, D)                                        # lane-dense merge


# ----------------------------- fused Pallas kernel -----------------------------

def _decoder_layer_kernel(x_ref, y_ref,
                          wqkv_ref, bqkv_ref, wo1_ref, bo1_ref, g1_ref, be1_ref,
                          wkv_ref, bkv_ref, wq_ref, bq_ref, wo2_ref, bo2_ref,
                          g2_ref, be2_ref,
                          w1_ref, b1_ref, w2_ref, b2_ref, g3_ref, be3_ref,
                          o_ref, *, num_heads, head_dim, eps):
    x = x_ref[0]                                      # (Sx, D) f32 (encoder)
    y0 = y_ref[0]                                     # (Sy, D) f32 (decoder)
    Sy, D = y0.shape

    # ---- sublayer 1: masked self-attention + dropout1(id) + add & LN1 ----
    qkv = _proj(y0, wqkv_ref, bqkv_ref)               # (Sy, 3D), head-major [Q|K|V]
    row = lax.broadcasted_iota(jnp.int32, (Sy, Sy), 0)
    col = lax.broadcasted_iota(jnp.int32, (Sy, Sy), 1)
    causal = col > row                                 # in-kernel causal mask
    attn = _mha(qkv[:, :D], qkv[:, D:2 * D], qkv[:, 2 * D:],
                num_heads, head_dim, causal)
    sa = _proj(attn, wo1_ref, bo1_ref)
    y1 = _layernorm(sa + y0, g1_ref[...], be1_ref[...], eps)

    # ---- sublayer 2: cross-attention (mask=None) + dropout2(id) + add & LN2 ----
    kv = _proj(x, wkv_ref, bkv_ref)                    # (Sx, 2D), head-major [K|V]
    q = _proj(y1, wq_ref, bq_ref)                      # (Sy, D)
    attn = _mha(q, kv[:, :D], kv[:, D:], num_heads, head_dim, None)
    ca = _proj(attn, wo2_ref, bo2_ref)
    y2 = _layernorm(ca + y1, g2_ref[...], be2_ref[...], eps)

    # ---- sublayer 3: FFN + dropout3(id) + add & LN3 ----
    h = jnp.maximum(_proj(y2, w1_ref, b1_ref), 0.0)    # ReLU, (Sy, F)
    f = _proj(h, w2_ref, b2_ref)                       # (Sy, D)
    o_ref[0] = _layernorm(f + y2, g3_ref[...], be3_ref[...], eps).astype(o_ref.dtype)


# ----------------------------- wrapper -----------------------------

def decoder_layer(x, y, kp, num_heads):
    B, Sy, D = y.shape
    Sx = x.shape[1]
    hd = D // num_heads
    F = kp["ffn_w1"].shape[1]
    kern = functools.partial(_decoder_layer_kernel,
                             num_heads=num_heads, head_dim=hd, eps=LN_EPS)
    rep = lambda shape: pl.BlockSpec(shape, lambda b: (0,) * len(shape))
    in_specs = [
        pl.BlockSpec((1, Sx, D), lambda b: (b, 0, 0)),   # x (encoder)
        pl.BlockSpec((1, Sy, D), lambda b: (b, 0, 0)),   # y (decoder)
        rep((D, 3 * D)), rep((1, 3 * D)),                # self-attn wqkv (bf16), bqkv
        rep((D, D)), rep((1, D)),                        # self-attn wo (bf16), bo
        rep((1, D)), rep((1, D)),                        # LN1 gamma, beta
        rep((D, 2 * D)), rep((1, 2 * D)),                # cross wkv (bf16), bkv
        rep((D, D)), rep((1, D)),                        # cross wq (bf16), bq
        rep((D, D)), rep((1, D)),                        # cross wo (bf16), bo
        rep((1, D)), rep((1, D)),                        # LN2 gamma, beta
        rep((D, F)), rep((1, F)),                        # ffn w1 (bf16), b1
        rep((F, D)), rep((1, D)),                        # ffn w2 (bf16), b2
        rep((1, D)), rep((1, D)),                        # LN3 gamma, beta
    ]
    return pl.pallas_call(
        kern,
        out_shape=jax.ShapeDtypeStruct((B, Sy, D), y.dtype),
        grid=(B,),
        in_specs=in_specs,
        out_specs=pl.BlockSpec((1, Sy, D), lambda b: (b, 0, 0)),
        compiler_params=pltpu.CompilerParams(dimension_semantics=("parallel",)),
    )(x, y,
      kp["sa_wqkv"], kp["sa_bqkv"], kp["sa_wo"], kp["sa_bo"], kp["ln1_g"], kp["ln1_b"],
      kp["ca_wkv"], kp["ca_bkv"], kp["ca_wq"], kp["ca_bq"], kp["ca_wo"], kp["ca_bo"],
      kp["ln2_g"], kp["ln2_b"],
      kp["ffn_w1"], kp["ffn_b1"], kp["ffn_w2"], kp["ffn_b2"], kp["ln3_g"], kp["ln3_b"])


# ----------------------------- one-time parameter prep -----------------------------

def _to_head_major(w, b, n_chunks, num_heads):
    # Permute columns from the PyTorch per-head [q|k|v] interleave (nn.Linear followed
    # by reshape(B,S,H,n_chunks*hd)) to chunk-major [Q_all | K_all | V_all] so the
    # kernel can slice whole 128-lane Q/K/V blocks. Cast weights to bf16 once.
    D = w.shape[0]
    hd = w.shape[1] // (n_chunks * num_heads)
    w2 = (w.reshape(D, num_heads, n_chunks, hd)
           .transpose(0, 2, 1, 3)
           .reshape(D, n_chunks * num_heads * hd))
    b2 = (b.reshape(num_heads, n_chunks, hd)
           .transpose(1, 0, 2)
           .reshape(1, -1))
    return w2.astype(jnp.bfloat16), b2.astype(jnp.float32)


def prepare_kernel_params(p, num_heads):
    sa_wqkv, sa_bqkv = _to_head_major(p["self_attn"]["wqkv"], p["self_attn"]["bqkv"],
                                      3, num_heads)
    ca_wkv, ca_bkv = _to_head_major(p["cross_attn"]["wkv"], p["cross_attn"]["bkv"],
                                    2, num_heads)
    row = lambda v: v.reshape(1, -1).astype(jnp.float32)
    bf16 = lambda w: w.astype(jnp.bfloat16)
    return {
        "sa_wqkv": sa_wqkv, "sa_bqkv": sa_bqkv,
        "sa_wo": bf16(p["self_attn"]["wo"]), "sa_bo": row(p["self_attn"]["bo"]),
        "ln1_g": row(p["norm1"]["gamma"]), "ln1_b": row(p["norm1"]["beta"]),
        "ca_wkv": ca_wkv, "ca_bkv": ca_bkv,
        "ca_wq": bf16(p["cross_attn"]["wq"]), "ca_bq": row(p["cross_attn"]["bq"]),
        "ca_wo": bf16(p["cross_attn"]["wo"]), "ca_bo": row(p["cross_attn"]["bo"]),
        "ln2_g": row(p["norm2"]["gamma"]), "ln2_b": row(p["norm2"]["beta"]),
        "ffn_w1": bf16(p["ffn"]["w1"]), "ffn_b1": row(p["ffn"]["b1"]),
        "ffn_w2": bf16(p["ffn"]["w2"]), "ffn_b2": row(p["ffn"]["b2"]),
        "ln3_g": row(p["norm3"]["gamma"]), "ln3_b": row(p["norm3"]["beta"]),
    }


# ----------------------------- pure-JAX reference -----------------------------

def _split_heads(t, H, n_chunks):
    B, S, nD = t.shape
    hd = nD // (H * n_chunks)
    t = t.reshape(B, S, H, n_chunks * hd).transpose(0, 2, 1, 3)
    return [t[..., i * hd:(i + 1) * hd] for i in range(n_chunks)]


def _merge_heads(v):
    B, H, S, hd = v.shape
    return v.transpose(0, 2, 1, 3).reshape(B, S, H * hd)


def _ref_proj(x, w, b):
    # mirror kernel precision: bf16 operands, f32 accumulation
    return jnp.einsum("bsd,df->bsf", x.astype(jnp.bfloat16), w.astype(jnp.bfloat16),
                      preferred_element_type=jnp.float32) + b


def _ref_attn(q, k, v, mask):
    hd = q.shape[-1]
    s = jnp.einsum("bhqd,bhkd->bhqk", q.astype(jnp.bfloat16), k.astype(jnp.bfloat16),
                   preferred_element_type=jnp.float32) / math.sqrt(hd)
    if mask is not None:
        s = s + mask
    p = jax.nn.softmax(s, axis=-1)
    return jnp.einsum("bhqk,bhkd->bhqd", p.astype(jnp.bfloat16), v.astype(jnp.bfloat16),
                      preferred_element_type=jnp.float32)


def _ref_ln(y, gamma, beta, eps=LN_EPS):
    mean = y.mean(-1, keepdims=True)
    var = ((y - mean) ** 2).mean(-1, keepdims=True)
    return gamma * (y - mean) / jnp.sqrt(var + eps) + beta


def ref_decoder_layer(x, y, mask, p, H):
    _y = y
    qkv = _ref_proj(y, p["self_attn"]["wqkv"], p["self_attn"]["bqkv"])
    q, k, v = _split_heads(qkv, H, 3)
    sa = _ref_proj(_merge_heads(_ref_attn(q, k, v, mask)),
                   p["self_attn"]["wo"], p["self_attn"]["bo"])
    y = _ref_ln(sa + _y, p["norm1"]["gamma"], p["norm1"]["beta"])
    _y = y
    kv = _ref_proj(x, p["cross_attn"]["wkv"], p["cross_attn"]["bkv"])
    k, v = _split_heads(kv, H, 2)
    q = _split_heads(_ref_proj(y, p["cross_attn"]["wq"], p["cross_attn"]["bq"]), H, 1)[0]
    ca = _ref_proj(_merge_heads(_ref_attn(q, k, v, None)),
                   p["cross_attn"]["wo"], p["cross_attn"]["bo"])
    y = _ref_ln(ca + _y, p["norm2"]["gamma"], p["norm2"]["beta"])
    _y = y
    h = jnp.maximum(_ref_proj(y, p["ffn"]["w1"], p["ffn"]["b1"]), 0.0)
    f = _ref_proj(h, p["ffn"]["w2"], p["ffn"]["b2"])
    y = _ref_ln(f + _y, p["norm3"]["gamma"], p["norm3"]["beta"])
    return y


# ----------------------------- setup & run -----------------------------

def make_params(key, D, F):
    ks = jax.random.split(key, 12)
    n = lambda k, shape, s=0.05: (jax.random.normal(k, shape, jnp.float32) * s)
    params = {
        "self_attn": {
            "wqkv": n(ks[0], (D, 3 * D)), "bqkv": n(ks[1], (3 * D,), 0.01),
            "wo": n(ks[2], (D, D)), "bo": n(ks[3], (D,), 0.01),
        },
        "cross_attn": {
            "wkv": n(ks[4], (D, 2 * D)), "bkv": n(ks[5], (2 * D,), 0.01),
            "wq": n(ks[6], (D, D)), "bq": n(ks[7], (D,), 0.01),
            "wo": n(ks[8], (D, D)), "bo": n(ks[9], (D,), 0.01),
        },
        "ffn": {
            "w1": n(ks[10], (D, F)), "b1": jnp.zeros((F,), jnp.float32),
            "w2": n(ks[11], (F, D)), "b2": jnp.zeros((D,), jnp.float32),
        },
    }
    for name in ("norm1", "norm2", "norm3"):
        params[name] = {"gamma": jnp.ones((D,), jnp.float32),
                        "beta": jnp.zeros((D,), jnp.float32)}
    return params


if __name__ == "__main__":
    # small but lane-dense shapes consistent with the module (d_model=128, heads=8)
    B, S, D, H, F = 2, 16, 128, 8, 256   # batch, seq, d_model, heads, ffn_hidden

    key = jax.random.PRNGKey(0)
    kx, ky, kp = jax.random.split(key, 3)
    x = jax.random.normal(kx, (B, S, D), jnp.float32)
    y = jax.random.normal(ky, (B, S, D), jnp.float32)
    params = make_params(kp, D, F)
    kparams = prepare_kernel_params(params, H)   # one-time: head-major permute + bf16

    fwd = jax.jit(functools.partial(decoder_layer, num_heads=H))
    out = jax.block_until_ready(fwd(x, y, kparams))

    # causal decoder mask for the pure-JAX reference check
    decoder_mask = jnp.where(
        jnp.triu(jnp.ones((S, S), dtype=bool), k=1), -jnp.inf, 0.0
    ).astype(jnp.float32)
    ref = ref_decoder_layer(x, y, decoder_mask, params, H)
    np.testing.assert_allclose(np.asarray(out), np.asarray(ref), atol=2e-2, rtol=2e-2)

    print("KERNEL_OK")
</pallas_src>

<mosaic_0001>
module attributes {stable_mosaic.version = 11 : i64} {
  func.func @_decoder_layer_kernel(%arg0: i32, %arg1: memref<1x16x128xf32, #tpu.memory_space<vmem>>, %arg2: memref<1x16x128xf32, #tpu.memory_space<vmem>>, %arg3: memref<128x384xbf16, #tpu.memory_space<vmem>>, %arg4: memref<1x384xf32, #tpu.memory_space<vmem>>, %arg5: memref<128x128xbf16, #tpu.memory_space<vmem>>, %arg6: memref<1x128xf32, #tpu.memory_space<vmem>>, %arg7: memref<1x128xf32, #tpu.memory_space<vmem>>, %arg8: memref<1x128xf32, #tpu.memory_space<vmem>>, %arg9: memref<128x256xbf16, #tpu.memory_space<vmem>>, %arg10: memref<1x256xf32, #tpu.memory_space<vmem>>, %arg11: memref<128x128xbf16, #tpu.memory_space<vmem>>, %arg12: memref<1x128xf32, #tpu.memory_space<vmem>>, %arg13: memref<128x128xbf16, #tpu.memory_space<vmem>>, %arg14: memref<1x128xf32, #tpu.memory_space<vmem>>, %arg15: memref<1x128xf32, #tpu.memory_space<vmem>>, %arg16: memref<1x128xf32, #tpu.memory_space<vmem>>, %arg17: memref<128x256xbf16, #tpu.memory_space<vmem>>, %arg18: memref<1x256xf32, #tpu.memory_space<vmem>>, %arg19: memref<256x128xbf16, #tpu.memory_space<vmem>>, %arg20: memref<1x128xf32, #tpu.memory_space<vmem>>, %arg21: memref<1x128xf32, #tpu.memory_space<vmem>>, %arg22: memref<1x128xf32, #tpu.memory_space<vmem>>, %arg23: memref<1x16x128xf32, #tpu.memory_space<vmem>>) attributes {dimension_semantics = [#tpu.dimension_semantics<parallel>], iteration_bounds = array<i64: 2>, scalar_prefetch = 0 : i64, scratch_operands = 0 : i64, tpu.core_type = #tpu.core_type<tc>, window_params = [{transform_indices = @transform_0, window_bounds = array<i64: 1, 16, 128>}, {transform_indices = @transform_1, window_bounds = array<i64: 1, 16, 128>}, {pipeline_mode = #tpu.pipeline_mode<synchronous>, transform_indices = @transform_2, window_bounds = array<i64: 128, 384>}, {pipeline_mode = #tpu.pipeline_mode<synchronous>, transform_indices = @transform_3, window_bounds = array<i64: 1, 384>}, {pipeline_mode = #tpu.pipeline_mode<synchronous>, transform_indices = @transform_4, window_bounds = array<i64: 128, 128>}, {pipeline_mode = #tpu.pipeline_mode<synchronous>, transform_indices = @transform_5, window_bounds = array<i64: 1, 128>}, {pipeline_mode = #tpu.pipeline_mode<synchronous>, transform_indices = @transform_6, window_bounds = array<i64: 1, 128>}, {pipeline_mode = #tpu.pipeline_mode<synchronous>, transform_indices = @transform_7, window_bounds = array<i64: 1, 128>}, {pipeline_mode = #tpu.pipeline_mode<synchronous>, transform_indices = @transform_8, window_bounds = array<i64: 128, 256>}, {pipeline_mode = #tpu.pipeline_mode<synchronous>, transform_indices = @transform_9, window_bounds = array<i64: 1, 256>}, {pipeline_mode = #tpu.pipeline_mode<synchronous>, transform_indices = @transform_10, window_bounds = array<i64: 128, 128>}, {pipeline_mode = #tpu.pipeline_mode<synchronous>, transform_indices = @transform_11, window_bounds = array<i64: 1, 128>}, {pipeline_mode = #tpu.pipeline_mode<synchronous>, transform_indices = @transform_12, window_bounds = array<i64: 128, 128>}, {pipeline_mode = #tpu.pipeline_mode<synchronous>, transform_indices = @transform_13, window_bounds = array<i64: 1, 128>}, {pipeline_mode = #tpu.pipeline_mode<synchronous>, transform_indices = @transform_14, window_bounds = array<i64: 1, 128>}, {pipeline_mode = #tpu.pipeline_mode<synchronous>, transform_indices = @transform_15, window_bounds = array<i64: 1, 128>}, {pipeline_mode = #tpu.pipeline_mode<synchronous>, transform_indices = @transform_16, window_bounds = array<i64: 128, 256>}, {pipeline_mode = #tpu.pipeline_mode<synchronous>, transform_indices = @transform_17, window_bounds = array<i64: 1, 256>}, {pipeline_mode = #tpu.pipeline_mode<synchronous>, transform_indices = @transform_18, window_bounds = array<i64: 256, 128>}, {pipeline_mode = #tpu.pipeline_mode<synchronous>, transform_indices = @transform_19, window_bounds = array<i64: 1, 128>}, {pipeline_mode = #tpu.pipeline_mode<synchronous>, transform_indices = @transform_20, window_bounds = array<i64: 1, 128>}, {pipeline_mode = #tpu.pipeline_mode<synchronous>, transform_indices = @transform_21, window_bounds = array<i64: 1, 128>}, {transform_indices = @transform_22, window_bounds = array<i64: 1, 16, 128>}]} {
    %c0 = arith.constant 0 : index
    %c0_0 = arith.constant 0 : index
    %c0_1 = arith.constant 0 : index
    %0 = vector.load %arg1[%c0, %c0_0, %c0_1] : memref<1x16x128xf32, #tpu.memory_space<vmem>>, vector<1x16x128xf32>
    %1 = vector.shape_cast %0 : vector<1x16x128xf32> to vector<16x128xf32>
    %c0_2 = arith.constant 0 : index
    %c0_3 = arith.constant 0 : index
    %c0_4 = arith.constant 0 : index
    %2 = vector.load %arg2[%c0_2, %c0_3, %c0_4] : memref<1x16x128xf32, #tpu.memory_space<vmem>>, vector<1x16x128xf32>
    %3 = vector.shape_cast %2 : vector<1x16x128xf32> to vector<16x128xf32>
    %4 = arith.truncf %3 : vector<16x128xf32> to vector<16x128xbf16>
    %c0_5 = arith.constant 0 : index
    %c0_6 = arith.constant 0 : index
    %5 = vector.load %arg3[%c0_5, %c0_6] : memref<128x384xbf16, #tpu.memory_space<vmem>>, vector<128x384xbf16>
    %cst = arith.constant dense<0.000000e+00> : vector<16x384xf32>
    %6 = tpu.matmul %4, %5, %cst {dimension_numbers = #tpu.dot_dimension_numbers<[1], [0], [0], [1], [0, 0, 1, 1], [], []>} : vector<16x128xbf16>, vector<128x384xbf16>, vector<16x384xf32> -> vector<16x384xf32>
    %c0_7 = arith.constant 0 : index
    %c0_8 = arith.constant 0 : index
    %7 = vector.load %arg4[%c0_7, %c0_8] : memref<1x384xf32, #tpu.memory_space<vmem>>, vector<1x384xf32>
    %8 = vector.broadcast %7 : vector<1x384xf32> to vector<16x384xf32>
    %9 = arith.addf %6, %8 : vector<16x384xf32>
    %10 = tpu.iota {dimensions = array<i32: 0>} : vector<16x16xi32>
    %11 = tpu.iota {dimensions = array<i32: 1>} : vector<16x16xi32>
    %12 = arith.cmpi sgt, %11, %10 : vector<16x16xi32>
    %13 = vector.extract_strided_slice %9 {offsets = [0, 0], sizes = [16, 128], strides = [1, 1]} : vector<16x384xf32> to vector<16x128xf32>
    %14 = vector.extract_strided_slice %9 {offsets = [0, 128], sizes = [16, 128], strides = [1, 1]} : vector<16x384xf32> to vector<16x128xf32>
    %15 = vector.extract_strided_slice %9 {offsets = [0, 256], sizes = [16, 128], strides = [1, 1]} : vector<16x384xf32> to vector<16x128xf32>
    %16 = vector.shape_cast %13 : vector<16x128xf32> to vector<16x8x16xf32>
    %17 = arith.truncf %16 : vector<16x8x16xf32> to vector<16x8x16xbf16>
    %18 = vector.shape_cast %14 : vector<16x128xf32> to vector<16x8x16xf32>
    %19 = arith.truncf %18 : vector<16x8x16xf32> to vector<16x8x16xbf16>
    %20 = vector.shape_cast %15 : vector<16x128xf32> to vector<16x8x16xf32>
    %21 = arith.truncf %20 : vector<16x8x16xf32> to vector<16x8x16xbf16>
    "tpu.trace_start"() <{level = 10 : i32, message = "qhd,khd->hqk"}> : () -> ()
    %cst_9 = arith.constant dense<0.000000e+00> : vector<8x16x16xf32>
    %22 = tpu.matmul %17, %19, %cst_9 {dimension_numbers = #tpu.dot_dimension_numbers<[2], [2], [0], [0], [0, 1, 0, 0, 1, 0], [1], [1]>} : vector<16x8x16xbf16>, vector<16x8x16xbf16>, vector<8x16x16xf32> -> vector<8x16x16xf32>
    "tpu.trace_stop"() : () -> ()
    %cst_10 = arith.constant 2.500000e-01 : f32
    %23 = vector.broadcast %cst_10 : f32 to vector<8x16x16xf32>
    %24 = arith.mulf %22, %23 : vector<8x16x16xf32>
    %25 = vector.shape_cast %12 : vector<16x16xi1> to vector<1x16x16xi1>
    %cst_11 = arith.constant 0xFF800000 : f32
    %26 = vector.shape_cast %25 : vector<1x16x16xi1> to vector<1x16x16xi1>
    %27 = vector.broadcast %26 : vector<1x16x16xi1> to vector<8x16x16xi1>
    %28 = vector.broadcast %cst_11 : f32 to vector<8x16x16xf32>
    %29 = arith.select %27, %28, %24 : vector<8x16x16xi1>, vector<8x16x16xf32>
    %cst_12 = arith.constant dense<0xFF800000> : vector<8x16xf32>
    %30 = vector.multi_reduction <maximumf>, %29, %cst_12 [2] : vector<8x16x16xf32> to vector<8x16xf32>
    %31 = vector.shape_cast %30 : vector<8x16xf32> to vector<8x16x1xf32>
    %32 = vector.broadcast %31 : vector<8x16x1xf32> to vector<8x16x16xf32>
    %33 = arith.subf %29, %32 : vector<8x16x16xf32>
    %34 = math.exp %33 : vector<8x16x16xf32>
    %cst_13 = arith.constant dense<0.000000e+00> : vector<8x16xf32>
    %35 = vector.multi_reduction <add>, %34, %cst_13 [2] : vector<8x16x16xf32> to vector<8x16xf32>
    %36 = vector.shape_cast %35 : vector<8x16xf32> to vector<8x16x1xf32>
    %37 = vector.broadcast %36 : vector<8x16x1xf32> to vector<8x16x16xf32>
    %38 = arith.divf %34, %37 : vector<8x16x16xf32>
    %39 = arith.truncf %38 : vector<8x16x16xf32> to vector<8x16x16xbf16>
    "tpu.trace_start"() <{level = 10 : i32, message = "hqk,khd->qhd"}> : () -> ()
    %cst_14 = arith.constant dense<0.000000e+00> : vector<8x16x16xf32>
    %40 = tpu.matmul %21, %39, %cst_14 {dimension_numbers = #tpu.dot_dimension_numbers<[0], [2], [2], [1], [0, 1, 0, 2, 1, 1], [1], [0]>} : vector<16x8x16xbf16>, vector<8x16x16xbf16>, vector<8x16x16xf32> -> vector<8x16x16xf32>
    %41 = tpu.transpose %40, [2, 0, 1] : vector<8x16x16xf32> -> vector<16x8x16xf32>
    "tpu.trace_stop"() : () -> ()
    %42 = vector.shape_cast %41 : vector<16x8x16xf32> to vector<16x128xf32>
    %43 = arith.truncf %42 : vector<16x128xf32> to vector<16x128xbf16>
    %c0_15 = arith.constant 0 : index
    %c0_16 = arith.constant 0 : index
    %44 = vector.load %arg5[%c0_15, %c0_16] : memref<128x128xbf16, #tpu.memory_space<vmem>>, vector<128x128xbf16>
    %cst_17 = arith.constant dense<0.000000e+00> : vector<16x128xf32>
    %45 = tpu.matmul %43, %44, %cst_17 {dimension_numbers = #tpu.dot_dimension_numbers<[1], [0], [0], [1], [0, 0, 1, 1], [], []>} : vector<16x128xbf16>, vector<128x128xbf16>, vector<16x128xf32> -> vector<16x128xf32>
    %c0_18 = arith.constant 0 : index
    %c0_19 = arith.constant 0 : index
    %46 = vector.load %arg6[%c0_18, %c0_19] : memref<1x128xf32, #tpu.memory_space<vmem>>, vector<1x128xf32>
    %47 = vector.broadcast %46 : vector<1x128xf32> to vector<16x128xf32>
    %48 = arith.addf %45, %47 : vector<16x128xf32>
    %49 = arith.addf %48, %3 : vector<16x128xf32>
    %c0_20 = arith.constant 0 : index
    %c0_21 = arith.constant 0 : index
    %50 = vector.load %arg7[%c0_20, %c0_21] : memref<1x128xf32, #tpu.memory_space<vmem>>, vector<1x128xf32>
    %c0_22 = arith.constant 0 : index
    %c0_23 = arith.constant 0 : index
    %51 = vector.load %arg8[%c0_22, %c0_23] : memref<1x128xf32, #tpu.memory_space<vmem>>, vector<1x128xf32>
    %cst_24 = arith.constant dense<0.000000e+00> : vector<16xf32>
    %52 = vector.multi_reduction <add>, %49, %cst_24 [1] : vector<16x128xf32> to vector<16xf32>
    %53 = vector.shape_cast %52 : vector<16xf32> to vector<16x1xf32>
    %cst_25 = arith.constant 1.280000e+02 : f32
    %54 = vector.broadcast %cst_25 : f32 to vector<16x1xf32>
    %55 = arith.divf %53, %54 : vector<16x1xf32>
    %56 = vector.broadcast %55 : vector<16x1xf32> to vector<16x128xf32>
    %57 = arith.subf %49, %56 : vector<16x128xf32>
    %58 = arith.mulf %57, %57 : vector<16x128xf32>
    %cst_26 = arith.constant dense<0.000000e+00> : vector<16xf32>
    %59 = vector.multi_reduction <add>, %58, %cst_26 [1] : vector<16x128xf32> to vector<16xf32>
    %60 = vector.shape_cast %59 : vector<16xf32> to vector<16x1xf32>
    %cst_27 = arith.constant 1.280000e+02 : f32
    %61 = vector.broadcast %cst_27 : f32 to vector<16x1xf32>
    %62 = arith.divf %60, %61 : vector<16x1xf32>
    %63 = vector.broadcast %55 : vector<16x1xf32> to vector<16x128xf32>
    %64 = arith.subf %49, %63 : vector<16x128xf32>
    %65 = vector.broadcast %50 : vector<1x128xf32> to vector<16x128xf32>
    %66 = arith.mulf %65, %64 : vector<16x128xf32>
    %cst_28 = arith.constant 9.99999974E-6 : f32
    %67 = vector.broadcast %cst_28 : f32 to vector<16x1xf32>
    %68 = arith.addf %62, %67 : vector<16x1xf32>
    %69 = math.rsqrt %68 : vector<16x1xf32>
    %70 = vector.broadcast %69 : vector<16x1xf32> to vector<16x128xf32>
    %71 = arith.mulf %66, %70 : vector<16x128xf32>
    %72 = vector.broadcast %51 : vector<1x128xf32> to vector<16x128xf32>
    %73 = arith.addf %71, %72 : vector<16x128xf32>
    %74 = arith.truncf %1 : vector<16x128xf32> to vector<16x128xbf16>
    %c0_29 = arith.constant 0 : index
    %c0_30 = arith.constant 0 : index
    %75 = vector.load %arg9[%c0_29, %c0_30] : memref<128x256xbf16, #tpu.memory_space<vmem>>, vector<128x256xbf16>
    %cst_31 = arith.constant dense<0.000000e+00> : vector<16x256xf32>
    %76 = tpu.matmul %74, %75, %cst_31 {dimension_numbers = #tpu.dot_dimension_numbers<[1], [0], [0], [1], [0, 0, 1, 1], [], []>} : vector<16x128xbf16>, vector<128x256xbf16>, vector<16x256xf32> -> vector<16x256xf32>
    %c0_32 = arith.constant 0 : index
    %c0_33 = arith.constant 0 : index
    %77 = vector.load %arg10[%c0_32, %c0_33] : memref<1x256xf32, #tpu.memory_space<vmem>>, vector<1x256xf32>
    %78 = vector.broadcast %77 : vector<1x256xf32> to vector<16x256xf32>
    %79 = arith.addf %76, %78 : vector<16x256xf32>
    %80 = arith.truncf %73 : vector<16x128xf32> to vector<16x128xbf16>
    %c0_34 = arith.constant 0 : index
    %c0_35 = arith.constant 0 : index
    %81 = vector.load %arg11[%c0_34, %c0_35] : memref<128x128xbf16, #tpu.memory_space<vmem>>, vector<128x128xbf16>
    %cst_36 = arith.constant dense<0.000000e+00> : vector<16x128xf32>
    %82 = tpu.matmul %80, %81, %cst_36 {dimension_numbers = #tpu.dot_dimension_numbers<[1], [0], [0], [1], [0, 0, 1, 1], [], []>} : vector<16x128xbf16>, vector<128x128xbf16>, vector<16x128xf32> -> vector<16x128xf32>
    %c0_37 = arith.constant 0 : index
    %c0_38 = arith.constant 0 : index
    %83 = vector.load %arg12[%c0_37, %c0_38] : memref<1x128xf32, #tpu.memory_space<vmem>>, vector<1x128xf32>
    %84 = vector.broadcast %83 : vector<1x128xf32> to vector<16x128xf32>
    %85 = arith.addf %82, %84 : vector<16x128xf32>
    %86 = vector.extract_strided_slice %79 {offsets = [0, 0], sizes = [16, 128], strides = [1, 1]} : vector<16x256xf32> to vector<16x128xf32>
    %87 = vector.extract_strided_slice %79 {offsets = [0, 128], sizes = [16, 128], strides = [1, 1]} : vector<16x256xf32> to vector<16x128xf32>
    %88 = vector.shape_cast %85 : vector<16x128xf32> to vector<16x8x16xf32>
    %89 = arith.truncf %88 : vector<16x8x16xf32> to vector<16x8x16xbf16>
    %90 = vector.shape_cast %86 : vector<16x128xf32> to vector<16x8x16xf32>
    %91 = arith.truncf %90 : vector<16x8x16xf32> to vector<16x8x16xbf16>
    %92 = vector.shape_cast %87 : vector<16x128xf32> to vector<16x8x16xf32>
    %93 = arith.truncf %92 : vector<16x8x16xf32> to vector<16x8x16xbf16>
    "tpu.trace_start"() <{level = 10 : i32, message = "qhd,khd->hqk"}> : () -> ()
    %cst_39 = arith.constant dense<0.000000e+00> : vector<8x16x16xf32>
    %94 = tpu.matmul %89, %91, %cst_39 {dimension_numbers = #tpu.dot_dimension_numbers<[2], [2], [0], [0], [0, 1, 0, 0, 1, 0], [1], [1]>} : vector<16x8x16xbf16>, vector<16x8x16xbf16>, vector<8x16x16xf32> -> vector<8x16x16xf32>
    "tpu.trace_stop"() : () -> ()
    %cst_40 = arith.constant 2.500000e-01 : f32
    %95 = vector.broadcast %cst_40 : f32 to vector<8x16x16xf32>
    %96 = arith.mulf %94, %95 : vector<8x16x16xf32>
    %cst_41 = arith.constant dense<0xFF800000> : vector<8x16xf32>
    %97 = vector.multi_reduction <maximumf>, %96, %cst_41 [2] : vector<8x16x16xf32> to vector<8x16xf32>
    %98 = vector.shape_cast %97 : vector<8x16xf32> to vector<8x16x1xf32>
    %99 = vector.broadcast %98 : vector<8x16x1xf32> to vector<8x16x16xf32>
    %100 = arith.subf %96, %99 : vector<8x16x16xf32>
    %101 = math.exp %100 : vector<8x16x16xf32>
    %cst_42 = arith.constant dense<0.000000e+00> : vector<8x16xf32>
    %102 = vector.multi_reduction <add>, %101, %cst_42 [2] : vector<8x16x16xf32> to vector<8x16xf32>
    %103 = vector.shape_cast %102 : vector<8x16xf32> to vector<8x16x1xf32>
    %104 = vector.broadcast %103 : vector<8x16x1xf32> to vector<8x16x16xf32>
    %105 = arith.divf %101, %104 : vector<8x16x16xf32>
    %106 = arith.truncf %105 : vector<8x16x16xf32> to vector<8x16x16xbf16>
    "tpu.trace_start"() <{level = 10 : i32, message = "hqk,khd->qhd"}> : () -> ()
    %cst_43 = arith.constant dense<0.000000e+00> : vector<8x16x16xf32>
    %107 = tpu.matmul %93, %106, %cst_43 {dimension_numbers = #tpu.dot_dimension_numbers<[0], [2], [2], [1], [0, 1, 0, 2, 1, 1], [1], [0]>} : vector<16x8x16xbf16>, vector<8x16x16xbf16>, vector<8x16x16xf32> -> vector<8x16x16xf32>
    %108 = tpu.transpose %107, [2, 0, 1] : vector<8x16x16xf32> -> vector<16x8x16xf32>
    "tpu.trace_stop"() : () -> ()
    %109 = vector.shape_cast %108 : vector<16x8x16xf32> to vector<16x128xf32>
    %110 = arith.truncf %109 : vector<16x128xf32> to vector<16x128xbf16>
    %c0_44 = arith.constant 0 : index
    %c0_45 = arith.constant 0 : index
    %111 = vector.load %arg13[%c0_44, %c0_45] : memref<128x128xbf16, #tpu.memory_space<vmem>>, vector<128x128xbf16>
    %cst_46 = arith.constant dense<0.000000e+00> : vector<16x128xf32>
    %112 = tpu.matmul %110, %111, %cst_46 {dimension_numbers = #tpu.dot_dimension_numbers<[1], [0], [0], [1], [0, 0, 1, 1], [], []>} : vector<16x128xbf16>, vector<128x128xbf16>, vector<16x128xf32> -> vector<16x128xf32>
    %c0_47 = arith.constant 0 : index
    %c0_48 = arith.constant 0 : index
    %113 = vector.load %arg14[%c0_47, %c0_48] : memref<1x128xf32, #tpu.memory_space<vmem>>, vector<1x128xf32>
    %114 = vector.broadcast %113 : vector<1x128xf32> to vector<16x128xf32>
    %115 = arith.addf %112, %114 : vector<16x128xf32>
    %116 = arith.addf %115, %73 : vector<16x128xf32>
    %c0_49 = arith.constant 0 : index
    %c0_50 = arith.constant 0 : index
    %117 = vector.load %arg15[%c0_49, %c0_50] : memref<1x128xf32, #tpu.memory_space<vmem>>, vector<1x128xf32>
    %c0_51 = arith.constant 0 : index
    %c0_52 = arith.constant 0 : index
    %118 = vector.load %arg16[%c0_51, %c0_52] : memref<1x128xf32, #tpu.memory_space<vmem>>, vector<1x128xf32>
    %cst_53 = arith.constant dense<0.000000e+00> : vector<16xf32>
    %119 = vector.multi_reduction <add>, %116, %cst_53 [1] : vector<16x128xf32> to vector<16xf32>
    %120 = vector.shape_cast %119 : vector<16xf32> to vector<16x1xf32>
    %cst_54 = arith.constant 1.280000e+02 : f32
    %121 = vector.broadcast %cst_54 : f32 to vector<16x1xf32>
    %122 = arith.divf %120, %121 : vector<16x1xf32>
    %123 = vector.broadcast %122 : vector<16x1xf32> to vector<16x128xf32>
    %124 = arith.subf %116, %123 : vector<16x128xf32>
    %125 = arith.mulf %124, %124 : vector<16x128xf32>
    %cst_55 = arith.constant dense<0.000000e+00> : vector<16xf32>
    %126 = vector.multi_reduction <add>, %125, %cst_55 [1] : vector<16x128xf32> to vector<16xf32>
    %127 = vector.shape_cast %126 : vector<16xf32> to vector<16x1xf32>
    %cst_56 = arith.constant 1.280000e+02 : f32
    %128 = vector.broadcast %cst_56 : f32 to vector<16x1xf32>
    %129 = arith.divf %127, %128 : vector<16x1xf32>
    %130 = vector.broadcast %122 : vector<16x1xf32> to vector<16x128xf32>
    %131 = arith.subf %116, %130 : vector<16x128xf32>
    %132 = vector.broadcast %117 : vector<1x128xf32> to vector<16x128xf32>
    %133 = arith.mulf %132, %131 : vector<16x128xf32>
    %cst_57 = arith.constant 9.99999974E-6 : f32
    %134 = vector.broadcast %cst_57 : f32 to vector<16x1xf32>
    %135 = arith.addf %129, %134 : vector<16x1xf32>
    %136 = math.rsqrt %135 : vector<16x1xf32>
    %137 = vector.broadcast %136 : vector<16x1xf32> to vector<16x128xf32>
    %138 = arith.mulf %133, %137 : vector<16x128xf32>
    %139 = vector.broadcast %118 : vector<1x128xf32> to vector<16x128xf32>
    %140 = arith.addf %138, %139 : vector<16x128xf32>
    %141 = arith.truncf %140 : vector<16x128xf32> to vector<16x128xbf16>
    %c0_58 = arith.constant 0 : index
    %c0_59 = arith.constant 0 : index
    %142 = vector.load %arg17[%c0_58, %c0_59] : memref<128x256xbf16, #tpu.memory_space<vmem>>, vector<128x256xbf16>
    %cst_60 = arith.constant dense<0.000000e+00> : vector<16x256xf32>
    %143 = tpu.matmul %141, %142, %cst_60 {dimension_numbers = #tpu.dot_dimension_numbers<[1], [0], [0], [1], [0, 0, 1, 1], [], []>} : vector<16x128xbf16>, vector<128x256xbf16>, vector<16x256xf32> -> vector<16x256xf32>
    %c0_61 = arith.constant 0 : index
    %c0_62 = arith.constant 0 : index
    %144 = vector.load %arg18[%c0_61, %c0_62] : memref<1x256xf32, #tpu.memory_space<vmem>>, vector<1x256xf32>
    %145 = vector.broadcast %144 : vector<1x256xf32> to vector<16x256xf32>
    %146 = arith.addf %143, %145 : vector<16x256xf32>
    %cst_63 = arith.constant 0.000000e+00 : f32
    %147 = vector.broadcast %cst_63 : f32 to vector<16x256xf32>
    %148 = arith.maximumf %146, %147 : vector<16x256xf32>
    %149 = arith.truncf %148 : vector<16x256xf32> to vector<16x256xbf16>
    %c0_64 = arith.constant 0 : index
    %c0_65 = arith.constant 0 : index
    %150 = vector.load %arg19[%c0_64, %c0_65] : memref<256x128xbf16, #tpu.memory_space<vmem>>, vector<256x128xbf16>
    %cst_66 = arith.constant dense<0.000000e+00> : vector<16x128xf32>
    %151 = tpu.matmul %149, %150, %cst_66 {dimension_numbers = #tpu.dot_dimension_numbers<[1], [0], [0], [1], [0, 0, 1, 1], [], []>} : vector<16x256xbf16>, vector<256x128xbf16>, vector<16x128xf32> -> vector<16x128xf32>
    %c0_67 = arith.constant 0 : index
    %c0_68 = arith.constant 0 : index
    %152 = vector.load %arg20[%c0_67, %c0_68] : memref<1x128xf32, #tpu.memory_space<vmem>>, vector<1x128xf32>
    %153 = vector.broadcast %152 : vector<1x128xf32> to vector<16x128xf32>
    %154 = arith.addf %151, %153 : vector<16x128xf32>
    %155 = arith.addf %154, %140 : vector<16x128xf32>
    %c0_69 = arith.constant 0 : index
    %c0_70 = arith.constant 0 : index
    %156 = vector.load %arg21[%c0_69, %c0_70] : memref<1x128xf32, #tpu.memory_space<vmem>>, vector<1x128xf32>
    %c0_71 = arith.constant 0 : index
    %c0_72 = arith.constant 0 : index
    %157 = vector.load %arg22[%c0_71, %c0_72] : memref<1x128xf32, #tpu.memory_space<vmem>>, vector<1x128xf32>
    %cst_73 = arith.constant dense<0.000000e+00> : vector<16xf32>
    %158 = vector.multi_reduction <add>, %155, %cst_73 [1] : vector<16x128xf32> to vector<16xf32>
    %159 = vector.shape_cast %158 : vector<16xf32> to vector<16x1xf32>
    %cst_74 = arith.constant 1.280000e+02 : f32
    %160 = vector.broadcast %cst_74 : f32 to vector<16x1xf32>
    %161 = arith.divf %159, %160 : vector<16x1xf32>
    %162 = vector.broadcast %161 : vector<16x1xf32> to vector<16x128xf32>
    %163 = arith.subf %155, %162 : vector<16x128xf32>
    %164 = arith.mulf %163, %163 : vector<16x128xf32>
    %cst_75 = arith.constant dense<0.000000e+00> : vector<16xf32>
    %165 = vector.multi_reduction <add>, %164, %cst_75 [1] : vector<16x128xf32> to vector<16xf32>
    %166 = vector.shape_cast %165 : vector<16xf32> to vector<16x1xf32>
    %cst_76 = arith.constant 1.280000e+02 : f32
    %167 = vector.broadcast %cst_76 : f32 to vector<16x1xf32>
    %168 = arith.divf %166, %167 : vector<16x1xf32>
    %169 = vector.broadcast %161 : vector<16x1xf32> to vector<16x128xf32>
    %170 = arith.subf %155, %169 : vector<16x128xf32>
    %171 = vector.broadcast %156 : vector<1x128xf32> to vector<16x128xf32>
    %172 = arith.mulf %171, %170 : vector<16x128xf32>
    %cst_77 = arith.constant 9.99999974E-6 : f32
    %173 = vector.broadcast %cst_77 : f32 to vector<16x1xf32>
    %174 = arith.addf %168, %173 : vector<16x1xf32>
    %175 = math.rsqrt %174 : vector<16x1xf32>
    %176 = vector.broadcast %175 : vector<16x1xf32> to vector<16x128xf32>
    %177 = arith.mulf %172, %176 : vector<16x128xf32>
    %178 = vector.broadcast %157 : vector<1x128xf32> to vector<16x128xf32>
    %179 = arith.addf %177, %178 : vector<16x128xf32>
    %c0_78 = arith.constant 0 : index
    %c0_79 = arith.constant 0 : index
    %c0_80 = arith.constant 0 : index
    %180 = vector.load %arg23[%c0_78, %c0_79, %c0_80] : memref<1x16x128xf32, #tpu.memory_space<vmem>>, vector<1x16x128xf32>
    %181 = vector.shape_cast %180 : vector<1x16x128xf32> to vector<16x128xf32>
    %182 = vector.shape_cast %179 : vector<16x128xf32> to vector<1x16x128xf32>
    tpu.vector_store %arg23[%c0_78, %c0_79, %c0_80], %182 {strides = array<i32>} : memref<1x16x128xf32, #tpu.memory_space<vmem>>, vector<1x16x128xf32>,
    return
  }
  func.func @transform_0(%arg0: i32) -> (i32, i32, i32) {
    %c0_i32 = arith.constant 0 : i32
    %c0_i32_0 = arith.constant 0 : i32
    %c0_i32_1 = arith.constant 0 : i32
    return %arg0, %c0_i32, %c0_i32_0 : i32, i32, i32
  }
  func.func @transform_1(%arg0: i32) -> (i32, i32, i32) {
    %c0_i32 = arith.constant 0 : i32
    %c0_i32_0 = arith.constant 0 : i32
    %c0_i32_1 = arith.constant 0 : i32
    return %arg0, %c0_i32, %c0_i32_0 : i32, i32, i32
  }
  func.func @transform_2(%arg0: i32) -> (i32, i32) {
    %c0_i32 = arith.constant 0 : i32
    %c0_i32_0 = arith.constant 0 : i32
    %c0_i32_1 = arith.constant 0 : i32
    return %c0_i32, %c0_i32_0 : i32, i32
  }
  func.func @transform_3(%arg0: i32) -> (i32, i32) {
    %c0_i32 = arith.constant 0 : i32
    %c0_i32_0 = arith.constant 0 : i32
    %c0_i32_1 = arith.constant 0 : i32
    return %c0_i32, %c0_i32_0 : i32, i32
  }
  func.func @transform_4(%arg0: i32) -> (i32, i32) {
    %c0_i32 = arith.constant 0 : i32
    %c0_i32_0 = arith.constant 0 : i32
    %c0_i32_1 = arith.constant 0 : i32
    return %c0_i32, %c0_i32_0 : i32, i32
  }
  func.func @transform_5(%arg0: i32) -> (i32, i32) {
    %c0_i32 = arith.constant 0 : i32
    %c0_i32_0 = arith.constant 0 : i32
    %c0_i32_1 = arith.constant 0 : i32
    return %c0_i32, %c0_i32_0 : i32, i32
  }
  func.func @transform_6(%arg0: i32) -> (i32, i32) {
    %c0_i32 = arith.constant 0 : i32
    %c0_i32_0 = arith.constant 0 : i32
    %c0_i32_1 = arith.constant 0 : i32
    return %c0_i32, %c0_i32_0 : i32, i32
  }
  func.func @transform_7(%arg0: i32) -> (i32, i32) {
    %c0_i32 = arith.constant 0 : i32
    %c0_i32_0 = arith.constant 0 : i32
    %c0_i32_1 = arith.constant 0 : i32
    return %c0_i32, %c0_i32_0 : i32, i32
  }
  func.func @transform_8(%arg0: i32) -> (i32, i32) {
    %c0_i32 = arith.constant 0 : i32
    %c0_i32_0 = arith.constant 0 : i32
    %c0_i32_1 = arith.constant 0 : i32
    return %c0_i32, %c0_i32_0 : i32, i32
  }
  func.func @transform_9(%arg0: i32) -> (i32, i32) {
    %c0_i32 = arith.constant 0 : i32
    %c0_i32_0 = arith.constant 0 : i32
    %c0_i32_1 = arith.constant 0 : i32
    return %c0_i32, %c0_i32_0 : i32, i32
  }
  func.func @transform_10(%arg0: i32) -> (i32, i32) {
    %c0_i32 = arith.constant 0 : i32
    %c0_i32_0 = arith.constant 0 : i32
    %c0_i32_1 = arith.constant 0 : i32
    return %c0_i32, %c0_i32_0 : i32, i32
  }
  func.func @transform_11(%arg0: i32) -> (i32, i32) {
    %c0_i32 = arith.constant 0 : i32
    %c0_i32_0 = arith.constant 0 : i32
    %c0_i32_1 = arith.constant 0 : i32
    return %c0_i32, %c0_i32_0 : i32, i32
  }
  func.func @transform_12(%arg0: i32) -> (i32, i32) {
    %c0_i32 = arith.constant 0 : i32
    %c0_i32_0 = arith.constant 0 : i32
    %c0_i32_1 = arith.constant 0 : i32
    return %c0_i32, %c0_i32_0 : i32, i32
  }
  func.func @transform_13(%arg0: i32) -> (i32, i32) {
    %c0_i32 = arith.constant 0 : i32
    %c0_i32_0 = arith.constant 0 : i32
    %c0_i32_1 = arith.constant 0 : i32
    return %c0_i32, %c0_i32_0 : i32, i32
  }
  func.func @transform_14(%arg0: i32) -> (i32, i32) {
    %c0_i32 = arith.constant 0 : i32
    %c0_i32_0 = arith.constant 0 : i32
    %c0_i32_1 = arith.constant 0 : i32
    return %c0_i32, %c0_i32_0 : i32, i32
  }
  func.func @transform_15(%arg0: i32) -> (i32, i32) {
    %c0_i32 = arith.constant 0 : i32
    %c0_i32_0 = arith.constant 0 : i32
    %c0_i32_1 = arith.constant 0 : i32
    return %c0_i32, %c0_i32_0 : i32, i32
  }
  func.func @transform_16(%arg0: i32) -> (i32, i32) {
    %c0_i32 = arith.constant 0 : i32
    %c0_i32_0 = arith.constant 0 : i32
    %c0_i32_1 = arith.constant 0 : i32
    return %c0_i32, %c0_i32_0 : i32, i32
  }
  func.func @transform_17(%arg0: i32) -> (i32, i32) {
    %c0_i32 = arith.constant 0 : i32
    %c0_i32_0 = arith.constant 0 : i32
    %c0_i32_1 = arith.constant 0 : i32
    return %c0_i32, %c0_i32_0 : i32, i32
  }
  func.func @transform_18(%arg0: i32) -> (i32, i32) {
    %c0_i32 = arith.constant 0 : i32
    %c0_i32_0 = arith.constant 0 : i32
    %c0_i32_1 = arith.constant 0 : i32
    return %c0_i32, %c0_i32_0 : i32, i32
  }
  func.func @transform_19(%arg0: i32) -> (i32, i32) {
    %c0_i32 = arith.constant 0 : i32
    %c0_i32_0 = arith.constant 0 : i32
    %c0_i32_1 = arith.constant 0 : i32
    return %c0_i32, %c0_i32_0 : i32, i32
  }
  func.func @transform_20(%arg0: i32) -> (i32, i32) {
    %c0_i32 = arith.constant 0 : i32
    %c0_i32_0 = arith.constant 0 : i32
    %c0_i32_1 = arith.constant 0 : i32
    return %c0_i32, %c0_i32_0 : i32, i32
  }
  func.func @transform_21(%arg0: i32) -> (i32, i32) {
    %c0_i32 = arith.constant 0 : i32
    %c0_i32_0 = arith.constant 0 : i32
    %c0_i32_1 = arith.constant 0 : i32
    return %c0_i32, %c0_i32_0 : i32, i32
  }
  func.func @transform_22(%arg0: i32) -> (i32, i32, i32) {
    %c0_i32 = arith.constant 0 : i32
    %c0_i32_0 = arith.constant 0 : i32
    %c0_i32_1 = arith.constant 0 : i32
    return %arg0, %c0_i32, %c0_i32_0 : i32, i32, i32
  }
}

</mosaic_0001>

<bundles_post_ra>
// kernel: decoder_layer.1
= control target key start
LH: loop header
LB: loop body
LE: loop exit
PB: predicated region body
PF: predicated region fallthrough
CT: control target
= control target key end

     0   :  { %s16293_s0 = inlined_call_operand.hbm [shape: f32[2,16,128], index: 0, kind: input, shape index: {}]   ;;  %s16294_s1 = inlined_call_operand.hbm [shape: f32[2,16,128], index: 1, kind: input, shape index: {}]   ;;  %s16295_s2 = inlined_call_operand.hbm [shape: bf16[128,384], index: 2, kind: input, shape index: {}]   ;;  %s16296_s3 = inlined_call_operand.vmem [shape: f32[1,384], index: 3, kind: input, shape index: {}]   ;;  %s16297_s4 = inlined_call_operand.hbm [shape: bf16[128,128], index: 4, kind: input, shape index: {}]   ;;  %s16298_s5 = inlined_call_operand.vmem [shape: f32[1,128], index: 5, kind: input, shape index: {}]   ;;  %s16299_s6 = inlined_call_operand.vmem [shape: f32[1,128], index: 6, kind: input, shape index: {}]   ;;  %s16300_s7 = inlined_call_operand.vmem [shape: f32[1,128], index: 7, kind: input, shape index: {}]   ;;  %s16301_s8 = inlined_call_operand.hbm [shape: bf16[128,256], index: 8, kind: input, shape index: {}]   ;;  %s16302_s9 = inlined_call_operand.vmem [shape: f32[1,256], index: 9, kind: input, shape index: {}]   ;;  %s16303_s10 = inlined_call_operand.hbm [shape: bf16[128,128], index: 10, kind: input, shape index: {}]   ;;  %s16304_s11 = inlined_call_operand.hbm [shape: f32[1,128], index: 11, kind: input, shape index: {}]   ;;  %s16305_s12 = inlined_call_operand.hbm [shape: bf16[128,128], index: 12, kind: input, shape index: {}]   ;;  %s16306_s13 = inlined_call_operand.hbm [shape: f32[1,128], index: 13, kind: input, shape index: {}]   ;;  %s16307_s14 = inlined_call_operand.vmem [shape: f32[1,128], index: 14, kind: input, shape index: {}]   ;;  %s16308_s15 = inlined_call_operand.vmem [shape: f32[1,128], index: 15, kind: input, shape index: {}]   ;;  %s16309_s16 = inlined_call_operand.hbm [shape: bf16[128,256], index: 16, kind: input, shape index: {}]   ;;  %s16310_s17 = inlined_call_operand.vmem [shape: f32[1,256], index: 17, kind: input, shape index: {}]   ;;  %s16311_s18 = inlined_call_operand.hbm [shape: bf16[256,128], index: 18, kind: input, shape index: {}]   ;;  %s16312_s19 = inlined_call_operand.vmem [shape: f32[1,128], index: 19, kind: input, shape index: {}]   ;;  %s16313_s20 = inlined_call_operand.vmem [shape: f32[1,128], index: 20, kind: input, shape index: {}]   ;;  %s16314_s21 = inlined_call_operand.vmem [shape: f32[1,128], index: 21, kind: input, shape index: {}]   ;;  %s16315_s22 = inlined_call_operand.hbm [shape: f32[2,16,128], index: 22, kind: output, shape index: {}]  }
   0x1   :  { %16333 = sst [smem:[#allocation33_spill]] %s16293_s0 }
   0x2   :  { %16334 = sst [smem:[#allocation34_spill]] %s16294_s1 }
   0x3   :  { %16335 = sst [smem:[#allocation35_spill]] %s16295_s2 }
   0x4   :  { %16336 = sst [smem:[#allocation36_spill]] %s16296_s3 }
   0x5   :  { %16337 = sst [smem:[#allocation37_spill]] %s16297_s4 }
   0x6   :  { %16338 = sst [smem:[#allocation38_spill]] %s16298_s5 }
   0x7   :  { %16339 = sst [smem:[#allocation39_spill]] %s16299_s6 }
   0x8   :  { %16340 = sst [smem:[#allocation40_spill]] %s16301_s8 }
   0x9   :  { %16341 = sst [smem:[#allocation41_spill]] %s16303_s10 }
   0xa   :  { %16342 = sst [smem:[#allocation42_spill]] %s16304_s11 }
   0xb   :  { %16343 = sst [smem:[#allocation43_spill]] %s16305_s12 }
   0xc   :  { %16344 = sst [smem:[#allocation44_spill]] %s16306_s13 }
   0xd   :  { %16345 = sst [smem:[#allocation45_spill]] %s16309_s16 }
   0xe   :  { %16346 = sst [smem:[#allocation46_spill]] %s16311_s18 }
   0xf   :  { %16347 = sst [smem:[#allocation47_spill]] %s16312_s19 }
  0x10   :  { %16348 = sst [smem:[#allocation48_spill]] %s16313_s20 }
  0x11   :  { %16349 = sst [smem:[#allocation49_spill]] %s16314_s21 }
  0x12   :  { %16350 = sst [smem:[#allocation50_spill]] %s16315_s22 }
  0x13   :  { %27 = vsyncpa [#allocation3], 0 }
  0x14   :  { %29 = vsyncpa [#allocation3 + $0x1], 0 }
  0x15   :  { %30 = vsyncpa [#allocation6], 0 }
  0x16   :  { %32 = vsyncpa [#allocation6 + $0x1], 0 }
  0x17   :  { %33 = vsyncpa [#allocation9], 0 }
  0x18   :  { %34 = vsyncpa [#allocation12], 0 }
  0x19   :  { %35 = vsyncpa [#allocation15], 0 }
  0x1a   :  { %36 = vsyncpa [#allocation18], 0 }
  0x1b   :  { %37 = vsyncpa [#allocation4], 0 }
  0x1c   :  { %39 = vsyncpa [#allocation4 + $0x1], 0  ;;  %s13914_s3 = smov 0   ;;  %s13916_s28 = smov 0  }
  0x1d   :  { %s13918_s29 = smov 0   ;;  %s13920_s30 = smov 0  }
  0x1e LB: > { %16351 = sst [smem:[#allocation29_spill]] %s13761_s29  ;;  %s13767_s4 = smov [#allocation7]   ;;  %s13765_s30 = sphi %s13920_s30, %s16404_s30   ;;  %s13761_s29 = sphi %s13918_s29, %s16406_s29   ;;  %s13757_s28 = sphi %s13916_s28, %s16408_s28   ;;  %s13753_s3 = sphi %s13914_s3, %s16407_s3  }
  0x1f   : > { %s560_s0 = sshll.u32 %s13767_s4, 4  ;;  %s13935_s23 = sadd.s32 4294967295, %s13765_s30   ;;  %s561_s0 = int_to_ptr.vmem [resolvable:$true] %s560_s0 }
  0x20   : > { %p12275_p0 = scmp.ge.s32.totalorder %s13765_s30, 1  ;;  %p16321_p1 = scmp.eq.s32.totalorder %s13935_s23, 0 }
  0x21   : > { %p548_p2 = scmp.lt.s32.totalorder %s13765_s30, 3  ;;  %s13768_s5 = smov [#allocation8]  }
  0x22   : > { %s576_s24 = sshll.u32 %s13768_s5, 4  ;;  %s13769_s25 = smov [#allocation11]   ;;  %s13953_s24 = int_to_ptr.vmem [resolvable:$true] %s576_s24 }
  0x23   : > { %p13940_p3 = pnand %p12275_p0, %p548_p2  ;;  %s13955_s26 = sshll.u32 %s13769_s25, 4  ;;  %s615_s26 = int_to_ptr.vmem [resolvable:$true] %s13955_s26 }
  0x24   : > { %s13398_s27 = scalar_lea.vmem %s561_s0, 3072  ;;  %p13406_p11 = scmp.lt.s32.totalorder %s561_s0, %s561_s0 }
  0x25   : > { %s16352_s1 = scalar_select %p13940_p3, 1, 0 }
  0x26   : > { %p12935_p5 = pneg %p13940_p3  ;;  %p13399_p8 = scmp.ne.s32.totalorder %s561_s0, %s13398_s27 }
  0x27   : > { %p13407_p12 = scmp.lt.s32.totalorder %s13398_s27, %s13398_s27 }
  0x28   : > { %p13949_p6 = pnand %p12935_p5, %p16321_p1 }
  0x29   : > { %p13408_p13 = por %p13407_p12, %p13406_p11 }
  0x2a   : > { %p13959_p7 = pneg %p13949_p6 }
  0x2c   : > { %p13401_p9 = pnand %p13399_p8, %p13959_p7 }
  0x2e   : > { %p13402_p10 = pneg %p13401_p9 }
  0x30   : > { %p13409_p0 = pnand %p13408_p13, %p13402_p10 }
  0x32   : > { %13412 = shalt.err (!%p13409_p0)
}
  0x33   : > { %s13770_s4 = smov 192   ;;  %s13771_s5 = smov 12  }
  0x34   : > { %s16355_s21 = sld [smem:[#allocation35_spill]]  ;;  %s13424_s20 = scalar_lea.vmem %s13953_s24, 1024 }
  0x35   : > { %p13425_p2 = scmp.ne.s32.totalorder %s13953_s24, %s13424_s20  ;;  %p13432_p9 = scmp.lt.s32.totalorder %s13953_s24, %s13953_s24 }
  0x36   : > { %p13433_p10 = scmp.lt.s32.totalorder %s13424_s20, %s13424_s20 }
  0x37   : > { %p13427_p5 = pnand %p13425_p2, %p13959_p7 }
  0x38   : > { %p13434_p11 = por %p13433_p10, %p13432_p9 }
  0x39   : > { %p13428_p8 = pneg %p13427_p5 }
  0x3a   : > { %12938 = dma.hbm_to_vmem [thread:$0]  (!%p13949_p6), %s16355_s21, 3072, %s561_s0, [#allocation6], %s13770_s4, %s13770_s4, %s13771_s5  }
  0x3b   : > { %p13435_p12 = pnand %p13434_p11, %p13428_p8 }
  0x3d   : > { %13438 = shalt.err (!%p13435_p12)
}
  0x3e   : > { %s16319_s27 = smov 64   ;;  %s16320_s19 = smov 4  }
  0x3f   : > { %s16356_s0 = sld [smem:[#allocation37_spill]]  ;;  %s13450_s4 = scalar_lea.vmem %s615_s26, 1024 }
  0x40   : > { %p13451_p13 = scmp.ne.s32.totalorder %s615_s26, %s13450_s4  ;;  %p13458_p5 = scmp.lt.s32.totalorder %s615_s26, %s615_s26 }
  0x41   : > { %p13459_p8 = scmp.lt.s32.totalorder %s13450_s4, %s13450_s4 }
  0x42   : > { %p13453_p0 = pnand %p13451_p13, %p13959_p7 }
  0x43   : > { %p13460_p9 = por %p13459_p8, %p13458_p5 }
  0x44   : > { %p13454_p2 = pneg %p13453_p0 }
  0x45   : > { %12941 = dma.hbm_to_vmem [thread:$0]  (!%p13949_p6), %s16356_s0, 1024, %s13953_s24, [#allocation9], %s16319_s27, %s16319_s27, %s16320_s19  }
  0x46   : > { %p13461_p10 = pnand %p13460_p9, %p13454_p2 }
  0x48   : > { %13464 = shalt.err (!%p13461_p10)
}
  0x49   : > { %s16357_s10 = sld [smem:[#allocation41_spill]]  ;;  %s13774_s24 = smov [#allocation14]  }
  0x4a   : > { %s638_s25 = sshll.u32 %s13774_s24, 4  ;;  %s639_s25 = int_to_ptr.vmem [resolvable:$true] %s638_s25 }
  0x4b   : > { %s13476_s21 = scalar_lea.vmem %s639_s25, 1024  ;;  %p13484_p0 = scmp.lt.s32.totalorder %s639_s25, %s639_s25 }
  0x4c   : > { %p13477_p11 = scmp.ne.s32.totalorder %s639_s25, %s13476_s21  ;;  %p13485_p2 = scmp.lt.s32.totalorder %s13476_s21, %s13476_s21 }
  0x4e   : > { %p13479_p12 = pnand %p13477_p11, %p13959_p7  ;;  %p13486_p5 = por %p13485_p2, %p13484_p0 }
  0x4f   : > { %12947 = dma.hbm_to_vmem [thread:$0]  (!%p13949_p6), %s16357_s10, 1024, %s615_s26, [#allocation12], %s16319_s27, %s16319_s27, %s16320_s19  }
  0x50   : > { %p13480_p13 = pneg %p13479_p12 }
  0x52   : > { %p13487_p8 = pnand %p13486_p5, %p13480_p13 }
  0x54   : > { %13490 = shalt.err (!%p13487_p8)
}
  0x55   : > { %s16358_s12 = sld [smem:[#allocation43_spill]]  ;;  %s13775_s0 = smov [#allocation17]  }
  0x56   : > { %s668_s4 = sshll.u32 %s13775_s0, 4  ;;  %s13776_s20 = smov [#allocation10]   ;;  %s669_s4 = int_to_ptr.vmem [resolvable:$true] %s668_s4 }
  0x57   : > { %s598_s5 = sshll.u32 %s13776_s20, 4  ;;  %s13502_s24 = scalar_lea.vmem %s669_s4, 2048  ;;  %s599_s5 = int_to_ptr.vmem [resolvable:$true] %s598_s5 }
  0x58   : > { %p13503_p9 = scmp.ne.s32.totalorder %s669_s4, %s13502_s24  ;;  %p13510_p12 = scmp.lt.s32.totalorder %s669_s4, %s669_s4 }
  0x59   : > { %p13511_p13 = scmp.lt.s32.totalorder %s13502_s24, %s13502_s24 }
  0x5a   : > { %p13505_p10 = pnand %p13503_p9, %p13959_p7 }
  0x5b   : > { %12953 = dma.hbm_to_vmem [thread:$0]  (!%p13949_p6), %s16358_s12, 1024, %s639_s25, [#allocation15], %s16319_s27, %s16319_s27, %s16320_s19  }
  0x5c   : > { %p13506_p11 = pneg %p13505_p10  ;;  %p13512_p0 = por %p13511_p13, %p13510_p12 }
  0x5e   : > { %p13513_p2 = pnand %p13512_p0, %p13506_p11 }
  0x60   : > { %13516 = shalt.err (!%p13513_p2)
}
  0x61   : > { %s16323_s21 = smov 128   ;;  %s16325_s25 = smov 8  }
  0x62   : > { %s16359_s16 = sld [smem:[#allocation45_spill]]  ;;  %s13528_s0 = scalar_lea.vmem %s599_s5, 2048 }
  0x63   : > { %p13529_p5 = scmp.ne.s32.totalorder %s599_s5, %s13528_s0  ;;  %p13536_p10 = scmp.lt.s32.totalorder %s599_s5, %s599_s5 }
  0x64   : > { %p13537_p11 = scmp.lt.s32.totalorder %s13528_s0, %s13528_s0 }
  0x65   : > { %p13531_p8 = pnand %p13529_p5, %p13959_p7 }
  0x66   : > { %p13538_p12 = por %p13537_p11, %p13536_p10 }
  0x67   : > { %p13532_p9 = pneg %p13531_p8 }
  0x68   : > { %12959 = dma.hbm_to_vmem [thread:$0]  (!%p13949_p6), %s16359_s16, 2048, %s669_s4, [#allocation18], %s16323_s21, %s16323_s21, %s16325_s25  }
  0x69   : > { %p13539_p13 = pnand %p13538_p12, %p13532_p9 }
  0x6b   : > { %13542 = shalt.err (!%p13539_p13)
}
  0x6c   : > { %s16360_s8 = sld [smem:[#allocation40_spill]]  ;;  %s13779_s4 = smov [#allocation13]  }
  0x6d   : > { %s628_s22 = sshll.u32 %s13779_s4, 4  ;;  %s13780_s26 = smov [#allocation16]   ;;  %s629_s22 = int_to_ptr.vmem [resolvable:$true] %s628_s22 }
  0x6e   : > { %s652_s27 = sshll.u32 %s13780_s26, 4  ;;  %s13554_s0 = scalar_lea.vmem %s629_s22, 16  ;;  %s653_s27 = int_to_ptr.vmem [resolvable:$true] %s652_s27 }
  0x6f   : > { %p13555_p0 = scmp.ne.s32.totalorder %s629_s22, %s13554_s0  ;;  %s13561_s19 = scalar_lea.vmem %s629_s22, 32 }
  0x70   : > { %p13562_p8 = scmp.lt.s32.totalorder %s629_s22, %s629_s22  ;;  %p13563_p9 = scmp.lt.s32.totalorder %s13561_s19, %s13554_s0 }
  0x71   : > { %p13557_p2 = pnand %p13555_p0, %p13959_p7 }
  0x72   : > { %12944 = dma.hbm_to_vmem [thread:$0]  (!%p13949_p6), %s16360_s8, 2048, %s599_s5, [#allocation9], %s16323_s21, %s16323_s21, %s16325_s25  }
  0x73   : > { %p13558_p5 = pneg %p13557_p2  ;;  %p13564_p10 = por %p13563_p9, %p13562_p8 }
  0x75   : > { %p13565_p11 = pnand %p13564_p10, %p13558_p5 }
  0x77   : > { %13568 = shalt.err (!%p13565_p11)
}
  0x78   : > { %s16361_s11 = sld [smem:[#allocation42_spill]]  ;;  %s13580_s24 = scalar_lea.vmem %s653_s27, 16 }
  0x79   : > { %p13581_p12 = scmp.ne.s32.totalorder %s653_s27, %s13580_s24  ;;  %s13587_s4 = scalar_lea.vmem %s653_s27, 32 }
  0x7a   : > { %p13588_p0 = scmp.lt.s32.totalorder %s653_s27, %s653_s27  ;;  %p13589_p2 = scmp.lt.s32.totalorder %s13587_s4, %s13580_s24 }
  0x7b   : > { %p13583_p13 = pnand %p13581_p12, %p13959_p7 }
  0x7c   : > { %p13590_p1 = por %p13589_p2, %p13588_p0 }
  0x7d   : > { %p13584_p4 = pneg %p13583_p13 }
  0x7e   : > { %12950 = dma.hbm_to_vmem [thread:$0]  (!%p13949_p6), %s16361_s11, 16, %s629_s22, [#allocation12]  }
  0x7f   : > { %p13591_p3 = pnand %p13590_p1, %p13584_p4 }
  0x81   : > { %13594 = shalt.err (!%p13591_p3)
}
  0x82   : > { %s16362_s13 = sld [smem:[#allocation44_spill]]  ;;  %s13781_s0 = smov [#allocation19]  }
  0x83   : > { %s684_s22 = sshll.u32 %s13781_s0, 4  ;;  %s685_s22 = int_to_ptr.vmem [resolvable:$true] %s684_s22 }
  0x84   : > { %s13606_s5 = scalar_lea.vmem %s685_s22, 2048  ;;  %p13614_p10 = scmp.lt.s32.totalorder %s685_s22, %s685_s22 }
  0x85   : > { %p13607_p5 = scmp.ne.s32.totalorder %s685_s22, %s13606_s5  ;;  %p13615_p11 = scmp.lt.s32.totalorder %s13606_s5, %s13606_s5 }
  0x87   : > { %p13609_p8 = pnand %p13607_p5, %p13959_p7  ;;  %p13616_p12 = por %p13615_p11, %p13614_p10 }
  0x88   : > { %12956 = dma.hbm_to_vmem [thread:$0]  (!%p13949_p6), %s16362_s13, 16, %s653_s27, [#allocation15]  }
  0x89   : > { %p13610_p9 = pneg %p13609_p8 }
  0x8b   : > { %p13617_p1 = pnand %p13616_p12, %p13610_p9 }
  0x8d   : > { %13620 = shalt.err (!%p13617_p1)
}
  0x8e   : > { %s16363_s20 = smov 4   ;;  %s16364_s24 = smov 64  }
  0x8f   : > { %s16365_s18 = sld [smem:[#allocation46_spill]]  ;;  %s12274_s6 = sadd.s32 4294967294, %s13765_s30  }
  0x90   : > { %s14052_s2 = sadd.s32 1, %s13765_s30   ;;  %s52_s19 = sadd.s32 1, %s13761_s29 }
  0x91   : > { %16366 = sst [smem:[#allocation30_spill]] %s14052_s2  ;;  %s49_s26 = ssub.s32 %s13765_s30, %s14052_s2 }
  0x92   : > { %p59_p3 = scmp.ne.s32.totalorder %s13761_s29, %s13757_s28  ;;  %p50_p4 = scmp.eq.s32.totalorder %s49_s26, 0 }
  0x93   : > { %p60_p7 = scmp.eq.s32.totalorder %s13765_s30, 0  ;;  %p65_p13 = scmp.ne.s32.totalorder %s13757_s28, %s13753_s3 }
  0x94   : > { %p535_p0 = scmp.eq.s32.totalorder %s13935_s23, 1  ;;  %p16368_p5 = scmp.eq.s32.totalorder %s13935_s23, 0 }
  0x95   : > { %12962 = dma.hbm_to_vmem [thread:$0]  (!%p13949_p6), %s16365_s18, 2048, %s685_s22, [#allocation18], %s16364_s24, %s16364_s24, %s16363_s20  }
  0x96   : > { %s14064_s0 = scalar_select %p50_p4, %s13761_s29, %s52_s19  }
  0x97   : > { %p61_p2 = por %p60_p7, %p59_p3  ;;  %p14068_p8 = por %p16368_p5, %p65_p13 }
  0x98   : > { %16367 = sst [smem:[#allocation31_spill]] %s14064_s0  ;;  %p14072_p6 = por %p535_p0, %p59_p3 }
  0x99   : > { %p541_p9 = scmp.eq.s32.totalorder %s12274_s6, 1  ;;  %p12983_p10 = scmp.lt.s32.totalorder %s13765_s30, 2 }
  0x9a   : > { %s16370_s22 = scalar_select %p14072_p6, 1, 0 }
  0x9b   : > { %s707_s20 = sand.u32 1, %s13761_s29   ;;  %p14078_p11 = por %p541_p9, %p65_p13 }
  0x9c   : > { %s14082_s4 = sshll.u32 %s707_s20, 4  ;;  %s12496_s27 = sshll.u32 %s13765_s30, 8 }
  0x9d   : > { %s16371_s24 = scalar_select %p14078_p11, 1, 0 }
  0x9e   : > { %s16373_s21 = sld [smem:[#allocation33_spill]]  ;;  %s711_s8 = scalar_lea.vmem [#allocation2], %s14082_s4 }
  0x9f   : > { %16372 = sst [smem:[#allocation32_spill]] %s16371_s24  ;;  %s718_s6 = sshll.u32 %s711_s8, 4  ;;  %s14095_s6 = int_to_ptr.vmem [resolvable:$true] %s718_s6 }
  0xa0   : > { %p14091_p12 = pnand %p12983_p10, %p61_p2  ;;  %s16375_s13 = sld [smem:[#allocation34_spill]] }
  0xa1   : > { %s14102_s19 = scalar_lea.sflag [#allocation3], %s707_s20 }
  0xa2   : > { %p13623_p3 = pneg %p14091_p12 }
  0xa4   : > { %s14088_s25 = scalar_lea.hbm %s16373_s21, %s12496_s27  ;;  %s13626_s0 = scalar_lea.hbm %s16373_s21, 512 }
  0xa5   : > { %s13621_s26 = scalar_lea.hbm %s14088_s25, 256  ;;  %p13627_p13 = scmp.lt.s32.totalorder %s14088_s25, %s16373_s21 }
  0xa6   : > { %s14100_s16 = scalar_lea.hbm %s16375_s13, %s12496_s27  ;;  %p13622_p1 = scmp.ne.s32.totalorder %s14088_s25, %s13621_s26 }
  0xa7   : > { %p13628_p0 = scmp.lt.s32.totalorder %s13626_s0, %s13621_s26 }
  0xa8   : > { %p13624_p4 = pnand %p13623_p3, %p13622_p1 }
  0xa9   : > { %p13629_p2 = por %p13628_p0, %p13627_p13 }
  0xaa   : > { %p13625_p7 = pneg %p13624_p4 }
  0xac   : > { %p13630_p5 = pnand %p13629_p2, %p13625_p7 }
  0xae   : > { %13633 = shalt.err (!%p13630_p5)
}
  0xaf   : > { %s13634_s11 = scalar_lea.vmem %s14095_s6, 256  ;;  %s13782_s12 = smov [#allocation2]  }
  0xb0   : > { %p13635_p9 = scmp.ne.s32.totalorder %s14095_s6, %s13634_s11  ;;  %s13639_s18 = sshll.u32 %s13782_s12, 4  ;;  %s13640_s18 = int_to_ptr.vmem [resolvable:$false] %s13639_s18 }
  0xb1   : > { %s13641_s20 = scalar_lea.vmem %s13640_s18, 512  ;;  %p13642_p4 = scmp.lt.s32.totalorder %s14095_s6, %s13640_s18 }
  0xb2   : > { %p13637_p10 = pnand %p13635_p9, %p13623_p3  ;;  %p13643_p11 = scmp.lt.s32.totalorder %s13641_s20, %s13634_s11 }
  0xb4   : > { %p13638_p1 = pneg %p13637_p10  ;;  %p13644_p6 = por %p13643_p11, %p13642_p4 }
  0xb6   : > { %p13645_p13 = pnand %p13644_p6, %p13638_p1 }
  0xb8   : > { %13648 = shalt.err (!%p13645_p13)
}
  0xb9   : > { %s16376_s29 = smov 8   ;;  %s16377_s2 = smov 128  }
  0xba   : > { %12966 = dma.hbm_to_vmem [thread:$0]  (!%p14091_p12), %s14088_s25, 256, %s14095_s6, %s14102_s19, %s16377_s2, %s16377_s2, %s16376_s29  }
  0xbb   : > { %s732_s0 = scalar_lea.vmem [#allocation5], %s14082_s4  ;;  %s728_s26 = sand.u32 1, %s13765_s30  }
  0xbc   : > { %s739_s27 = sshll.u32 %s732_s0, 4  ;;  %s729_s8 = scalar_lea.sflag [#allocation6], %s728_s26  ;;  %s14134_s27 = int_to_ptr.vmem [resolvable:$true] %s739_s27 }
  0xbd   : > { %s13649_s11 = scalar_lea.hbm %s14100_s16, 256  ;;  %s13654_s20 = scalar_lea.hbm %s16375_s13, 512 }
  0xbe   : > { %p13650_p6 = scmp.ne.s32.totalorder %s14100_s16, %s13649_s11  ;;  %p13655_p0 = scmp.lt.s32.totalorder %s14100_s16, %s16375_s13 }
  0xbf   : > { %p13656_p2 = scmp.lt.s32.totalorder %s13654_s20, %s13649_s11 }
  0xc0   : > { %p13652_p11 = pnand %p13650_p6, %p13623_p3 }
  0xc1   : > { %p13657_p5 = por %p13656_p2, %p13655_p0 }
  0xc2   : > { %p13653_p7 = pneg %p13652_p11 }
  0xc4   : > { %p13658_p9 = pnand %p13657_p5, %p13653_p7 }
  0xc6   : > { %13661 = shalt.err (!%p13658_p9)
}
  0xc7   : > { %s13662_s25 = scalar_lea.vmem %s14134_s27, 256  ;;  %s13783_s4 = smov [#allocation5]  }
  0xc8   : > { %p13663_p10 = scmp.ne.s32.totalorder %s14134_s27, %s13662_s25  ;;  %s13667_s6 = sshll.u32 %s13783_s4, 4  ;;  %s13668_s6 = int_to_ptr.vmem [resolvable:$false] %s13667_s6 }
  0xc9   : > { %s13669_s19 = scalar_lea.vmem %s13668_s6, 512  ;;  %p13670_p13 = scmp.lt.s32.totalorder %s14134_s27, %s13668_s6 }
  0xca   : > { %p13665_p1 = pnand %p13663_p10, %p13623_p3  ;;  %p13671_p6 = scmp.lt.s32.totalorder %s13669_s19, %s13662_s25 }
  0xcc   : > { %p13666_p4 = pneg %p13665_p1  ;;  %p13672_p11 = por %p13671_p6, %p13670_p13 }
  0xce   : > { %p13673_p0 = pnand %p13672_p11, %p13666_p4 }
  0xd0   : > { %13676 = shalt.err (!%p13673_p0)
}
  0xd1   : > { %12969 = dma.hbm_to_vmem [thread:$0]  (!%p14091_p12), %s14100_s16, 256, %s14134_s27, %s729_s8, %s16377_s2, %s16377_s2, %s16376_s29  }
  0xd2   : > { %p16378_p3 = scmp.ne.s32.totalorder %s16352_s1, 0 }
  0xd3   : > { %s14164_s21 = sand.u32 (!%p16378_p3), 1, %s13757_s28  }
  0xd4   : > { %751 = sbr.rel (%p16378_p3) target bundleno = 5138 (0x1412), region = 108  ;;  %s14167_s24 = sshll.u32 (!%p16378_p3), %s14164_s21, 4 }
  0xd5   : > { %s754_s0 = scalar_lea.sflag (!%p16378_p3), [#allocation3], %s14164_s21  ;;  %s757_s10 = scalar_lea.vmem (!%p16378_p3), [#allocation2], %s14167_s24 }
  0xd9   : > { %13720 = dma.done.wait (%p14068_p8), %s754_s0, 256  }
  0xda   : > { %13722 = vsyncadd (%p14068_p8), %s754_s0, 4294967040  ;;  %s762_s16 = sand.u32 1, %s13935_s23   ;;  %s14177_s29 = scalar_lea.vmem [#allocation5], %s14167_s24 }
  0xdb   : > { %s763_s1 = scalar_lea.sflag [#allocation6], %s762_s16 }
  0xdc   : > { %13724 = dma.done.wait (%p14068_p8), %s763_s1, 256  }
  0xdd   : > { %13726 = vsyncadd (%p14068_p8), %s763_s1, 4294967040  ;;  %p16379_p12 = scmp.eq.s32.totalorder %s13935_s23, 0 }
  0xdf   : > { %13728 = dma.done.wait (%p16379_p12), [#allocation6], 3072   ;;  %p16380_p7 = pmov %p16379_p12 }
  0xe1   : > { %13730 = vsyncadd (%p16380_p7), [#allocation6], 4294964224  ;;  %p16381_p2 = pmov %p16380_p7 }
  0xe3   : > { %13732 = dma.done.wait (%p16381_p2), [#allocation9], 3072   ;;  %p16382_p5 = pmov %p16381_p2 }
  0xe4   : > { %p16383_p9 = pmov %p16381_p2 }
  0xe5   : > { %13734 = vsyncadd (%p16382_p5), [#allocation9], 4294964224 }
  0xe6   : > { %13736 = dma.done.wait (%p16383_p9), [#allocation12], 1040   ;;  %p16384_p10 = pmov %p16381_p2 }
  0xe7   : > { %p16385_p8 = pmov %p16381_p2 }
  0xe8   : > { %13738 = vsyncadd (%p16384_p10), [#allocation12], 4294966256 }
  0xe9   : > { %13740 = dma.done.wait (%p16385_p8), [#allocation15], 1040   ;;  %p16386_p1 = pmov %p16381_p2 }
  0xeb   : > { %13742 = vsyncadd (%p16386_p1), [#allocation15], 4294966256  ;;  %p16387_p4 = pmov %p16386_p1 }
  0xec   : > { %p16388_p13 = pmov %p16386_p1 }
  0xed   : > { %13744 = dma.done.wait (%p16387_p4), [#allocation18], 4096  }
  0xee   : > { %13746 = vsyncadd (%p16388_p13), [#allocation18], 4294963200  ;;  %v13784_v0 = vmov 0   ;;  %v13125_v1 = vld [vmem:[#allocation7 + $0xac] ss:$12 sps:$4 sm:$0xff]   ;;  %v871_v17 = vld [vmem:[%s14177_s29] sm:$0xff]  ;;  %v908_v23 = vlaneseq }
  0xef   : > { %1083 = vmatprep.mubr.bf16.mxu0 %v13784_v0  ;;  %v13127_v2 = vld [vmem:[#allocation7 + $0xa8] ss:$12 sps:$4 sm:$0xff]   ;;  %1051 = vmatprep.subr.bf16.mxu0 %v13125_v1  ;;  %v13130_v4 = vld [vmem:[#allocation7 + $0x90] ss:$12 sps:$4 sm:$0xff]   ;;  %v13133_v6 = vld [vmem:[#allocation7 + $0x78] ss:$12 sps:$4 sm:$0xff]  }
  0xf0   : > { %v13128_v3 = vld [vmem:[#allocation7 + $0x94] ss:$12 sps:$4 sm:$0xff]   ;;  %1052 = vmatpush1.bf16.msra.mxu0 %v13127_v2  ;;  %v13131_v5 = vld [vmem:[#allocation7 + $0x7c] ss:$12 sps:$4 sm:$0xff]   ;;  %v13134_v7 = vld [vmem:[#allocation7 + $0x64] ss:$12 sps:$4 sm:$0xff]  }
  0xf1   : > { %1053 = vmatprep.subr.bf16.mxu0 %v13128_v3  ;;  %v13136_v8 = vld [vmem:[#allocation7 + $0x60] ss:$12 sps:$4 sm:$0xff]   ;;  %v13139_v10 = vld [vmem:[#allocation7 + $0x48] ss:$12 sps:$4 sm:$0xff]   ;;  %v13142_v12 = vld [vmem:[#allocation7 + $0x30] ss:$12 sps:$4 sm:$0xff]  }
  0xf2   : > { %v13137_v9 = vld [vmem:[#allocation7 + $0x4c] ss:$12 sps:$4 sm:$0xff]   ;;  %v13140_v11 = vld [vmem:[#allocation7 + $0x34] ss:$12 sps:$4 sm:$0xff]   ;;  %v13143_v13 = vld [vmem:[#allocation7 + $0x1c] ss:$12 sps:$4 sm:$0xff]  }
  0xf3   : > { %v13145_v14 = vld [vmem:[#allocation7 + $0x18] ss:$12 sps:$4 sm:$0xff]   ;;  %v13148_v16 = vld [vmem:[#allocation7] ss:$12 sps:$4 sm:$0xff]   ;;  %v13149_v20 = vld [vmem:[#allocation7 + $0xb0] ss:$12 sps:$4 sm:$0xff]  }
  0xf4   : > { %1054 = vmatpush1.bf16.msra.mxu0 %v13130_v4  ;;  %v13146_v15 = vld [vmem:[#allocation7 + $0x4] ss:$12 sps:$4 sm:$0xff]   ;;  %v872_v18 = vld [vmem:[%s14177_s29 + $0x8] sm:$0xff]  ;;  %v13785_v21 = vmov 0.0   ;;  %v14211_v24 = vshrl.u32 %v908_v23, 7  ;;  %s16389_s27 = sld [smem:[#allocation36_spill]] }
  0xf5   : > { %1055 = vmatprep.subr.bf16.mxu0 %v13131_v5  ;;  %v873_v19 = vpack.c.bf16 %v872_v18, %v871_v17  ;;  %12621 = vmatprep.subr.bf16.mxu1 %v13785_v21  ;;  %v13150_v22 = vld [vmem:[#allocation7 + $0x98] ss:$12 sps:$4 sm:$0xff]   ;;  %v13151_v25 = vld [vmem:[#allocation7 + $0x80] ss:$12 sps:$4 sm:$0xff]   ;;  %v13152_v27 = vld [vmem:[#allocation7 + $0x68] ss:$12 sps:$4 sm:$0xff]  }
  0xf6   : > { %12622 = vmatpush3.bf16.msra.mxu1 %v13149_v20  ;;  %v14215_v26 = vsub.s32 0, %v14211_v24  ;;  %v13153_v30 = vld [vmem:[#allocation7 + $0x50] ss:$12 sps:$4 sm:$0xff]   ;;  %v14228_v33 = vsub.s32 1, %v14211_v24  ;;  %v13154_v34 = vld [vmem:[#allocation7 + $0x38] ss:$12 sps:$4 sm:$0xff]  }
  0xf7   : > { %12623 = vmatprep.subr.bf16.mxu1 %v13785_v21  ;;  %s13786_s26 = smov 80   ;;  %s13787_s8 = smov 112   ;;  %v13155_v36 = vld [vmem:[#allocation7 + $0x20] ss:$12 sps:$4 sm:$0xff]   ;;  %v13156_v40 = vld [vmem:[#allocation7 + $0x8] ss:$12 sps:$4 sm:$0xff]  }
  0xf8   : > { %1056 = vmatpush1.bf16.msra.mxu0 %v13133_v6  ;;  %s13788_s11 = smov 64   ;;  %s13789_s12 = smov 96   ;;  %vm13791_vm0 = vmmov 0   ;;  %v13794_v58 = vmov 1983009808   ;;  %vm3314_vm1 = vcmask 130048  }
  0xf9   : > { %1057 = vmatprep.subr.bf16.mxu0 %v13134_v7  ;;  %s13790_s18 = smov 48   ;;  %12637 = vmatprep.mubr.msk.bf16.mxu1 %vm13791_vm0, %v13785_v21  ;;  %s13792_s20 = smov 32   ;;  %v1189_v59 = vunpack.c.l.s4 %v13794_v58  ;;  %v13795_v3 = vmov 1934713408   ;;  %vm6129_vm4 = vcmask 261120   ;;  %vm6132_vm5 = vcmask 392192  }
  0xfa   : > { %12624 = vmatpush3.bf16.msra.mxu1 %v13150_v22  ;;  %v14220_v28 = vld [vmem:[%s16389_s27] sm:$0x7]  ;;  %s13793_s25 = smov 16   ;;  %v1253_v4 = vunpack.c.l.s4 %v13795_v3  ;;  %vm6135_vm6 = vcmask 523264   ;;  %vm6138_vm7 = vcmask 654336   ;;  %vm6141_vm8 = vcmask 785408  }
  0xfb   : > { %12625 = vmatprep.subr.bf16.mxu1 %v13785_v21  ;;  %v911_v29 = vrot.slane %v14220_v28, %v14215_v26  ;;  %v915_v35 = vrot.slane %v14220_v28, %v14228_v33  ;;  %v1190_v62 = vunpack.c.0.s8 %v1189_v59  ;;  %vm6144_vm9 = vcmask 916480   ;;  %s16394_s19 = sld [smem:[#allocation38_spill]]  ;;  %s867_s5 = scalar_lea.vmem [#allocation20], %s14167_s24 }
  0xfc   : > { %1058 = vmatpush1.bf16.msra.mxu0 %v13136_v8  ;;  %s16396_s4 = sld [smem:[#allocation47_spill]]  ;;  %s12093_s2 = sshll.u32 %s867_s5, 4  ;;  %s16250_s2 = int_to_ptr.vmem [resolvable:$true] %s12093_s2 }
  0xfd   : > { %1059 = vmatprep.subr.bf16.mxu0 %v13137_v9  ;;  %v14325_v5 = vsub.s32 %v1190_v62, %v14211_v24  ;;  %s16397_s0 = sld [smem:[#allocation48_spill]]  ;;  %p16400_p11 = scmp.ne.s32.totalorder %s16370_s22, 0 }
  0xfe   : > { %12626 = vmatpush3.bf16.msra.mxu1 %v13151_v25  ;;  %s16398_s1 = sld [smem:[#allocation49_spill]] }
  0xff   : > { %12627 = vmatprep.subr.bf16.mxu1 %v13785_v21 }
 0x100   : > { %1060 = vmatpush1.bf16.msra.mxu0 %v13139_v10 }
 0x101   : > { %1061 = vmatprep.subr.bf16.mxu0 %v13140_v11 }
 0x102   : > { %12628 = vmatpush3.bf16.msra.mxu1 %v13152_v27 }
 0x103   : > { %12629 = vmatprep.subr.bf16.mxu1 %v13785_v21 }
 0x104   : > { %1062 = vmatpush1.bf16.msra.mxu0 %v13142_v12 }
 0x105   : > { %1063 = vmatprep.subr.bf16.mxu0 %v13143_v13  ;;  %v1254_v13 = vunpack.c.0.s8 %v1253_v4 }
 0x106   : > { %12630 = vmatpush3.bf16.msra.mxu1 %v13153_v30 }
 0x107   : > { %12631 = vmatprep.subr.bf16.mxu1 %v13785_v21 }
 0x108   : > { %1064 = vmatpush1.bf16.msra.mxu0 %v13145_v14 }
 0x109   : > { %1065 = vmatprep.subr.bf16.mxu0 %v13146_v15 }
 0x10a   : > { %12632 = vmatpush3.bf16.msra.mxu1 %v13154_v34 }
 0x10b   : > { %12633 = vmatprep.subr.bf16.mxu1 %v13785_v21 }
 0x10c   : > { %1066 = vmatpush1.bf16.msra.mxu0 %v13148_v16 }
 0x10d   : > { %12665 = vmatprep.subr.bf16.mxu0 %v13785_v21 }
 0x10e   : > { %12634 = vmatpush3.bf16.msra.mxu1 %v13155_v36 }
 0x10f   : > { %1084 = vmatmul.mubr.bf16.vlgmr.msra.gmra.mxu0 %v873_v19  ;;  %12635 = vmatprep.subr.bf16.mxu1 %v13785_v21 }
 0x110   : > { %12667 = vmatprep.mubr.msk.bf16.mxu0 %vm13791_vm0, %v13785_v21 }
 0x112   : > { %12636 = vmatpush3.bf16.msra.mxu1 %v13156_v40 }
 0x113   : > { %12641 = vmatprep.subr.bf16.mxu1 %v13785_v21 }
 0x115   : > { %12638 = vmatmul.mubr.bf16.vlgmr.msra.gmra.mxu1 %v873_v19 }
 0x116   : > { %12643 = vmatprep.mubr.msk.bf16.mxu1 %vm13791_vm0, %v13785_v21 }
 0x1cf   : > { %v1085_v31 = vpop.f32.mrf.mxu0 }
 0x1d0   : > { %v14225_v32 = vadd.f32 %v1085_v31, %v911_v29  ;;  %v14341_v31 = vsub.s32 %v1254_v13, %v14211_v24 }
 0x1d1   : > { %v1087_v37 = vpop.f32.mrf.mxu0 }
 0x1d2   : > { %1156 = vrot.lane.b32.xlu0 %v14225_v32, %s13786_s26  ;;  %1144 = vrot.lane.b32.xlu1 %v14225_v32, %s13787_s8  ;;  %v14242_v38 = vadd.f32 %v1087_v37, %v915_v35 }
 0x1d3   : > { %v1089_v39 = vpop.f32.mrf.mxu0 }
 0x1d4   : > { %v14249_v41 = vadd.f32 %v1089_v39, %v911_v29 }
 0x1d5   : > { %v1091_v42 = vpop.f32.mrf.mxu0 }
 0x1d6   : > { %1162 = vrot.lane.b32.xlu0 %v14225_v32, %s13788_s11  ;;  %1150 = vrot.lane.b32.xlu1 %v14225_v32, %s13789_s12  ;;  %v14278_v43 = vadd.f32 %v1091_v42, %v915_v35 }
 0x1da   : > { %1168 = vrot.lane.b32.xlu0 %v14225_v32, %s13790_s18  ;;  %1482 = vrot.lane.b32.xlu1 %v14242_v38, %s13789_s12 }
 0x1de   : > { %1174 = vrot.lane.b32.xlu0 %v14225_v32, %s13792_s20  ;;  %1152 = vrot.lane.b32.xlu1 %v14249_v41, %s13789_s12 }
 0x1e2   : > { %1476 = vrot.lane.b32.xlu0 %v14242_v38, %s13787_s8  ;;  %1158 = vrot.lane.b32.xlu1 %v14249_v41, %s13786_s26 }
 0x1e6   : > { %1488 = vrot.lane.b32.xlu0 %v14242_v38, %s13786_s26  ;;  %1164 = vrot.lane.b32.xlu1 %v14249_v41, %s13788_s11 }
 0x1ea   : > { %1494 = vrot.lane.b32.xlu0 %v14242_v38, %s13788_s11  ;;  %1170 = vrot.lane.b32.xlu1 %v14249_v41, %s13790_s18 }
 0x1ee   : > { %1500 = vrot.lane.b32.xlu0 %v14242_v38, %s13790_s18  ;;  %1176 = vrot.lane.b32.xlu1 %v14249_v41, %s13792_s20 }
 0x1f2   : > { %1506 = vrot.lane.b32.xlu0 %v14242_v38, %s13792_s20  ;;  %1484 = vrot.lane.b32.xlu1 %v14278_v43, %s13789_s12 }
 0x1f6   : > { %1512 = vrot.lane.b32.xlu0 %v14242_v38, %s13793_s25  ;;  %1490 = vrot.lane.b32.xlu1 %v14278_v43, %s13786_s26 }
 0x1fa   : > { %1146 = vrot.lane.b32.xlu0 %v14249_v41, %s13787_s8  ;;  %1496 = vrot.lane.b32.xlu1 %v14278_v43, %s13788_s11 }
 0x1fe   : > { %1478 = vrot.lane.b32.xlu0 %v14278_v43, %s13787_s8  ;;  %1502 = vrot.lane.b32.xlu1 %v14278_v43, %s13790_s18 }
 0x202   : > { %1508 = vrot.lane.b32.xlu1 %v14278_v43, %s13792_s20 }
 0x206   : > { %1514 = vrot.lane.b32.xlu1 %v14278_v43, %s13793_s25 }
 0x244   : > { %v14300_v44 = vpop.permute.xlu0 %1156  ;;  %v14302_v45 = vpop.permute.xlu1 %1144 }
 0x248   : > { %v14304_v46 = vpop.permute.xlu0 %1162  ;;  %v14306_v47 = vpop.permute.xlu1 %1150 }
 0x24c   : > { %v14308_v48 = vpop.permute.xlu0 %1168  ;;  %v1483_v49 = vpop.permute.xlu1 %1482 }
 0x24d   : > { %v1518_v6 = vcombine.low %v14242_v38, %v1483_v49  ;;  %v1519_v14 = vcombine.high %v14242_v38, %v1483_v49 }
 0x24f   : > { %v1526_v17 = vrot.slane %v1518_v6, %v14325_v5  ;;  %v1533_v34 = vrot.slane %v1519_v14, %v14325_v5 }
 0x250   : > { %v14310_v50 = vpop.permute.xlu0 %1174  ;;  %v14312_v51 = vpop.permute.xlu1 %1152 }
 0x254   : > { %v1477_v52 = vpop.permute.xlu0 %1476  ;;  %v14314_v53 = vpop.permute.xlu1 %1158 }
 0x258   : > { %v1489_v54 = vpop.permute.xlu0 %1488  ;;  %v14316_v55 = vpop.permute.xlu1 %1164 }
 0x259   : > { %v1534_v63 = vcombine.low %v1477_v52, %v1489_v54  ;;  %v1535_v7 = vcombine.high %v1477_v52, %v1489_v54 }
 0x25b   : > { %v1542_v10 = vrot.slane %v1534_v63, %v14325_v5  ;;  %v1549_v18 = vrot.slane %v1535_v7, %v14325_v5 }
 0x25c   : > { %v1495_v56 = vpop.permute.xlu0 %1494  ;;  %v14318_v57 = vpop.permute.xlu1 %1170 }
 0x25d   : > { %v1582_v30 = vcombine.low %v1526_v17, %v1542_v10  ;;  %v1598_v39 = vcombine.low %v1533_v34, %v1549_v18  ;;  %v1583_v40 = vcombine.high %v1526_v17, %v1542_v10  ;;  %v1599_v62 = vcombine.high %v1533_v34, %v1549_v18 }
 0x25f   : > { %v1590_v52 = vrot.slane %v1582_v30, %v14341_v31  ;;  %v1597_v3 = vrot.slane %v1583_v40, %v14341_v31  ;;  %v1613_v13 = vrot.slane %v1599_v62, %v14341_v31 }
 0x260   : > { %v1501_v60 = vpop.permute.xlu0 %1500  ;;  %v14320_v61 = vpop.permute.xlu1 %1176 }
 0x264   : > { %v1507_v1 = vpop.permute.xlu0 %1506  ;;  %v14322_v2 = vpop.permute.xlu1 %1484 }
 0x265   : > { %v1550_v8 = vcombine.low %v1495_v56, %v1507_v1  ;;  %v1551_v9 = vcombine.high %v1495_v56, %v1507_v1  ;;  %v1606_v1 = vrot.slane %v1598_v39, %v14341_v31 }
 0x267   : > { %v1558_v19 = vrot.slane %v1550_v8, %v14325_v5  ;;  %v1565_v20 = vrot.slane %v1551_v9, %v14325_v5  ;;  %v1654_v9 = vcombine.low %v14278_v43, %v14322_v2 }
 0x268   : > { %v1513_v11 = vpop.permute.xlu0 %1512  ;;  %v14329_v12 = vpop.permute.xlu1 %1490 }
 0x269   : > { %v1566_v15 = vcombine.low %v1501_v60, %v1513_v11  ;;  %v1567_v16 = vcombine.high %v1501_v60, %v1513_v11 }
 0x26b   : > { %v1574_v22 = vrot.slane %v1566_v15, %v14325_v5  ;;  %v1581_v25 = vrot.slane %v1567_v16, %v14325_v5 }
 0x26c   : > { %v14338_v27 = vpop.permute.xlu0 %1146  ;;  %v1497_v29 = vpop.permute.xlu1 %1496 }
 0x26d   : > { %v1614_v35 = vcombine.low %v1558_v19, %v1574_v22  ;;  %v1630_v36 = vcombine.low %v1565_v20, %v1581_v25  ;;  %v1615_v37 = vcombine.high %v1558_v19, %v1574_v22  ;;  %v1631_v54 = vcombine.high %v1565_v20, %v1581_v25 }
 0x26e   : > { %v1662_v25 = vrot.slane %v1654_v9, %v14325_v5 }
 0x26f   : > { %v1622_v38 = vrot.slane %v1614_v35, %v14341_v31  ;;  %v1638_v56 = vrot.slane %v1630_v36, %v14341_v31  ;;  %v1629_v58 = vrot.slane %v1615_v37, %v14341_v31  ;;  %v1645_v8 = vrot.slane %v1631_v54, %v14341_v31 }
 0x270   : > { %v1479_v42 = vpop.permute.xlu0 %1478  ;;  %v1503_v49 = vpop.permute.xlu1 %1502  ;;  %v1655_v36 = vcombine.high %v14278_v43, %v14322_v2 }
 0x271   : > { %v1647_v59 = vcombine.high %v1590_v52, %v1622_v38  ;;  %v1646_v60 = vcombine.low %v1590_v52, %v1622_v38  ;;  %v1670_v63 = vcombine.low %v1479_v42, %v14329_v12  ;;  %v1650_v10 = vcombine.low %v1606_v1, %v1638_v56 }
 0x272   : > { %v1648_v11 = vcombine.low %v1597_v3, %v1629_v58  ;;  %v1671_v14 = vcombine.high %v1479_v42, %v14329_v12  ;;  %v1652_v20 = vcombine.low %v1613_v13, %v1645_v8  ;;  %v1649_v22 = vcombine.high %v1597_v3, %v1629_v58 }
 0x273   : > { %v1791_v6 = vpack.c.bf16 %v1647_v59, %v1647_v59  ;;  %v1790_v7 = vpack.c.bf16 %v1646_v60, %v1646_v60  ;;  %v1678_v15 = vrot.slane %v1670_v63, %v14325_v5  ;;  %v1794_v18 = vpack.c.bf16 %v1650_v10, %v1650_v10 }
 0x274   : > { %v1509_v4 = vpop.permute.xlu1 %1508  ;;  %v1792_v19 = vpack.c.bf16 %v1648_v11, %v1648_v11  ;;  %v1685_v40 = vrot.slane %v1671_v14, %v14325_v5  ;;  %v1796_v42 = vpack.c.bf16 %v1652_v20, %v1652_v20  ;;  %v1793_v52 = vpack.c.bf16 %v1649_v22, %v1649_v22 }
 0x275   : > { %2314 = vxpose.xlu1.c.b16.start.end [1/1] (short) (narrow) %v1791_v6, 16  ;;  %2298 = vxpose.xlu0.c.b16.start.end [1/1] (short) (narrow) %v1790_v7, 16  ;;  %v1686_v16 = vcombine.low %v1497_v29, %v1509_v4  ;;  %v1687_v30 = vcombine.high %v1497_v29, %v1509_v4  ;;  %v1718_v39 = vcombine.low %v1662_v25, %v1678_v15 }
 0x276   : > { %v1651_v54 = vcombine.high %v1606_v1, %v1638_v56  ;;  %v1719_v58 = vcombine.high %v1662_v25, %v1678_v15  ;;  %v1669_v43 = vrot.slane %v1655_v36, %v14325_v5  ;;  %v1653_v4 = vcombine.high %v1613_v13, %v1645_v8 }
 0x277   : > { %v1694_v12 = vrot.slane %v1686_v16, %v14325_v5  ;;  %v1701_v29 = vrot.slane %v1687_v30, %v14325_v5  ;;  %v1726_v2 = vrot.slane %v1718_v39, %v14341_v31  ;;  %v14378_v39 = vpop.f32.mrf.mxu1 }
 0x278   : > { %v1515_v17 = vpop.permute.xlu1 %1514  ;;  %v1795_v3 = vpack.c.bf16 %v1651_v54, %v1651_v54  ;;  %v1733_v56 = vrot.slane %v1719_v58, %v14341_v31  ;;  %v1734_v1 = vcombine.low %v1669_v43, %v1685_v40  ;;  %v1797_v14 = vpack.c.bf16 %v1653_v4, %v1653_v4 }
 0x279   : > { %v1702_v34 = vcombine.low %v1503_v49, %v1515_v17  ;;  %v1703_v35 = vcombine.high %v1503_v49, %v1515_v17  ;;  %2362 = vxpose.xlu1.c.b16.start.end [1/1] (short) (narrow) %v1794_v18, 16  ;;  %2330 = vxpose.xlu0.c.b16.start.end [1/1] (short) (narrow) %v1792_v19, 16  ;;  %v1735_v17 = vcombine.high %v1669_v43, %v1685_v40  ;;  %v12639_v40 = vpop.f32.mrf.mxu1 }
 0x27a   : > { %v1742_v16 = vrot.slane %v1734_v1, %v14341_v31 }
 0x27b   : > { %v1710_v37 = vrot.slane %v1702_v34, %v14325_v5  ;;  %v1717_v38 = vrot.slane %v1703_v35, %v14325_v5  ;;  %v1749_v22 = vrot.slane %v1735_v17, %v14341_v31 }
 0x27d   : > { %v1750_v49 = vcombine.low %v1694_v12, %v1710_v37  ;;  %v1751_v59 = vcombine.high %v1694_v12, %v1710_v37  ;;  %2394 = vxpose.xlu1.c.b16.start.end [1/1] (short) (narrow) %v1796_v42, 16  ;;  %2346 = vxpose.xlu0.c.b16.start.end [1/1] (short) (narrow) %v1793_v52, 16  ;;  %v1766_v63 = vcombine.low %v1701_v29, %v1717_v38  ;;  %v14380_v42 = vpop.f32.mrf.mxu1 }
 0x27e   : > { %v1767_v11 = vcombine.high %v1701_v29, %v1717_v38 }
 0x27f   : > { %v1758_v60 = vrot.slane %v1750_v49, %v14341_v31  ;;  %v1765_v62 = vrot.slane %v1751_v59, %v14341_v31  ;;  %v1774_v10 = vrot.slane %v1766_v63, %v14341_v31  ;;  %v12640_v52 = vpop.f32.mrf.mxu1 }
 0x280   : > { %v1781_v8 = vrot.slane %v1767_v11, %v14341_v31 }
 0x281   : > { %v1782_v6 = vcombine.low %v1726_v2, %v1758_v60  ;;  %2378 = vxpose.xlu0.c.b16.start.end [1/1] (short) (narrow) %v1795_v3, 16  ;;  %v1784_v9 = vcombine.low %v1733_v56, %v1765_v62  ;;  %v1783_v15 = vcombine.high %v1726_v2, %v1758_v60  ;;  %v1786_v19 = vcombine.low %v1742_v16, %v1774_v10 }
 0x282   : > { %v1785_v20 = vcombine.high %v1733_v56, %v1765_v62  ;;  %v1788_v30 = vcombine.low %v1749_v22, %v1781_v8  ;;  %v1787_v35 = vcombine.high %v1742_v16, %v1774_v10  ;;  %v1789_v37 = vcombine.high %v1749_v22, %v1781_v8 }
 0x283   : > { %v1798_v7 = vpack.c.bf16 %v1782_v6, %v1782_v6  ;;  %v1800_v18 = vpack.c.bf16 %v1784_v9, %v1784_v9  ;;  %v1799_v13 = vpack.c.bf16 %v1783_v15, %v1783_v15  ;;  %v1802_v25 = vpack.c.bf16 %v1786_v19, %v1786_v19 }
 0x284   : > { %v1801_v34 = vpack.c.bf16 %v1785_v20, %v1785_v20  ;;  %v1804_v36 = vpack.c.bf16 %v1788_v30, %v1788_v30  ;;  %v1803_v12 = vpack.c.bf16 %v1787_v35, %v1787_v35  ;;  %v1805_v38 = vpack.c.bf16 %v1789_v37, %v1789_v37 }
 0x285   : > { %2426 = vxpose.xlu1.c.b16.start.end [1/1] (short) (narrow) %v1798_v7, 16  ;;  %2410 = vxpose.xlu0.c.b16.start.end [1/1] (short) (narrow) %v1797_v14, 16 }
 0x289   : > { %2458 = vxpose.xlu1.c.b16.start.end [1/1] (short) (narrow) %v1800_v18, 16  ;;  %2442 = vxpose.xlu0.c.b16.start.end [1/1] (short) (narrow) %v1799_v13, 16 }
 0x28d   : > { %2490 = vxpose.xlu1.c.b16.start.end [1/1] (short) (narrow) %v1802_v25, 16  ;;  %2474 = vxpose.xlu0.c.b16.start.end [1/1] (short) (narrow) %v1801_v34, 16 }
 0x291   : > { %2522 = vxpose.xlu1.c.b16.start.end [1/1] (short) (narrow) %v1804_v36, 16  ;;  %2506 = vxpose.xlu0.c.b16.start.end [1/1] (short) (narrow) %v1803_v12, 16 }
 0x295   : > { %1182 = vrot.lane.b32.xlu1 %v14249_v41, %s13793_s25  ;;  %2538 = vxpose.xlu0.c.b16.start.end [1/1] (short) (narrow) %v1805_v38, 16 }
 0x29e   : > { %1180 = vrot.lane.b32.xlu0 %v14225_v32, %s13793_s25 }
 0x2d7   : > { %v14382_v54 = vpop.trf.xlu0  ;;  %v2322_v29 = vpop.trf.xlu1 }
 0x2db   : > { %v2338_v49 = vpop.trf.xlu0  ;;  %v2370_v58 = vpop.trf.xlu1 }
 0x2dc   : > { %v2554_v56 = vcombine.low %v14382_v54, %v2370_v58  ;;  %v2555_v17 = vcombine.high %v14382_v54, %v2370_v58 }
 0x2de   : > { %v2562_v18 = vrot.slane %v2554_v56, %v14325_v5 }
 0x2df   : > { %v2354_v59 = vpop.trf.xlu0  ;;  %v2402_v43 = vpop.trf.xlu1 }
 0x2e0   : > { %v2570_v1 = vcombine.low %v2338_v49, %v2402_v43  ;;  %v2571_v9 = vcombine.high %v2338_v49, %v2402_v43 }
 0x2e2   : > { %v2578_v19 = vrot.slane %v2570_v1, %v14325_v5  ;;  %v14391_v20 = vrot.slane %v2571_v9, %v14325_v5 }
 0x2e3   : > { %v2386_v2 = vpop.trf.xlu0 }
 0x2e4   : > { %v2690_v14 = vcombine.low %v2322_v29, %v2386_v2  ;;  %v2691_v22 = vcombine.high %v2322_v29, %v2386_v2  ;;  %v2618_v49 = vcombine.low %v2562_v18, %v2578_v19  ;;  %v2619_v58 = vcombine.high %v2562_v18, %v2578_v19 }
 0x2e6   : > { %v2698_v34 = vrot.slane %v2690_v14, %v14325_v5  ;;  %v2626_v14 = vrot.slane %v2618_v49, %v14341_v31 }
 0x2e7   : > { %v2434_v60 = vpop.trf.xlu1  ;;  %v2418_v62 = vpop.trf.xlu0 }
 0x2e8   : > { %v2706_v7 = vcombine.low %v2354_v59, %v2418_v62  ;;  %v2707_v35 = vcombine.high %v2354_v59, %v2418_v62  ;;  %v2705_v59 = vrot.slane %v2691_v22, %v14325_v5 }
 0x2ea   : > { %v2714_v8 = vrot.slane %v2706_v7, %v14325_v5  ;;  %v2721_v62 = vrot.slane %v2707_v35, %v14325_v5 }
 0x2eb   : > { %v2466_v63 = vpop.trf.xlu1  ;;  %v2450_v3 = vpop.trf.xlu0 }
 0x2ec   : > { %v2754_v43 = vcombine.low %v2698_v34, %v2714_v8  ;;  %v2755_v1 = vcombine.high %v2698_v34, %v2714_v8 }
 0x2ee   : > { %v2762_v19 = vrot.slane %v2754_v43, %v14341_v31 }
 0x2ef   : > { %v2498_v4 = vpop.trf.xlu1  ;;  %v2482_v6 = vpop.trf.xlu0 }
 0x2f0   : > { %v2586_v10 = vcombine.low %v2434_v60, %v2498_v4  ;;  %v2587_v56 = vcombine.high %v2434_v60, %v2498_v4 }
 0x2f2   : > { %v2594_v25 = vrot.slane %v2586_v10, %v14325_v5  ;;  %v2601_v4 = vrot.slane %v2587_v56, %v14325_v5 }
 0x2f3   : > { %v2530_v11 = vpop.trf.xlu1  ;;  %v2514_v15 = vpop.trf.xlu0 }
 0x2f4   : > { %v2602_v16 = vcombine.low %v2466_v63, %v2530_v11  ;;  %v2722_v30 = vcombine.low %v2450_v3, %v2514_v15  ;;  %v2723_v36 = vcombine.high %v2450_v3, %v2514_v15  ;;  %v2603_v12 = vcombine.high %v2466_v63, %v2530_v11 }
 0x2f5   : > { %v2633_v11 = vrot.slane %v2619_v58, %v14341_v31 }
 0x2f6   : > { %v2610_v13 = vrot.slane %v2602_v16, %v14325_v5  ;;  %v2730_v29 = vrot.slane %v2722_v30, %v14325_v5  ;;  %v2737_v63 = vrot.slane %v2723_v36, %v14325_v5  ;;  %v2617_v3 = vrot.slane %v2603_v12, %v14325_v5 }
 0x2f7   : > { %v2546_v37 = vpop.trf.xlu0  ;;  %v2769_v16 = vrot.slane %v2755_v1, %v14341_v31 }
 0x2f8   : > { %v2650_v38 = vcombine.low %v2594_v25, %v2610_v13  ;;  %v2651_v40 = vcombine.high %v2594_v25, %v2610_v13  ;;  %v2738_v52 = vcombine.low %v2482_v6, %v2546_v37  ;;  %v2739_v54 = vcombine.high %v2482_v6, %v2546_v37 }
 0x2f9   : > { %v2569_v13 = vrot.slane %v2555_v17, %v14325_v5  ;;  %v2666_v22 = vcombine.low %v2601_v4, %v2617_v3  ;;  %v2770_v25 = vcombine.low %v2705_v59, %v2721_v62 }
 0x2fa   : > { %v2746_v2 = vrot.slane %v2738_v52, %v14325_v5  ;;  %v2753_v7 = vrot.slane %v2739_v54, %v14325_v5  ;;  %v2665_v10 = vrot.slane %v2651_v40, %v14341_v31  ;;  %v2658_v60 = vrot.slane %v2650_v38, %v14341_v31 }
 0x2fb   : > { %v2634_v12 = vcombine.low %v2569_v13, %v14391_v20  ;;  %v2778_v49 = vrot.slane %v2770_v25, %v14341_v31  ;;  %v2674_v43 = vrot.slane %v2666_v22, %v14341_v31 }
 0x2fc   : > { %v2786_v6 = vcombine.low %v2730_v29, %v2746_v2  ;;  %v2787_v9 = vcombine.high %v2730_v29, %v2746_v2  ;;  %v2802_v15 = vcombine.low %v2737_v63, %v2753_v7  ;;  %v2684_v30 = vcombine.low %v2633_v11, %v2665_v10 }
 0x2fd   : > { %v2682_v35 = vcombine.low %v2626_v14, %v2658_v60  ;;  %v2685_v58 = vcombine.high %v2633_v11, %v2665_v10  ;;  %v2683_v17 = vcombine.high %v2626_v14, %v2658_v60  ;;  %v2642_v56 = vrot.slane %v2634_v12, %v14341_v31 }
 0x2fe   : > { %v2801_v18 = vrot.slane %v2787_v9, %v14341_v31  ;;  %v2794_v8 = vrot.slane %v2786_v6, %v14341_v31  ;;  %v2810_v37 = vrot.slane %v2802_v15, %v14341_v31  ;;  %v2803_v1 = vcombine.high %v2737_v63, %v2753_v7 }
 0x2ff   : > { %v2686_v15 = vcombine.low %v2642_v56, %v2674_v43  ;;  %v2687_v7 = vcombine.high %v2642_v56, %v2674_v43  ;;  %v2846_v12 = vshrl.u32 %v2684_v30, 16 }
 0x300   : > { %v2820_v34 = vcombine.low %v2769_v16, %v2801_v18  ;;  %v2818_v36 = vcombine.low %v2762_v19, %v2794_v8  ;;  %v2821_v52 = vcombine.high %v2769_v16, %v2801_v18  ;;  %v2819_v54 = vcombine.high %v2762_v19, %v2794_v8 }
 0x301   : > { %v2822_v6 = vcombine.low %v2778_v49, %v2810_v37  ;;  %v2838_v16 = vshrl.u32 %v2683_v17, 16  ;;  %v2667_v18 = vcombine.high %v2601_v4, %v2617_v3  ;;  %v2771_v19 = vcombine.high %v2705_v59, %v2721_v62 }
 0x302   : > { %v2844_v38 = vpack.i.b16 %v2820_v34, %v2684_v30  ;;  %v2828_v40 = vpack.i.b16 %v2818_v36, %v2682_v35  ;;  %v2852_v29 = vpack.i.b16 %v2821_v52, %v2685_v58  ;;  %v2836_v2 = vpack.i.b16 %v2819_v54, %v2683_v17 }
 0x303   : > { %v2839_v9 = vshrl.u32 %v2819_v54, 16  ;;  %v2635_v8 = vcombine.high %v2569_v13, %v14391_v20  ;;  %v2860_v25 = vpack.i.b16 %v2822_v6, %v2686_v15  ;;  %v2823_v60 = vcombine.high %v2778_v49, %v2810_v37 }
 0x304   : > { %2954 = vxpose.xlu1.c.b16.start.end [1/1] (short) (narrow) %v2844_v38, 16  ;;  %2890 = vxpose.xlu0.c.b16.start.end [1/1] (short) (narrow) %v2828_v40, 16  ;;  %v2817_v11 = vrot.slane %v2803_v1, %v14341_v31  ;;  %v2847_v14 = vshrl.u32 %v2820_v34, 16  ;;  %v2681_v63 = vrot.slane %v2667_v18, %v14341_v31  ;;  %v2785_v22 = vrot.slane %v2771_v19, %v14341_v31 }
 0x305   : > { %v2840_v10 = vpack.i.b16 %v2839_v9, %v2838_v16  ;;  %v2868_v38 = vpack.i.b16 %v2823_v60, %v2687_v7  ;;  %v2649_v3 = vrot.slane %v2635_v8, %v14341_v31  ;;  %v2855_v20 = vshrl.u32 %v2821_v52, 16 }
 0x306   : > { %v2824_v59 = vcombine.low %v2785_v22, %v2817_v11  ;;  %v2848_v62 = vpack.i.b16 %v2847_v14, %v2846_v12  ;;  %v2854_v13 = vshrl.u32 %v2685_v58, 16  ;;  %v2831_v34 = vshrl.u32 %v2818_v36, 16 }
 0x307   : > { %v2688_v4 = vcombine.low %v2649_v3, %v2681_v63  ;;  %v2863_v54 = vshrl.u32 %v2822_v6, 16  ;;  %v2830_v49 = vshrl.u32 %v2682_v35, 16  ;;  %v918_v17 = vsub.s32 2, %v14211_v24 }
 0x308   : > { %2986 = vxpose.xlu1.c.b16.start.end [1/1] (short) (narrow) %v2852_v29, 16  ;;  %2922 = vxpose.xlu0.c.b16.start.end [1/1] (short) (narrow) %v2836_v2, 16  ;;  %v2856_v40 = vpack.i.b16 %v2855_v20, %v2854_v13  ;;  %v2862_v30 = vshrl.u32 %v2686_v15, 16  ;;  %v2825_v56 = vcombine.high %v2785_v22, %v2817_v11  ;;  %v2871_v29 = vshrl.u32 %v2823_v60, 16 }
 0x309   : > { %v2876_v37 = vpack.i.b16 %v2824_v59, %v2688_v4  ;;  %v2832_v43 = vpack.i.b16 %v2831_v34, %v2830_v49  ;;  %v2689_v52 = vcombine.high %v2649_v3, %v2681_v63  ;;  %v919_v2 = vrot.slane %v14220_v28, %v918_v17 }
 0x30a   : > { %v2864_v1 = vpack.i.b16 %v2863_v54, %v2862_v30  ;;  %v2870_v58 = vshrl.u32 %v2687_v7, 16  ;;  %v2879_v16 = vshrl.u32 %v2824_v59, 16  ;;  %v2878_v6 = vshrl.u32 %v2688_v4, 16 }
 0x30b   : > { %v2884_v9 = vpack.i.b16 %v2825_v56, %v2689_v52  ;;  %v14425_v35 = vadd.f32 %v14378_v39, %v919_v2  ;;  %v2887_v18 = vshrl.u32 %v2825_v56, 16  ;;  %v2886_v19 = vshrl.u32 %v2689_v52, 16  ;;  %v1183_v39 = vpop.permute.xlu1 %1182 }
 0x30c   : > { %3018 = vxpose.xlu1.c.b16.start.end [1/1] (short) (narrow) %v2860_v25, 16  ;;  %2938 = vxpose.xlu0.c.b16.start.end [1/1] (short) (narrow) %v2840_v10, 16  ;;  %v2872_v36 = vpack.i.b16 %v2871_v29, %v2870_v58  ;;  %v2880_v15 = vpack.i.b16 %v2879_v16, %v2878_v6  ;;  %v14430_v28 = vadd.f32 %v14380_v42, %v919_v2 }
 0x30d   : > { %v2888_v8 = vpack.i.b16 %v2887_v18, %v2886_v19  ;;  %v1202_v60 = vcombine.low %v14302_v45, %v14300_v44  ;;  %v1203_v11 = vcombine.high %v14302_v45, %v14300_v44  ;;  %v1370_v14 = vcombine.low %v14318_v57, %v1183_v39 }
 0x30e   : > { %v1371_v7 = vcombine.high %v14318_v57, %v1183_v39  ;;  %v1186_v63 = vcombine.low %v14225_v32, %v14306_v47  ;;  %v1187_v22 = vcombine.high %v14225_v32, %v14306_v47  ;;  %v1338_v12 = vcombine.low %v14338_v27, %v14314_v53 }
 0x30f   : > { %v1354_v44 = vcombine.low %v14316_v55, %v14320_v61  ;;  %v1355_v45 = vcombine.high %v14316_v55, %v14320_v61  ;;  %v1339_v57 = vcombine.high %v14338_v27, %v14314_v53  ;;  %v1218_v47 = vcombine.low %v14304_v46, %v14310_v50 }
 0x310   : > { %3050 = vxpose.xlu1.c.b16.start.end [1/1] (short) (narrow) %v2868_v38, 16  ;;  %2970 = vxpose.xlu0.c.b16.start.end [1/1] (short) (narrow) %v2848_v62, 16  ;;  %v1181_v42 = vpop.permute.xlu0 %1180  ;;  %v1219_v62 = vcombine.high %v14304_v46, %v14310_v50  ;;  %v1322_v20 = vcombine.low %v14249_v41, %v14312_v51  ;;  %v1323_v4 = vcombine.high %v14249_v41, %v14312_v51 }
 0x311   : > { %v1234_v38 = vcombine.low %v14308_v48, %v1181_v42  ;;  %v1235_v32 = vcombine.high %v14308_v48, %v1181_v42  ;;  %v1210_v13 = vrot.slane %v1202_v60, %v14325_v5  ;;  %v1217_v55 = vrot.slane %v1203_v11, %v14325_v5 }
 0x312   : > { %v1378_v53 = vrot.slane %v1370_v14, %v14325_v5  ;;  %v1385_v48 = vrot.slane %v1371_v7, %v14325_v5  ;;  %v1194_v61 = vrot.slane %v1186_v63, %v14325_v5  ;;  %v1201_v27 = vrot.slane %v1187_v22, %v14325_v5 }
 0x313   : > { %v1346_v46 = vrot.slane %v1338_v12, %v14325_v5  ;;  %v1242_v50 = vrot.slane %v1234_v38, %v14325_v5  ;;  %v1362_v41 = vrot.slane %v1354_v44, %v14325_v5  ;;  %v1369_v51 = vrot.slane %v1355_v45, %v14325_v5 }
 0x314   : > { %3082 = vxpose.xlu1.c.b16.start.end [1/1] (short) (narrow) %v2876_v37, 16  ;;  %3002 = vxpose.xlu0.c.b16.start.end [1/1] (short) (narrow) %v2856_v40, 16  ;;  %v1353_v40 = vrot.slane %v1339_v57, %v14325_v5  ;;  %v1249_v54 = vrot.slane %v1235_v32, %v14325_v5  ;;  %v1226_v49 = vrot.slane %v1218_v47, %v14325_v5 }
 0x315   : > { %v1233_v17 = vrot.slane %v1219_v62, %v14325_v5  ;;  %v1330_v30 = vrot.slane %v1322_v20, %v14325_v5  ;;  %v1418_v56 = vcombine.low %v1362_v41, %v1378_v53  ;;  %v1434_v29 = vcombine.low %v1369_v51, %v1385_v48 }
 0x316   : > { %v1435_v52 = vcombine.high %v1369_v51, %v1385_v48  ;;  %v1250_v39 = vcombine.low %v1194_v61, %v1210_v13  ;;  %v1251_v42 = vcombine.high %v1194_v61, %v1210_v13  ;;  %v1266_v60 = vcombine.low %v1201_v27, %v1217_v55 }
 0x317   : > { %v1386_v2 = vcombine.low %v1330_v30, %v1346_v46  ;;  %v1387_v58 = vcombine.high %v1330_v30, %v1346_v46  ;;  %v1298_v18 = vcombine.low %v1233_v17, %v1249_v54  ;;  %v1299_v19 = vcombine.high %v1233_v17, %v1249_v54 }
 0x318   : > { %2906 = vxpose.xlu1.c.b16.start.end [1/1] (short) (narrow) %v2832_v43, 16  ;;  %3034 = vxpose.xlu0.c.b16.start.end [1/1] (short) (narrow) %v2864_v1, 16  ;;  %v1337_v43 = vrot.slane %v1323_v4, %v14325_v5  ;;  %v1419_v1 = vcombine.high %v1362_v41, %v1378_v53  ;;  %v1267_v11 = vcombine.high %v1201_v27, %v1217_v55 }
 0x319   : > { %v1426_v14 = vrot.slane %v1418_v56, %v14341_v31  ;;  %v1442_v63 = vrot.slane %v1434_v29, %v14341_v31  ;;  %v1449_v22 = vrot.slane %v1435_v52, %v14341_v31  ;;  %v1394_v12 = vrot.slane %v1386_v2, %v14341_v31 }
 0x31a   : > { %v1402_v6 = vcombine.low %v1337_v43, %v1353_v40  ;;  %v1433_v7 = vrot.slane %v1419_v1, %v14341_v31  ;;  %v1401_v38 = vrot.slane %v1387_v58, %v14341_v31  ;;  %v1306_v62 = vrot.slane %v1298_v18, %v14341_v31 }
 0x31b   : > { %v1313_v20 = vrot.slane %v1299_v19, %v14341_v31  ;;  %v1258_v13 = vrot.slane %v1250_v39, %v14341_v31  ;;  %v1265_v55 = vrot.slane %v1251_v42, %v14341_v31  ;;  %v1274_v53 = vrot.slane %v1266_v60, %v14341_v31 }
 0x31c   : > { %3114 = vxpose.xlu1.c.b16.start.end [1/1] (short) (narrow) %v2884_v9, 16  ;;  %3066 = vxpose.xlu0.c.b16.start.end [1/1] (short) (narrow) %v2872_v36, 16  ;;  %v1282_v9 = vcombine.low %v1226_v49, %v1242_v50  ;;  %v1283_v36 = vcombine.high %v1226_v49, %v1242_v50  ;;  %v1410_v32 = vrot.slane %v1402_v6, %v14341_v31 }
 0x31d   : > { %v1281_v48 = vrot.slane %v1267_v11, %v14341_v31  ;;  %v1450_v61 = vcombine.low %v1394_v12, %v1426_v14  ;;  %v1452_v27 = vcombine.low %v1401_v38, %v1433_v7  ;;  %v1318_v17 = vcombine.low %v1274_v53, %v1306_v62 }
 0x31e   : > { %v1290_v44 = vrot.slane %v1282_v9, %v14341_v31  ;;  %v1297_v45 = vrot.slane %v1283_v36, %v14341_v31  ;;  %v1454_v46 = vcombine.low %v1410_v32, %v1442_v63  ;;  %v1319_v30 = vcombine.high %v1274_v53, %v1306_v62 }
 0x31f   : > { %v1321_v56 = vcombine.high %v1281_v48, %v1313_v20  ;;  %v1451_v29 = vcombine.high %v1394_v12, %v1426_v14  ;;  %v1455_v52 = vcombine.high %v1410_v32, %v1442_v63  ;;  %v1453_v2 = vcombine.high %v1401_v38, %v1433_v7 }
 0x320   : > { %1808 = vrot.lane.b32.xlu1 %v14425_v35, %s13787_s8  ;;  %3098 = vxpose.xlu0.c.b16.start.end [1/1] (short) (narrow) %v2880_v15, 16  ;;  %v1403_v15 = vcombine.high %v1337_v43, %v1353_v40  ;;  %v1314_v41 = vcombine.low %v1258_v13, %v1290_v44  ;;  %v1315_v51 = vcombine.high %v1258_v13, %v1290_v44 }
 0x321   : > { %v1316_v40 = vcombine.low %v1265_v55, %v1297_v45  ;;  %v1317_v54 = vcombine.high %v1265_v55, %v1297_v45  ;;  %v1320_v43 = vcombine.low %v1281_v48, %v1313_v20  ;;  %v12331_v9 = vpack.c.bf16 %v1454_v46, %v1450_v61 }
 0x322   : > { %v1417_v47 = vrot.slane %v1403_v15, %v14341_v31  ;;  %v12329_v15 = vpack.c.bf16 %v1318_v17, %v1314_v41  ;;  %v12333_v19 = vpack.c.bf16 %v1319_v30, %v1315_v51  ;;  %v12335_v44 = vpack.c.bf16 %v1455_v52, %v1451_v29 }
 0x323   : > { %v12330_v18 = vpack.c.bf16 %v1320_v43, %v1316_v40  ;;  %v12334_v39 = vpack.c.bf16 %v1321_v56, %v1317_v54  ;;  %v2161_v7 = vrot.slane %v12331_v9, %v14325_v5 }
 0x324   : > { %1814 = vrot.lane.b32.xlu1 %v14425_v35, %s13789_s12  ;;  %3130 = vxpose.xlu0.c.b16.start.end [1/1] (short) (narrow) %v2888_v8, 16  ;;  %v1456_v50 = vcombine.low %v1417_v47, %v1449_v22  ;;  %v1457_v58 = vcombine.high %v1417_v47, %v1449_v22  ;;  %v2145_v38 = vrot.slane %v12329_v15, %v14325_v5 }
 0x326   : > { %v12332_v36 = vpack.c.bf16 %v1456_v50, %v1452_v27  ;;  %v12336_v22 = vpack.c.bf16 %v1457_v58, %v1453_v2 }
 0x328   : > { %1816 = vrot.lane.b32.xlu1 %v14430_v28, %s13789_s12  ;;  %v2169_v63 = vrot.slane %v12332_v36, %v14325_v5  ;;  %v2237_v62 = vrot.slane %v12336_v22, %v14325_v5 }
 0x32a   : > { %v2186_v55 = vcombine.low %v2161_v7, %v2169_v63  ;;  %v2187_v53 = vcombine.high %v2161_v7, %v2169_v63 }
 0x32c   : > { %1822 = vrot.lane.b32.xlu1 %v14430_v28, %s13786_s26 }
 0x32d   : > { %1810 = vrot.lane.b32.xlu0 %v14430_v28, %s13787_s8 }
 0x330   : > { %1828 = vrot.lane.b32.xlu1 %v14430_v28, %s13788_s11 }
 0x331   : > { %1820 = vrot.lane.b32.xlu0 %v14425_v35, %s13786_s26 }
 0x334   : > { %1834 = vrot.lane.b32.xlu1 %v14430_v28, %s13790_s18 }
 0x335   : > { %1826 = vrot.lane.b32.xlu0 %v14425_v35, %s13788_s11 }
 0x338   : > { %1840 = vrot.lane.b32.xlu1 %v14430_v28, %s13792_s20 }
 0x339   : > { %1832 = vrot.lane.b32.xlu0 %v14425_v35, %s13790_s18 }
 0x33c   : > { %1846 = vrot.lane.b32.xlu1 %v14430_v28, %s13793_s25 }
 0x33d   : > { %1838 = vrot.lane.b32.xlu0 %v14425_v35, %s13792_s20 }
 0x341   : > { %1844 = vrot.lane.b32.xlu0 %v14425_v35, %s13793_s25 }
 0x366   : > { %v14458_v25 = vpop.trf.xlu0  ;;  %v14460_v10 = vpop.trf.xlu1 }
 0x367   : > { %v3146_v45 = vcombine.low %v14458_v25, %v14460_v10 }
 0x36a   : > { %v14475_v3 = vpop.trf.xlu0  ;;  %v14477_v59 = vpop.trf.xlu1 }
 0x36b   : > { %v3154_v14 = vcombine.low %v14475_v3, %v14477_v59  ;;  %v3153_v59 = vrot.slane %v3146_v45, %v14325_v5 }
 0x36d   : > { %v3161_v47 = vrot.slane %v3154_v14, %v14325_v5  ;;  %v2201_v14 = vrot.slane %v2187_v53, %v14341_v31 }
 0x36e   : > { %v14502_v37 = vpop.trf.xlu0  ;;  %v14504_v34 = vpop.trf.xlu1 }
 0x36f   : > { %v3178_v40 = vcombine.low %v3153_v59, %v3161_v47  ;;  %v3179_v54 = vcombine.high %v3153_v59, %v3161_v47 }
 0x371   : > { %v3193_v15 = vrot.slane %v3179_v54, %v14341_v31 }
 0x372   : > { %v14514_v16 = vpop.trf.xlu1  ;;  %v14516_v8 = vpop.trf.xlu0 }
 0x376   : > { %v3090_v57 = vpop.trf.xlu1  ;;  %v3010_v4 = vpop.trf.xlu0 }
 0x377   : > { %v3162_v60 = vcombine.low %v14504_v34, %v3090_v57  ;;  %v2153_v34 = vrot.slane %v12330_v18, %v14325_v5  ;;  %v2221_v57 = vrot.slane %v12334_v39, %v14325_v5  ;;  %v3222_v25 = vcombine.low %v14502_v37, %v3010_v4 }
 0x379   : > { %v3169_v10 = vrot.slane %v3162_v60, %v14325_v5  ;;  %v2170_v48 = vcombine.low %v2145_v38, %v2153_v34  ;;  %v3229_v4 = vrot.slane %v3222_v25, %v14325_v5  ;;  %v2171_v41 = vcombine.high %v2145_v38, %v2153_v34 }
 0x37a   : > { %v2914_v49 = vpop.trf.xlu1  ;;  %v3042_v1 = vpop.trf.xlu0 }
 0x37b   : > { %v3214_v12 = vcombine.low %v2914_v49, %v14516_v8  ;;  %v2229_v8 = vrot.slane %v12335_v44, %v14325_v5  ;;  %v14559_v29 = vrot.slane %v2170_v48, %v14341_v31  ;;  %v2185_v18 = vrot.slane %v2171_v41, %v14341_v31 }
 0x37c   : > { %v2194_v44 = vrot.slane %v2186_v55, %v14341_v31 }
 0x37d   : > { %v3221_v20 = vrot.slane %v3214_v12, %v14325_v5  ;;  %v2254_v56 = vcombine.low %v2229_v8, %v2237_v62 }
 0x37e   : > { %v3122_v6 = vpop.trf.xlu1  ;;  %v3074_v42 = vpop.trf.xlu0  ;;  %v2202_v34 = vcombine.low %v14559_v29, %v2194_v44 }
 0x37f   : > { %v3170_v11 = vcombine.low %v14514_v16, %v3122_v6  ;;  %v2213_v16 = vrot.slane %v12333_v19, %v14325_v5  ;;  %v3246_v49 = vcombine.low %v3221_v20, %v3229_v4  ;;  %v3247_v17 = vcombine.high %v3221_v20, %v3229_v4 }
 0x380   : > { %v3186_v6 = vrot.slane %v3178_v40, %v14341_v31  ;;  %v2262_v45 = vrot.slane %v2254_v56, %v14341_v31  ;;  %v14609_v4 = vcombine.high %v2185_v18, %v2201_v14 }
 0x381   : > { %v3177_v3 = vrot.slane %v3170_v11, %v14325_v5  ;;  %v2238_v61 = vcombine.low %v2213_v16, %v2221_v57  ;;  %v2239_v51 = vcombine.high %v2213_v16, %v2221_v57  ;;  %v3254_v39 = vrot.slane %v3246_v49, %v14341_v31 }
 0x382   : > { %v3106_v32 = vpop.trf.xlu0  ;;  %v14584_v57 = vcombine.low %v2185_v18, %v2201_v14 }
 0x383   : > { %v3230_v13 = vcombine.low %v3042_v1, %v3106_v32  ;;  %v3194_v27 = vcombine.low %v3169_v10, %v3177_v3  ;;  %v3195_v46 = vcombine.high %v3169_v10, %v3177_v3  ;;  %v2255_v1 = vcombine.high %v2229_v8, %v2237_v62 }
 0x384   : > { %v14562_v52 = vrot.slane %v2238_v61, %v14341_v31  ;;  %v2253_v19 = vrot.slane %v2239_v51, %v14341_v31  ;;  %v2277_v61 = vshrl.u32 %v2202_v34, 16 }
 0x385   : > { %v3237_v30 = vrot.slane %v3230_v13, %v14325_v5  ;;  %v3202_v2 = vrot.slane %v3194_v27, %v14341_v31  ;;  %v3209_v58 = vrot.slane %v3195_v46, %v14341_v31  ;;  %v2269_v7 = vrot.slane %v2255_v1, %v14341_v31 }
 0x386   : > { %v3138_v37 = vpop.trf.xlu0  ;;  %v2270_v16 = vcombine.low %v14562_v52, %v2262_v45 }
 0x387   : > { %v3238_v50 = vcombine.low %v3074_v42, %v3138_v37  ;;  %v3261_v42 = vrot.slane %v3247_v17, %v14341_v31  ;;  %v3210_v63 = vcombine.low %v3186_v6, %v3202_v2  ;;  %v14578_v12 = vcombine.low %v3193_v15, %v3209_v58 }
 0x388   : > { %v14586_v32 = vcombine.low %v2253_v19, %v2269_v7  ;;  %v14594_v62 = vcombine.high %v3193_v15, %v3209_v58  ;;  %v2276_v20 = vpack.i.b16 %v2270_v16, %v2202_v34  ;;  %v2278_v37 = vshrl.u32 %v2270_v16, 16 }
 0x389   : > { %v3245_v43 = vrot.slane %v3238_v50, %v14325_v5  ;;  %v3286_v8 = vshrl.u32 %v3210_v63, 16  ;;  %v14611_v27 = vcombine.high %v2253_v19, %v2269_v7  ;;  %v3211_v41 = vcombine.high %v3186_v6, %v3202_v2 }
 0x38a   : > { %v2288_v13 = vpack.i.b16 %v14586_v32, %v14584_v57  ;;  %v2279_v51 = vpack.i.b16 %v2278_v37, %v2277_v61  ;;  %v2290_v14 = vshrl.u32 %v14586_v32, 16 }
 0x38b   : > { %v3262_v9 = vcombine.low %v3237_v30, %v3245_v43  ;;  %v3263_v36 = vcombine.high %v3237_v30, %v3245_v43  ;;  %v2294_v40 = vpack.i.b16 %v14611_v27, %v14609_v4  ;;  %v2203_v30 = vcombine.high %v14559_v29, %v2194_v44 }
 0x38c   : > { %v2271_v43 = vcombine.high %v14562_v52, %v2262_v45  ;;  %v3294_v2 = vshrl.u32 %v3211_v41, 16  ;;  %v2289_v45 = vshrl.u32 %v14584_v57, 16 }
 0x38d   : > { %v3270_v60 = vrot.slane %v3262_v9, %v14341_v31  ;;  %v3277_v11 = vrot.slane %v3263_v36, %v14341_v31  ;;  %v2283_v29 = vshrl.u32 %v2203_v30, 16 }
 0x38e   : > { %v2282_v9 = vpack.i.b16 %v2271_v43, %v2203_v30  ;;  %v2284_v52 = vshrl.u32 %v2271_v43, 16 }
 0x38f   : > { %v3278_v22 = vcombine.low %v3254_v39, %v3270_v60  ;;  %v14580_v38 = vcombine.low %v3261_v42, %v3277_v11  ;;  %v14592_v47 = vcombine.high %v3261_v42, %v3277_v11  ;;  %v3279_v50 = vcombine.high %v3254_v39, %v3270_v60 }
 0x390   : > { %v3302_v39 = vshrl.u32 %v14578_v12, 16  ;;  %v2285_v42 = vpack.i.b16 %v2284_v52, %v2283_v29 }
 0x391   : > { %v3284_v10 = vpack.i.b16 %v3278_v22, %v3210_v63  ;;  %v3300_v3 = vpack.i.b16 %v14580_v38, %v14578_v12  ;;  %v3287_v59 = vshrl.u32 %v3278_v22, 16  ;;  %v3308_v48 = vpack.i.b16 %v14592_v47, %v14594_v62 }
 0x392   : > { %v14588_v25 = vpop.permute.xlu1 %1808  ;;  %v3292_v54 = vpack.i.b16 %v3279_v50, %v3211_v41  ;;  %v3295_v56 = vshrl.u32 %v3279_v50, 16  ;;  %v3303_v15 = vshrl.u32 %v14580_v38, 16  ;;  %v3311_v22 = vshrl.u32 %v14592_v47, 16 }
 0x393   : > { %12642 = vmatpush3.bf16.msra.mxu1 %v3284_v10  ;;  %12666 = vmatpush3.bf16.msra.mxu0 %v3300_v3  ;;  %v3288_v53 = vpack.i.b16 %v3287_v59, %v3286_v8  ;;  %v2291_v10 = vpack.i.b16 %v2290_v14, %v2289_v45  ;;  %v3310_v3 = vshrl.u32 %v14594_v62, 16 }
 0x394   : > { %12647 = vmatprep.subr.bf16.mxu1 %v13785_v21  ;;  %12677 = vmatprep.subr.bf16.mxu0 %v13785_v21  ;;  %v3296_v36 = vpack.i.b16 %v3295_v56, %v3294_v2  ;;  %v3304_v60 = vpack.i.b16 %v3303_v15, %v3302_v39 }
 0x396   : > { %v14600_v55 = vpop.permute.xlu1 %1814  ;;  %12644 = vmatmul.mubr.msk.bf16.vlgmr.msra.gmra.mxu1 %vm3314_vm1, %v2276_v20  ;;  %12668 = vmatmul.mubr.msk.bf16.vlgmr.msra.gmra.mxu0 %vm3314_vm1, %v2288_v13  ;;  %v3312_v13 = vpack.i.b16 %v3311_v22, %v3310_v3 }
 0x397   : > { %12648 = vmatpush3.bf16.msra.mxu1 %v3288_v53  ;;  %12678 = vmatpush3.bf16.msra.mxu0 %v3308_v48  ;;  %v1850_v7 = vcombine.low %v14425_v35, %v14600_v55  ;;  %v1851_v20 = vcombine.high %v14425_v35, %v14600_v55  ;;  %v2296_v35 = vshrl.u32 %v14611_v27, 16 }
 0x398   : > { %12649 = vmatprep.mubr.msk.bf16.mxu1 %vm13791_vm0, %v13785_v21  ;;  %12653 = vmatprep.subr.bf16.mxu1 %v13785_v21 }
 0x399   : > { %12679 = vmatprep.mubr.msk.bf16.mxu0 %vm13791_vm0, %v13785_v21  ;;  %12689 = vmatprep.subr.bf16.mxu0 %v13785_v21  ;;  %v1858_v57 = vrot.slane %v1850_v7, %v14325_v5  ;;  %v1865_v30 = vrot.slane %v1851_v20, %v14325_v5 }
 0x39a   : > { %v14613_v46 = vpop.permute.xlu1 %1816 }
 0x39b   : > { %v1986_v52 = vcombine.low %v14430_v28, %v14613_v46 }
 0x39e   : > { %12650 = vmatmul.mubr.msk.bf16.vlgmr.msra.gmra.mxu1 %vm3314_vm1, %v2279_v51  ;;  %12680 = vmatmul.mubr.msk.bf16.vlgmr.msra.gmra.mxu0 %vm3314_vm1, %v2294_v40  ;;  %v14622_v49 = vpop.permute.xlu1 %1822 }
 0x39f   : > { %12654 = vmatpush3.bf16.msra.mxu1 %v3292_v54  ;;  %v14624_v17 = vpop.permute.xlu0 %1810  ;;  %12655 = vmatprep.mubr.msk.bf16.mxu1 %vm13791_vm0, %v13785_v21 }
 0x3a0   : > { %12659 = vmatprep.subr.bf16.mxu1 %v13785_v21  ;;  %12691 = vmatprep.mubr.msk.bf16.mxu0 %vm13791_vm0, %v13785_v21  ;;  %v2002_v27 = vcombine.low %v14624_v17, %v14622_v49 }
 0x3a2   : > { %v14633_v58 = vpop.permute.xlu1 %1828  ;;  %v2010_v14 = vrot.slane %v2002_v27, %v14325_v5 }
 0x3a3   : > { %v1821_v1 = vpop.permute.xlu0 %1820 }
 0x3a4   : > { %v1866_v11 = vcombine.low %v14588_v25, %v1821_v1  ;;  %v1867_v32 = vcombine.high %v14588_v25, %v1821_v1  ;;  %v2295_v25 = vshrl.u32 %v14609_v4, 16 }
 0x3a6   : > { %12656 = vmatmul.mubr.msk.bf16.vlgmr.msra.gmra.mxu1 %vm3314_vm1, %v2282_v9  ;;  %v14640_v18 = vpop.permute.xlu1 %1834  ;;  %v1874_v12 = vrot.slane %v1866_v11, %v14325_v5  ;;  %v1881_v55 = vrot.slane %v1867_v32, %v14325_v5  ;;  %v2297_v2 = vpack.i.b16 %v2296_v35, %v2295_v25 }
 0x3a7   : > { %12660 = vmatpush3.bf16.msra.mxu1 %v3296_v36  ;;  %v1827_v6 = vpop.permute.xlu0 %1826  ;;  %12661 = vmatprep.mubr.msk.bf16.mxu1 %vm13791_vm0, %v13785_v21 }
 0x3a8   : > { %12671 = vmatprep.subr.bf16.mxu1 %v13785_v21  ;;  %v1914_v53 = vcombine.low %v1858_v57, %v1874_v12  ;;  %v1915_v41 = vcombine.high %v1858_v57, %v1874_v12  ;;  %v1930_v29 = vcombine.low %v1865_v30, %v1881_v55  ;;  %v1931_v22 = vcombine.high %v1865_v30, %v1881_v55 }
 0x3a9   : > { %v1994_v12 = vrot.slane %v1986_v52, %v14325_v5 }
 0x3aa   : > { %v14651_v63 = vpop.permute.xlu1 %1840  ;;  %v1922_v43 = vrot.slane %v1914_v53, %v14341_v31  ;;  %v1938_v7 = vrot.slane %v1930_v29, %v14341_v31  ;;  %v1945_v20 = vrot.slane %v1931_v22, %v14341_v31 }
 0x3ab   : > { %v1833_v19 = vpop.permute.xlu0 %1832  ;;  %v2018_v1 = vcombine.low %v14633_v58, %v14651_v63  ;;  %v2051_v25 = vcombine.high %v1994_v12, %v2010_v14 }
 0x3ad   : > { %v2026_v45 = vrot.slane %v2018_v1, %v14325_v5 }
 0x3ae   : > { %12662 = vmatmul.mubr.msk.bf16.vlgmr.msra.gmra.mxu1 %vm3314_vm1, %v2285_v42  ;;  %v1847_v47 = vpop.permute.xlu1 %1846 }
 0x3af   : > { %12672 = vmatpush3.bf16.msra.mxu1 %v3304_v60  ;;  %v1839_v44 = vpop.permute.xlu0 %1838  ;;  %12673 = vmatprep.mubr.msk.bf16.mxu1 %vm13791_vm0, %v13785_v21  ;;  %v2034_v40 = vcombine.low %v14640_v18, %v1847_v47 }
 0x3b0   : > { %12683 = vmatprep.subr.bf16.mxu1 %v13785_v21  ;;  %v1882_v38 = vcombine.low %v1827_v6, %v1839_v44  ;;  %v1883_v34 = vcombine.high %v1827_v6, %v1839_v44  ;;  %v1929_v6 = vrot.slane %v1915_v41, %v14341_v31 }
 0x3b1   : > { %v2042_v15 = vrot.slane %v2034_v40, %v14325_v5  ;;  %v2065_v40 = vrot.slane %v2051_v25, %v14341_v31 }
 0x3b2   : > { %v1890_v48 = vrot.slane %v1882_v38, %v14325_v5  ;;  %v1897_v62 = vrot.slane %v1883_v34, %v14325_v5  ;;  %v2035_v38 = vcombine.high %v14640_v18, %v1847_v47  ;;  %v1987_v18 = vcombine.high %v14430_v28, %v14613_v46 }
 0x3b3   : > { %v1845_v16 = vpop.permute.xlu0 %1844 }
 0x3b4   : > { %v1898_v59 = vcombine.low %v1833_v19, %v1845_v16  ;;  %v1899_v8 = vcombine.high %v1833_v19, %v1845_v16  ;;  %v2082_v16 = vcombine.low %v2026_v45, %v2042_v15  ;;  %v2049_v53 = vrot.slane %v2035_v38, %v14325_v5 }
 0x3b5   : > { %v2001_v28 = vrot.slane %v1987_v18, %v14325_v5 }
 0x3b6   : > { %v1906_v61 = vrot.slane %v1898_v59, %v14325_v5  ;;  %v1913_v37 = vrot.slane %v1899_v8, %v14325_v5  ;;  %12674 = vmatmul.mubr.msk.bf16.vlgmr.msra.gmra.mxu1 %vm3314_vm1, %v2291_v10  ;;  %v2019_v59 = vcombine.high %v14633_v58, %v14651_v63  ;;  %v2003_v8 = vcombine.high %v14624_v17, %v14622_v49 }
 0x3b7   : > { %12684 = vmatpush3.bf16.msra.mxu1 %v3312_v13  ;;  %12685 = vmatprep.mubr.msk.bf16.mxu1 %vm13791_vm0, %v13785_v21  ;;  %v2050_v13 = vcombine.low %v1994_v12, %v2010_v14  ;;  %v2090_v47 = vrot.slane %v2082_v16, %v14341_v31 }
 0x3b8   : > { %v1946_v50 = vcombine.low %v1890_v48, %v1906_v61  ;;  %v1947_v51 = vcombine.high %v1890_v48, %v1906_v61  ;;  %12695 = vmatprep.subr.bf16.mxu1 %v13785_v21  ;;  %v1962_v54 = vcombine.low %v1897_v62, %v1913_v37  ;;  %v1963_v39 = vcombine.high %v1897_v62, %v1913_v37 }
 0x3b9   : > { %v2083_v48 = vcombine.high %v2026_v45, %v2042_v15  ;;  %v2033_v63 = vrot.slane %v2019_v59, %v14325_v5  ;;  %v2017_v49 = vrot.slane %v2003_v8, %v14325_v5  ;;  %v2058_v17 = vrot.slane %v2050_v13, %v14341_v31 }
 0x3ba   : > { %v1954_v56 = vrot.slane %v1946_v50, %v14341_v31  ;;  %v1961_v4 = vrot.slane %v1947_v51, %v14341_v31  ;;  %v1970_v19 = vrot.slane %v1962_v54, %v14341_v31  ;;  %v1977_v34 = vrot.slane %v1963_v39, %v14341_v31 }
 0x3bb   : > { %v2097_v46 = vrot.slane %v2083_v48, %v14341_v31  ;;  %v2098_v35 = vcombine.low %v2033_v63, %v2049_v53  ;;  %v2115_v41 = vcombine.high %v2058_v17, %v2090_v47  ;;  %v2114_v51 = vcombine.low %v2058_v17, %v2090_v47 }
 0x3bc   : > { %v1979_v9 = vcombine.high %v1922_v43, %v1954_v56  ;;  %v1978_v36 = vcombine.low %v1922_v43, %v1954_v56  ;;  %v1981_v11 = vcombine.high %v1929_v6, %v1961_v4  ;;  %v1980_v44 = vcombine.low %v1929_v6, %v1961_v4 }
 0x3bd   : > { %v1983_v57 = vcombine.high %v1938_v7, %v1970_v19  ;;  %v1982_v32 = vcombine.low %v1938_v7, %v1970_v19  ;;  %v1985_v62 = vcombine.high %v1945_v20, %v1977_v34  ;;  %v1984_v58 = vcombine.low %v1945_v20, %v1977_v34 }
 0x3be   : > { %12686 = vmatmul.mubr.msk.bf16.vlgmr.msra.gmra.mxu1 %vm3314_vm1, %v2297_v2  ;;  %v2123_v42 = vpack.c.bf16 %v1979_v9, %v1979_v9  ;;  %v2122_v60 = vpack.c.bf16 %v1978_v36, %v1978_v36  ;;  %v2125_v10 = vpack.c.bf16 %v1981_v11, %v1981_v11  ;;  %v2124_v3 = vpack.c.bf16 %v1980_v44, %v1980_v44 }
 0x3bf   : > { %12697 = vmatprep.mubr.msk.bf16.mxu1 %vm13791_vm0, %v13785_v21  ;;  %v2127_v61 = vpack.c.bf16 %v1983_v57, %v1983_v57  ;;  %v2126_v37 = vpack.c.bf16 %v1982_v32, %v1982_v32  ;;  %v2129_v55 = vpack.c.bf16 %v1985_v62, %v1985_v62  ;;  %v2128_v50 = vpack.c.bf16 %v1984_v58, %v1984_v58 }
 0x3c0   : > { %3903 = vxpose.xlu0.c.b16.start.end [1/1] (short) (narrow) %v2123_v42, 16  ;;  %3887 = vxpose.xlu1.c.b16.start.end [1/1] (short) (narrow) %v2122_v60, 16  ;;  %v2066_v54 = vcombine.low %v2001_v28, %v2017_v49  ;;  %v2106_v30 = vrot.slane %v2098_v35, %v14341_v31  ;;  %v2099_v43 = vcombine.high %v2033_v63, %v2049_v53 }
 0x3c1   : > { %v2131_v56 = vpack.c.bf16 %v2115_v41, %v2115_v41  ;;  %v2130_v4 = vpack.c.bf16 %v2114_v51, %v2114_v51  ;;  %v2117_v27 = vcombine.high %v2065_v40, %v2097_v46  ;;  %v2116_v1 = vcombine.low %v2065_v40, %v2097_v46 }
 0x3c2   : > { %v2074_v2 = vrot.slane %v2066_v54, %v14341_v31  ;;  %v2067_v9 = vcombine.high %v2001_v28, %v2017_v49  ;;  %v2113_v36 = vrot.slane %v2099_v43, %v14341_v31 }
 0x3c3   : > { %v2133_v6 = vpack.c.bf16 %v2117_v27, %v2117_v27  ;;  %v2132_v29 = vpack.c.bf16 %v2116_v1, %v2116_v1 }
 0x3c4   : > { %3935 = vxpose.xlu0.c.b16.start.end [1/1] (short) (narrow) %v2125_v10, 16  ;;  %3919 = vxpose.xlu1.c.b16.start.end [1/1] (short) (narrow) %v2124_v3, 16  ;;  %v2119_v52 = vcombine.high %v2074_v2, %v2106_v30  ;;  %v2118_v15 = vcombine.low %v2074_v2, %v2106_v30  ;;  %v2081_v19 = vrot.slane %v2067_v9, %v14341_v31 }
 0x3c6   : > { %v2135_v39 = vpack.c.bf16 %v2119_v52, %v2119_v52  ;;  %v2134_v42 = vpack.c.bf16 %v2118_v15, %v2118_v15  ;;  %v2121_v60 = vcombine.high %v2081_v19, %v2113_v36  ;;  %v2120_v11 = vcombine.low %v2081_v19, %v2113_v36 }
 0x3c8   : > { %3967 = vxpose.xlu0.c.b16.start.end [1/1] (short) (narrow) %v2127_v61, 16  ;;  %3951 = vxpose.xlu1.c.b16.start.end [1/1] (short) (narrow) %v2126_v37, 16  ;;  %v2137_v44 = vpack.c.bf16 %v2121_v60, %v2121_v60  ;;  %v2136_v45 = vpack.c.bf16 %v2120_v11, %v2120_v11 }
 0x3cc   : > { %3999 = vxpose.xlu0.c.b16.start.end [1/1] (short) (narrow) %v2129_v55, 16  ;;  %3983 = vxpose.xlu1.c.b16.start.end [1/1] (short) (narrow) %v2128_v50, 16 }
 0x3d0   : > { %4031 = vxpose.xlu0.c.b16.start.end [1/1] (short) (narrow) %v2131_v56, 16  ;;  %4015 = vxpose.xlu1.c.b16.start.end [1/1] (short) (narrow) %v2130_v4, 16 }
 0x3d4   : > { %4063 = vxpose.xlu0.c.b16.start.end [1/1] (short) (narrow) %v2133_v6, 16  ;;  %4047 = vxpose.xlu1.c.b16.start.end [1/1] (short) (narrow) %v2132_v29, 16 }
 0x3d8   : > { %4095 = vxpose.xlu0.c.b16.start.end [1/1] (short) (narrow) %v2135_v39, 16  ;;  %4079 = vxpose.xlu1.c.b16.start.end [1/1] (short) (narrow) %v2134_v42, 16 }
 0x3dc   : > { %4127 = vxpose.xlu0.c.b16.start.end [1/1] (short) (narrow) %v2137_v44, 16  ;;  %4111 = vxpose.xlu1.c.b16.start.end [1/1] (short) (narrow) %v2136_v45, 16 }
 0x422   : > { %v3911_v14 = vpop.trf.xlu0  ;;  %v3895_v7 = vpop.trf.xlu1 }
 0x426   : > { %v3943_v22 = vpop.trf.xlu0  ;;  %v3927_v12 = vpop.trf.xlu1 }
 0x42a   : > { %v3975_v38 = vpop.trf.xlu0  ;;  %v3959_v34 = vpop.trf.xlu1 }
 0x42b   : > { %v4280_v16 = vcombine.high %v3911_v14, %v3975_v38  ;;  %v4144_v10 = vcombine.high %v3895_v7, %v3959_v34  ;;  %v4279_v25 = vcombine.low %v3911_v14, %v3975_v38  ;;  %v4143_v28 = vcombine.low %v3895_v7, %v3959_v34 }
 0x42d   : > { %v14715_v8 = vrot.slane %v4280_v16, %v14325_v5  ;;  %v14718_v20 = vrot.slane %v4144_v10, %v14325_v5  ;;  %v4287_v27 = vrot.slane %v4279_v25, %v14325_v5  ;;  %v4151_v1 = vrot.slane %v4143_v28, %v14325_v5 }
 0x42e   : > { %v4007_v3 = vpop.trf.xlu0  ;;  %v3991_v57 = vpop.trf.xlu1 }
 0x42f   : > { %v4296_v32 = vcombine.high %v3943_v22, %v4007_v3  ;;  %v4160_v59 = vcombine.high %v3927_v12, %v3991_v57  ;;  %v4295_v58 = vcombine.low %v3943_v22, %v4007_v3  ;;  %v4159_v63 = vcombine.low %v3927_v12, %v3991_v57 }
 0x431   : > { %v14721_v13 = vrot.slane %v4296_v32, %v14325_v5  ;;  %v14724_v18 = vrot.slane %v4160_v59, %v14325_v5  ;;  %v4303_v55 = vrot.slane %v4295_v58, %v14325_v5  ;;  %v4167_v50 = vrot.slane %v4159_v63, %v14325_v5 }
 0x432   : > { %v4039_v53 = vpop.trf.xlu0  ;;  %v4023_v47 = vpop.trf.xlu1 }
 0x433   : > { %v4360_v48 = vcombine.high %v14715_v8, %v14721_v13  ;;  %v4224_v61 = vcombine.high %v14718_v20, %v14724_v18  ;;  %v4207_v39 = vcombine.low %v4151_v1, %v4167_v50  ;;  %v4343_v42 = vcombine.low %v4287_v27, %v4303_v55 }
 0x434   : > { %v4208_v22 = vcombine.high %v4151_v1, %v4167_v50  ;;  %v4344_v12 = vcombine.high %v4287_v27, %v4303_v55 }
 0x435   : > { %v4215_v38 = vrot.slane %v4207_v39, %v14341_v31  ;;  %v4351_v16 = vrot.slane %v4343_v42, %v14341_v31 }
 0x436   : > { %v4071_v37 = vpop.trf.xlu0  ;;  %v4055_v62 = vpop.trf.xlu1  ;;  %v4222_v58 = vrot.slane %v4208_v22, %v14341_v31  ;;  %v4358_v63 = vrot.slane %v4344_v12, %v14341_v31 }
 0x43a   : > { %v4103_v49 = vpop.trf.xlu0  ;;  %v4087_v17 = vpop.trf.xlu1 }
 0x43b   : > { %v4312_v46 = vcombine.high %v4039_v53, %v4103_v49  ;;  %v4176_v35 = vcombine.high %v4023_v47, %v4087_v17  ;;  %v4311_v41 = vcombine.low %v4039_v53, %v4103_v49  ;;  %v4175_v51 = vcombine.low %v4023_v47, %v4087_v17 }
 0x43d   : > { %v4326_v2 = vrot.slane %v4312_v46, %v14325_v5  ;;  %v4190_v9 = vrot.slane %v4176_v35, %v14325_v5  ;;  %v4319_v15 = vrot.slane %v4311_v41, %v14325_v5  ;;  %v4183_v19 = vrot.slane %v4175_v51, %v14325_v5 }
 0x43e   : > { %v4135_v40 = vpop.trf.xlu0  ;;  %v4119_v54 = vpop.trf.xlu1 }
 0x43f   : > { %v4327_v30 = vcombine.low %v4071_v37, %v4135_v40  ;;  %v4328_v43 = vcombine.high %v4071_v37, %v4135_v40  ;;  %v4191_v56 = vcombine.low %v4055_v62, %v4119_v54  ;;  %v4192_v4 = vcombine.high %v4055_v62, %v4119_v54 }
 0x440   : > { %v4223_v37 = vcombine.low %v14718_v20, %v14724_v18  ;;  %v4359_v54 = vcombine.low %v14715_v8, %v14721_v13 }
 0x441   : > { %v4335_v36 = vrot.slane %v4327_v30, %v14325_v5  ;;  %v4342_v6 = vrot.slane %v4328_v43, %v14325_v5  ;;  %v4199_v29 = vrot.slane %v4191_v56, %v14325_v5  ;;  %v4206_v52 = vrot.slane %v4192_v4, %v14325_v5 }
 0x442   : > { %v4374_v30 = vrot.slane %v4360_v48, %v14341_v31  ;;  %v4238_v43 = vrot.slane %v4224_v61, %v14341_v31  ;;  %v4231_v56 = vrot.slane %v4223_v37, %v14341_v31  ;;  %v4367_v61 = vrot.slane %v4359_v54, %v14341_v31 }
 0x443   : > { %v4392_v60 = vcombine.high %v4326_v2, %v4342_v6  ;;  %v4256_v11 = vcombine.high %v4190_v9, %v4206_v52  ;;  %v4239_v44 = vcombine.low %v4183_v19, %v4199_v29  ;;  %v4375_v45 = vcombine.low %v4319_v15, %v4335_v36 }
 0x444   : > { %v4240_v14 = vcombine.high %v4183_v19, %v4199_v29  ;;  %v4376_v7 = vcombine.high %v4319_v15, %v4335_v36  ;;  %v4391_v62 = vcombine.low %v4326_v2, %v4342_v6  ;;  %v4255_v49 = vcombine.low %v4190_v9, %v4206_v52 }
 0x445   : > { %v4247_v34 = vrot.slane %v4239_v44, %v14341_v31  ;;  %v4383_v10 = vrot.slane %v4375_v45, %v14341_v31  ;;  %v4406_v46 = vrot.slane %v4392_v60, %v14341_v31  ;;  %v4270_v35 = vrot.slane %v4256_v11, %v14341_v31 }
 0x446   : > { %v4254_v3 = vrot.slane %v4240_v14, %v14341_v31  ;;  %v4390_v57 = vrot.slane %v4376_v7, %v14341_v31  ;;  %v4263_v1 = vrot.slane %v4255_v49, %v14341_v31  ;;  %v4399_v2 = vrot.slane %v4391_v62, %v14341_v31 }
 0x447   : > { %v4271_v32 = vcombine.low %v4215_v38, %v4247_v34  ;;  %v4407_v59 = vcombine.low %v4351_v16, %v4383_v10  ;;  %v4272_v53 = vcombine.high %v4215_v38, %v4247_v34  ;;  %v4408_v47 = vcombine.high %v4351_v16, %v4383_v10 }
 0x448   : > { %v4273_v55 = vcombine.low %v4222_v58, %v4254_v3  ;;  %v4409_v40 = vcombine.low %v4358_v63, %v4390_v57  ;;  %v4274_v27 = vcombine.high %v4222_v58, %v4254_v3  ;;  %v4410_v36 = vcombine.high %v4358_v63, %v4390_v57 }
 0x449   : > { %v4417_v17 = vpack.i.b16 %v4407_v59, %v4271_v32  ;;  %v4419_v25 = vshrl.u32 %v4271_v32, 16  ;;  %v4420_v28 = vshrl.u32 %v4407_v59, 16  ;;  %v4427_v41 = vshrl.u32 %v4272_v53, 16 }
 0x44a   : > { %v4428_v51 = vshrl.u32 %v4408_v47, 16  ;;  %v4425_v4 = vpack.i.b16 %v4408_v47, %v4272_v53  ;;  %v4435_v9 = vshrl.u32 %v4273_v55, 16  ;;  %v14767_v6 = vcombine.low %v4238_v43, %v4270_v35 }
 0x44b   : > { %4479 = vxpose.xlu1.c.b16.start.end [1/1] (short) (narrow) %v4417_v17, 16  ;;  %v4421_v50 = vpack.i.b16 %v4420_v28, %v4419_v25  ;;  %v14769_v8 = vcombine.low %v4374_v30, %v4406_v46  ;;  %v4436_v48 = vshrl.u32 %v4409_v40, 16  ;;  %v14771_v20 = vcombine.high %v4238_v43, %v4270_v35 }
 0x44c   : > { %v4429_v13 = vpack.i.b16 %v4428_v51, %v4427_v41  ;;  %v14773_v18 = vcombine.high %v4374_v30, %v4406_v46  ;;  %v4467_v52 = vshrl.u32 %v14767_v6, 16  ;;  %v4433_v19 = vpack.i.b16 %v4409_v40, %v4273_v55 }
 0x44d   : > { %4495 = vxpose.xlu0.c.b16.start.end [1/1] (short) (narrow) %v4421_v50, 16  ;;  %v4465_v29 = vpack.i.b16 %v14769_v8, %v14767_v6  ;;  %v4468_v15 = vshrl.u32 %v14769_v8, 16  ;;  %v4475_v42 = vshrl.u32 %v14771_v20, 16  ;;  %v4275_v11 = vcombine.low %v4231_v56, %v4263_v1 }
 0x44e   : > { %v4473_v39 = vpack.i.b16 %v14773_v18, %v14771_v20  ;;  %v4476_v60 = vshrl.u32 %v14773_v18, 16  ;;  %v4411_v44 = vcombine.low %v4367_v61, %v4399_v2  ;;  %v4437_v14 = vpack.i.b16 %v4436_v48, %v4435_v9 }
 0x44f   : > { %4511 = vxpose.xlu1.c.b16.start.end [1/1] (short) (narrow) %v4425_v4, 16  ;;  %v14784_v45 = vpack.i.b16 %v4468_v15, %v4467_v52  ;;  %v4443_v7 = vshrl.u32 %v4274_v27, 16  ;;  %v4444_v22 = vshrl.u32 %v4410_v36, 16  ;;  %v4441_v16 = vpack.i.b16 %v4410_v36, %v4274_v27 }
 0x450   : > { %v14786_v12 = vpack.i.b16 %v4476_v60, %v4475_v42  ;;  %v4276_v10 = vcombine.high %v4231_v56, %v4263_v1  ;;  %v4451_v59 = vshrl.u32 %v4275_v11, 16  ;;  %v4452_v53 = vshrl.u32 %v4411_v44, 16 }
 0x451   : > { %4527 = vxpose.xlu0.c.b16.start.end [1/1] (short) (narrow) %v4429_v13, 16  ;;  %v4445_v32 = vpack.i.b16 %v4444_v22, %v4443_v7  ;;  %v4412_v47 = vcombine.high %v4367_v61, %v4399_v2  ;;  %v4449_v58 = vpack.i.b16 %v4411_v44, %v4275_v11  ;;  %v1139_v40 = vand.u32 127, %v908_v23 }
 0x452   : > { %v4453_v17 = vpack.i.b16 %v4452_v53, %v4451_v59  ;;  %v4459_v25 = vshrl.u32 %v4276_v10, 16  ;;  %v1137_v1 = vadd.s32 8, %v14211_v24 }
 0x453   : > { %4543 = vxpose.xlu1.c.b16.start.end [1/1] (short) (narrow) %v4433_v19, 16  ;;  %v4460_v28 = vshrl.u32 %v4412_v47, 16  ;;  %v4457_v55 = vpack.i.b16 %v4412_v47, %v4276_v10  ;;  %vm14790_vm2 = vcmp.gt.s32.totalorder %v1139_v40, %v14211_v24 }
 0x454   : > { %vm14799_vm3 = vcmp.gt.s32.totalorder %v1139_v40, %v1137_v1 }
 0x455   : > { %4559 = vxpose.xlu0.c.b16.start.end [1/1] (short) (narrow) %v4437_v14, 16  ;;  %v4461_v51 = vpack.i.b16 %v4460_v28, %v4459_v25 }
 0x456   : > { %v3352_v38 = vpop.f32.mrf.mxu1  ;;  %v3528_v34 = vpop.f32.mrf.mxu0 }
 0x457   : > { %4575 = vxpose.xlu1.c.b16.start.end [1/1] (short) (narrow) %v4441_v16, 16  ;;  %v3667_v4 = vmul.f32 0.25, %v3352_v38  ;;  %v3675_v9 = vmul.f32 0.25, %v3528_v34 }
 0x458   : > { %v12645_v3 = vpop.f32.mrf.mxu1  ;;  %v12669_v57 = vpop.f32.mrf.mxu0 }
 0x459   : > { %4591 = vxpose.xlu0.c.b16.start.end [1/1] (short) (narrow) %v4445_v32, 16  ;;  %v14797_v13 = vsel %vm14790_vm2, -inf, %v3667_v4  ;;  %v14805_v52 = vsel %vm14790_vm2, -inf, %v3675_v9 }
 0x45a   : > { %v3355_v37 = vpop.f32.mrf.mxu1  ;;  %v3531_v62 = vpop.f32.mrf.mxu0  ;;  %v3703_v24 = vsel %vm3314_vm1, %v14797_v13, -inf  ;;  %v3727_v44 = vsel %vm3314_vm1, %v14805_v52, -inf }
 0x45b   : > { %4607 = vxpose.xlu1.c.b16.start.end [1/1] (short) (narrow) %v4449_v58, 16  ;;  %v3676_v23 = vmul.f32 0.25, %v3531_v62  ;;  %v3668_v15 = vmul.f32 0.25, %v3355_v37 }
 0x45c   : > { %v12646_v63 = vpop.f32.mrf.mxu1  ;;  %v12670_v49 = vpop.f32.mrf.mxu0 }
 0x45d   : > { %4623 = vxpose.xlu0.c.b16.start.end [1/1] (short) (narrow) %v4453_v17, 16  ;;  %v14811_v42 = vsel %vm14799_vm3, -inf, %v3676_v23  ;;  %v14817_v14 = vsel %vm14799_vm3, -inf, %v3668_v15 }
 0x45e   : > { %v3396_v46 = vpop.f32.mrf.mxu1  ;;  %v3616_v35 = vpop.f32.mrf.mxu0  ;;  %v3730_v38 = vsel %vm3314_vm1, %v14811_v42, -inf  ;;  %v3706_v3 = vsel %vm3314_vm1, %v14817_v14, -inf }
 0x45f   : > { %4639 = vxpose.xlu1.c.b16.start.end [1/1] (short) (narrow) %v4457_v55, 16  ;;  %v3669_v60 = vmul.f32 0.25, %v3396_v46  ;;  %v3679_v16 = vmul.f32 0.25, %v3616_v35 }
 0x460   : > { %v12651_v50 = vpop.f32.mrf.mxu1  ;;  %v12681_v41 = vpop.f32.mrf.mxu0 }
 0x461   : > { %4655 = vxpose.xlu0.c.b16.start.end [1/1] (short) (narrow) %v4461_v51, 16  ;;  %v14823_v34 = vsel %vm14790_vm2, -inf, %v3669_v60  ;;  %v14835_v47 = vsel %vm14790_vm2, -inf, %v3679_v16 }
 0x462   : > { %v3399_v54 = vpop.f32.mrf.mxu1  ;;  %v3619_v30 = vpop.f32.mrf.mxu0  ;;  %v3709_v53 = vsel %vm3314_vm1, %v14823_v34, -inf  ;;  %v3739_v25 = vsel %vm3314_vm1, %v14835_v47, -inf }
 0x463   : > { %v3670_v7 = vmul.f32 0.25, %v3399_v54  ;;  %v3680_v32 = vmul.f32 0.25, %v3619_v30 }
 0x464   : > { %v12652_v43 = vpop.f32.mrf.mxu1  ;;  %v12682_v56 = vpop.f32.mrf.mxu0 }
 0x465   : > { %v14829_v57 = vsel %vm14799_vm3, -inf, %v3670_v7  ;;  %v14841_v63 = vsel %vm14799_vm3, -inf, %v3680_v32 }
 0x466   : > { %v3440_v2 = vpop.f32.mrf.mxu1  ;;  %v3712_v58 = vsel %vm3314_vm1, %v14829_v57, -inf  ;;  %v3742_v55 = vsel %vm3314_vm1, %v14841_v63, -inf }
 0x467   : > { %v3671_v37 = vmul.f32 0.25, %v3440_v2 }
 0x468   : > { %v12657_v36 = vpop.f32.mrf.mxu1 }
 0x469   : > { %v14847_v28 = vsel %vm14790_vm2, -inf, %v3671_v37 }
 0x46a   : > { %v3443_v61 = vpop.f32.mrf.mxu1  ;;  %v3715_v40 = vsel %vm3314_vm1, %v14847_v28, -inf }
 0x46b   : > { %v3672_v49 = vmul.f32 0.25, %v3443_v61 }
 0x46c   : > { %v12658_v19 = vpop.f32.mrf.mxu1  ;;  %3704 = vmax.xlane.f32.xlu1 %v3703_v24 }
 0x46d   : > { %v14853_v50 = vsel %vm14799_vm3, -inf, %v3672_v49 }
 0x46e   : > { %v3484_v11 = vpop.f32.mrf.mxu1  ;;  %3728 = vmax.xlane.f32.xlu0 %v3727_v44  ;;  %v3718_v43 = vsel %vm3314_vm1, %v14853_v50, -inf }
 0x46f   : > { %v3673_v46 = vmul.f32 0.25, %v3484_v11 }
 0x470   : > { %v12663_v22 = vpop.f32.mrf.mxu1  ;;  %3731 = vmax.xlane.f32.xlu1 %v3730_v38 }
 0x471   : > { %v14859_v54 = vsel %vm14790_vm2, -inf, %v3673_v46 }
 0x472   : > { %v3487_v10 = vpop.f32.mrf.mxu1  ;;  %3707 = vmax.xlane.f32.xlu0 %v3706_v3  ;;  %v3721_v9 = vsel %vm3314_vm1, %v14859_v54, -inf }
 0x473   : > { %v3674_v41 = vmul.f32 0.25, %v3487_v10 }
 0x474   : > { %v12664_v59 = vpop.f32.mrf.mxu1  ;;  %3710 = vmax.xlane.f32.xlu1 %v3709_v53 }
 0x475   : > { %v14865_v56 = vsel %vm14799_vm3, -inf, %v3674_v41 }
 0x476   : > { %v3572_v62 = vpop.f32.mrf.mxu1  ;;  %3713 = vmax.xlane.f32.xlu0 %v3712_v58  ;;  %v3724_v61 = vsel %vm3314_vm1, %v14865_v56, -inf }
 0x477   : > { %v3677_v4 = vmul.f32 0.25, %v3572_v62 }
 0x478   : > { %v12675_v17 = vpop.f32.mrf.mxu1  ;;  %3740 = vmax.xlane.f32.xlu1 %v3739_v25 }
 0x479   : > { %v14879_v19 = vsel %vm14790_vm2, -inf, %v3677_v4 }
 0x47a   : > { %v3575_v35 = vpop.f32.mrf.mxu1  ;;  %3743 = vmax.xlane.f32.xlu0 %v3742_v55  ;;  %v3733_v11 = vsel %vm3314_vm1, %v14879_v19, -inf }
 0x47b   : > { %v3678_v24 = vmul.f32 0.25, %v3575_v35 }
 0x47c   : > { %v12676_v51 = vpop.f32.mrf.mxu1  ;;  %3716 = vmax.xlane.f32.xlu1 %v3715_v40 }
 0x47d   : > { %v14885_v44 = vsel %vm14799_vm3, -inf, %v3678_v24 }
 0x47e   : > { %v3660_v30 = vpop.f32.mrf.mxu1  ;;  %3719 = vmax.xlane.f32.xlu0 %v3718_v43  ;;  %v3736_v22 = vsel %vm3314_vm1, %v14885_v44, -inf }
 0x47f   : > { %v3681_v1 = vmul.f32 0.25, %v3660_v30 }
 0x480   : > { %v12687_v2 = vpop.f32.mrf.mxu1  ;;  %3722 = vmax.xlane.f32.xlu1 %v3721_v9 }
 0x481   : > { %v14871_v36 = vsel %vm14790_vm2, -inf, %v3681_v1 }
 0x482   : > { %v3663_v23 = vpop.f32.mrf.mxu1  ;;  %v3745_v15 = vsel %vm3314_vm1, %v14871_v36, -inf  ;;  %3725 = vmax.xlane.f32.xlu0 %v3724_v61 }
 0x483   : > { %v3682_v7 = vmul.f32 0.25, %v3663_v23 }
 0x484   : > { %v12688_v60 = vpop.f32.mrf.mxu1  ;;  %3746 = vmax.xlane.f32.xlu1 %v3745_v15 }
 0x485   : > { %v14891_v27 = vsel %vm14799_vm3, -inf, %v3682_v7 }
 0x486   : > { %3734 = vmax.xlane.f32.xlu0 %v3733_v11  ;;  %v3748_v38 = vsel %vm3314_vm1, %v14891_v27, -inf }
 0x48a   : > { %3737 = vmax.xlane.f32.xlu0 %v3736_v22 }
 0x48e   : > { %3749 = vmax.xlane.f32.xlu0 %v3748_v38 }
 0x4ad   : > { %v14899_v16 = vpop.trf.xlu1 }
 0x4af   : > { %v14901_v10 = vpop.trf.xlu0 }
 0x4b1   : > { %4671 = vxpose.xlu1.c.b16.start.end [1/1] (short) (narrow) %v4465_v29, 16  ;;  %v14903_v3 = vpop.trf.xlu1 }
 0x4b3   : > { %v14905_v48 = vpop.trf.xlu0 }
 0x4b5   : > { %v14907_v32 = vpop.trf.xlu1 }
 0x4b7   : > { %v14909_v59 = vpop.trf.xlu0 }
 0x4b9   : > { %v14911_v53 = vpop.trf.xlu1 }
 0x4bb   : > { %4687 = vxpose.xlu0.c.b16.start.end [1/1] (short) (narrow) %v14784_v45, 16  ;;  %v14913_v37 = vpop.trf.xlu0 }
 0x4bd   : > { %v14915_v6 = vpop.trf.xlu1 }
 0x4bf   : > { %v14917_v8 = vpop.trf.xlu0 }
 0x4c1   : > { %v14919_v29 = vpop.trf.xlu1 }
 0x4c3   : > { %v14921_v45 = vpop.trf.xlu0 }
 0x4f5   : > { %v3705_v62 = vpop.xlane.xlu1 %3704 }
 0x4f6   : > { %v3751_v58 = vsub.f32 %v14797_v13, %v3705_v62 }
 0x4f7   : > { %v3729_v49 = vpop.xlane.xlu0 %3728 }
 0x4f8   : > { %v3767_v17 = vmul.f32 1.442695, %v3751_v58  ;;  %v3759_v25 = vsub.f32 %v14805_v52, %v3729_v49 }
 0x4f9   : > { %v3732_v46 = vpop.xlane.xlu1 %3731 }
 0x4fa   : > { %13245 = vpow2.f32 %v3767_v17  ;;  %v3783_v35 = vmul.f32 1.442695, %v3759_v25  ;;  %v3760_v55 = vsub.f32 %v14811_v42, %v3732_v46 }
 0x4fb   : > { %v3708_v41 = vpop.xlane.xlu0 %3707 }
 0x4fc   : > { %13247 = vpow2.f32 %v3783_v35  ;;  %v3752_v51 = vsub.f32 %v14817_v14, %v3708_v41  ;;  %v3785_v40 = vmul.f32 1.442695, %v3760_v55 }
 0x4fd   : > { %v3711_v30 = vpop.xlane.xlu1 %3710 }
 0x4fe   : > { %v3769_v43 = vmul.f32 1.442695, %v3752_v51  ;;  %v3753_v4 = vsub.f32 %v14823_v34, %v3711_v30 }
 0x4ff   : > { %v3714_v1 = vpop.xlane.xlu0 %3713 }
 0x500   : > { %13249 = vpow2.f32 %v3769_v43  ;;  %v3771_v13 = vmul.f32 1.442695, %v3753_v4  ;;  %v3754_v2 = vsub.f32 %v14829_v57, %v3714_v1 }
 0x501   : > { %13251 = vpow2.f32 %v3785_v40  ;;  %v3741_v52 = vpop.xlane.xlu1 %3740 }
 0x502   : > { %13253 = vpow2.f32 %v3771_v13  ;;  %v3773_v9 = vmul.f32 1.442695, %v3754_v2  ;;  %v3763_v42 = vsub.f32 %v14835_v47, %v3741_v52 }
 0x503   : > { %v3744_v23 = vpop.xlane.xlu0 %3743 }
 0x504   : > { %v3791_v61 = vmul.f32 1.442695, %v3763_v42  ;;  %v3764_v14 = vsub.f32 %v14841_v63, %v3744_v23  ;;  %13255 = vpow2.f32 %v3773_v9 }
 0x505   : > { %v3717_v15 = vpop.xlane.xlu1 %3716 }
 0x506   : > { %13257 = vpow2.f32 %v3791_v61  ;;  %v3793_v24 = vmul.f32 1.442695, %v3764_v14  ;;  %v3755_v34 = vsub.f32 %v14847_v28, %v3717_v15 }
 0x507   : > { %v14932_v60 = vpop.eup %13245  ;;  %v3720_v11 = vpop.xlane.xlu0 %3719 }
 0x508   : > { %v3775_v57 = vmul.f32 1.442695, %v3755_v34  ;;  %v3756_v7 = vsub.f32 %v14853_v50, %v3720_v11  ;;  %v3799_v22 = vsel %vm3314_vm1, %v14932_v60, 0.0  ;;  %13259 = vpow2.f32 %v3793_v24 }
 0x509   : > { %v14937_v47 = vpop.eup %13247  ;;  %3800 = vadd.xlane.f32.xlu1 %v3799_v22  ;;  %v3723_v63 = vpop.xlane.xlu1 %3722 }
 0x50a   : > { %13261 = vpow2.f32 %v3775_v57  ;;  %v3777_v38 = vmul.f32 1.442695, %v3756_v7  ;;  %v3757_v62 = vsub.f32 %v14859_v54, %v3723_v63  ;;  %v3823_v17 = vsel %vm3314_vm1, %v14937_v47, 0.0 }
 0x50b   : > { %v3726_v58 = vpop.xlane.xlu0 %3725 }
 0x50c   : > { %v3779_v28 = vmul.f32 1.442695, %v3757_v62  ;;  %v3758_v49 = vsub.f32 %v14865_v56, %v3726_v58  ;;  %13263 = vpow2.f32 %v3777_v38 }
 0x50d   : > { %v14943_v50 = vpop.eup %13249  ;;  %3824 = vadd.xlane.f32.xlu1 %v3823_v17  ;;  %v3747_v25 = vpop.xlane.xlu1 %3746 }
 0x50e   : > { %v14945_v46 = vpop.eup %13251  ;;  %13265 = vpow2.f32 %v3779_v28  ;;  %v3781_v35 = vmul.f32 1.442695, %v3758_v49  ;;  %v3765_v55 = vsub.f32 %v14871_v36, %v3747_v25  ;;  %v3802_v54 = vsel %vm3314_vm1, %v14943_v50, 0.0 }
 0x50f   : > { %v14950_v41 = vpop.eup %13253  ;;  %3803 = vadd.xlane.f32.xlu0 %v3802_v54  ;;  %v3735_v56 = vpop.xlane.xlu0 %3734  ;;  %v3826_v36 = vsel %vm3314_vm1, %v14945_v46, 0.0 }
 0x510   : > { %v3761_v51 = vsub.f32 %v14879_v19, %v3735_v56  ;;  %v3805_v40 = vsel %vm3314_vm1, %v14950_v41, 0.0  ;;  %13267 = vpow2.f32 %v3781_v35  ;;  %v3795_v43 = vmul.f32 1.442695, %v3765_v55 }
 0x511   : > { %3806 = vadd.xlane.f32.xlu1 %v3805_v40  ;;  %v14955_v30 = vpop.eup %13255 }
 0x512   : > { %v3787_v4 = vmul.f32 1.442695, %v3761_v51  ;;  %v3808_v42 = vsel %vm3314_vm1, %v14955_v30, 0.0 }
 0x513   : > { %v14959_v1 = vpop.eup %13257  ;;  %v3738_v13 = vpop.xlane.xlu0 %3737  ;;  %3827 = vadd.xlane.f32.xlu0 %v3826_v36 }
 0x514   : > { %13269 = vpow2.f32 %v3787_v4  ;;  %v3762_v2 = vsub.f32 %v14885_v44, %v3738_v13  ;;  %v3835_v19 = vsel %vm3314_vm1, %v14959_v1, 0.0  ;;  %v4679_v35 = vpop.trf.xlu1 }
 0x515   : > { %3836 = vadd.xlane.f32.xlu1 %v3835_v19  ;;  %v14964_v52 = vpop.eup %13259  ;;  %13271 = vpow2.f32 %v3795_v43 }
 0x516   : > { %v3789_v9 = vmul.f32 1.442695, %v3762_v2  ;;  %v3838_v34 = vsel %vm3314_vm1, %v14964_v52, 0.0 }
 0x517   : > { %v14968_v23 = vpop.eup %13261  ;;  %v3750_v61 = vpop.xlane.xlu0 %3749  ;;  %3809 = vadd.xlane.f32.xlu0 %v3808_v42 }
 0x518   : > { %13273 = vpow2.f32 %v3789_v9  ;;  %v3766_v14 = vsub.f32 %v14891_v27, %v3750_v61  ;;  %v3811_v44 = vsel %vm3314_vm1, %v14968_v23, 0.0 }
 0x519   : > { %3812 = vadd.xlane.f32.xlu1 %v3811_v44  ;;  %v14973_v15 = vpop.eup %13263 }
 0x51a   : > { %v3797_v24 = vmul.f32 1.442695, %v3766_v14  ;;  %v3814_v27 = vsel %vm3314_vm1, %v14973_v15, 0.0 }
 0x51b   : > { %v14977_v11 = vpop.eup %13265  ;;  %3839 = vadd.xlane.f32.xlu0 %v3838_v34 }
 0x51c   : > { %13275 = vpow2.f32 %v3797_v24  ;;  %v3817_v57 = vsel %vm3314_vm1, %v14977_v11, 0.0 }
 0x51d   : > { %3818 = vadd.xlane.f32.xlu1 %v3817_v57  ;;  %v14983_v7 = vpop.eup %13267  ;;  %v15007_v54 = vpop.trf.xlu0 }
 0x51e   : > { %v3820_v63 = vsel %vm3314_vm1, %v14983_v7, 0.0 }
 0x51f   : > { %3815 = vadd.xlane.f32.xlu0 %v3814_v27 }
 0x521   : > { %v14985_v22 = vpop.eup %13269 }
 0x522   : > { %v3829_v38 = vsel %vm3314_vm1, %v14985_v22, 0.0  ;;  %v14991_v62 = vpop.eup %13271 }
 0x523   : > { %3821 = vadd.xlane.f32.xlu0 %v3820_v63  ;;  %3830 = vadd.xlane.f32.xlu1 %v3829_v38  ;;  %v3841_v49 = vsel %vm3314_vm1, %v14991_v62, 0.0 }
 0x525   : > { %v14993_v58 = vpop.eup %13273 }
 0x526   : > { %v3832_v28 = vsel %vm3314_vm1, %v14993_v58, 0.0 }
 0x527   : > { %3833 = vadd.xlane.f32.xlu0 %v3832_v28  ;;  %3842 = vadd.xlane.f32.xlu1 %v3841_v49  ;;  %v4803_v28 = vcombine.low %v14901_v10, %v14909_v59  ;;  %v4735_v49 = vcombine.low %v14899_v16, %v14907_v32 }
 0x529   : > { %v14999_v17 = vpop.eup %13275  ;;  %v15030_v59 = vrot.slane %v4803_v28, %v14325_v5  ;;  %v15033_v16 = vrot.slane %v4735_v49, %v14325_v5 }
 0x52a   : > { %v3844_v25 = vsel %vm3314_vm1, %v14999_v17, 0.0 }
 0x52b   : > { %3845 = vadd.xlane.f32.xlu0 %v3844_v25  ;;  %v4743_v25 = vcombine.low %v14903_v3, %v14911_v53 }
 0x52d   : > { %v15036_v3 = vrot.slane %v4743_v25, %v14325_v5 }
 0x554   : > { %4703 = vxpose.xlu1.c.b16.start.end [1/1] (short) (narrow) %v4473_v39, 16 }
 0x558   : > { %4719 = vxpose.xlu0.c.b16.start.end [1/1] (short) (narrow) %v14786_v12, 16 }
 0x592   : > { %v3801_v55 = vpop.xlane.xlu1 %3800 }
 0x593   : > { %13277 = vrcp.f32 %v3801_v55 }
 0x596   : > { %v3825_v56 = vpop.xlane.xlu1 %3824 }
 0x598   : > { %v3804_v51 = vpop.xlane.xlu0 %3803 }
 0x599   : > { %13279 = vrcp.f32 %v3804_v51 }
 0x59a   : > { %v3807_v40 = vpop.xlane.xlu1 %3806 }
 0x59b   : > { %13281 = vrcp.f32 %v3807_v40  ;;  %v4767_v40 = vcombine.low %v15033_v16, %v15036_v3 }
 0x59c   : > { %v3828_v43 = vpop.xlane.xlu0 %3827 }
 0x59e   : > { %v15009_v4 = vpop.xlane.xlu1 %3836 }
 0x5a0   : > { %v3810_v36 = vpop.xlane.xlu0 %3809  ;;  %v13278_v20 = vpop.eup %13277 }
 0x5a1   : > { %13283 = vrcp.f32 %v3810_v36  ;;  %v3848_v12 = vmul.f32 %v13278_v20, %v14932_v60 }
 0x5a2   : > { %v3813_v13 = vpop.xlane.xlu1 %3812 }
 0x5a4   : > { %v3840_v18 = vpop.xlane.xlu0 %3839 }
 0x5a6   : > { %v13280_v39 = vpop.eup %13279  ;;  %v3819_v19 = vpop.xlane.xlu1 %3818 }
 0x5a7   : > { %v3850_v2 = vmul.f32 %v13280_v39, %v14943_v50  ;;  %v4775_v39 = vrot.slane %v4767_v40, %v14341_v31 }
 0x5a8   : > { %v3816_v9 = vpop.xlane.xlu0 %3815  ;;  %v13282_v14 = vpop.eup %13281 }
 0x5a9   : > { %v3879_v42 = vpack.c.bf16 %v3850_v2, %v3848_v12  ;;  %v3852_v57 = vmul.f32 %v13282_v14, %v14950_v41  ;;  %13285 = vrcp.f32 %v3816_v9  ;;  %v4811_v41 = vcombine.low %v14905_v48, %v14913_v37 }
 0x5aa   : > { %13287 = vrcp.f32 %v3813_v13  ;;  %v4819_v37 = vcombine.low %v14917_v8, %v15007_v54 }
 0x5ab   : > { %v4899_v61 = vsel %vm3314_vm1, %v3879_v42, 0  ;;  %v15039_v48 = vrot.slane %v4811_v41, %v14325_v5 }
 0x5ac   : > { %v3822_v44 = vpop.xlane.xlu0 %3821  ;;  %12690 = vmatpush3.bf16.xpose.msra.mxu0 %v4899_v61  ;;  %v3831_v24 = vpop.xlane.xlu1 %3830  ;;  %v4826_v8 = vrot.slane %v4819_v37, %v14325_v5 }
 0x5ad   : > { %12701 = vmatprep.subr.bf16.mxu0 %v13785_v21  ;;  %13289 = vrcp.f32 %v3822_v44  ;;  %v4836_v25 = vcombine.high %v15030_v59, %v15039_v48 }
 0x5ae   : > { %v13284_v34 = vpop.eup %13283  ;;  %13291 = vrcp.f32 %v3819_v19 }
 0x5af   : > { %v3854_v27 = vmul.f32 %v13284_v34, %v14955_v30  ;;  %v4751_v30 = vcombine.low %v14915_v6, %v4679_v35  ;;  %13293 = vrcp.f32 %v3828_v43 }
 0x5b0   : > { %v3834_v60 = vpop.xlane.xlu0 %3833  ;;  %v3843_v63 = vpop.xlane.xlu1 %3842  ;;  %13295 = vrcp.f32 %v3825_v56  ;;  %v4835_v56 = vcombine.low %v15030_v59, %v15039_v48 }
 0x5b1   : > { %v3880_v50 = vpack.c.bf16 %v3854_v27, %v3852_v57  ;;  %v15042_v32 = vrot.slane %v4751_v30, %v14325_v5  ;;  %13297 = vrcp.f32 %v3834_v60 }
 0x5b2   : > { %13299 = vrcp.f32 %v3831_v24  ;;  %v4843_v19 = vrot.slane %v4835_v56, %v14341_v31 }
 0x5b3   : > { %v4946_v38 = vsel %vm3314_vm1, %v3880_v50, 0  ;;  %13301 = vrcp.f32 %v3840_v18 }
 0x5b4   : > { %12696 = vmatpush3.bf16.xpose.msra.mxu1 %v4946_v38  ;;  %v3846_v55 = vpop.xlane.xlu0 %3845  ;;  %13303 = vrcp.f32 %v15009_v4 }
 0x5b5   : > { %12707 = vmatprep.subr.bf16.mxu1 %v13785_v21  ;;  %13305 = vrcp.f32 %v3846_v55 }
 0x5b6   : > { %v4711_v51 = vpop.trf.xlu1  ;;  %v13286_v43 = vpop.eup %13285  ;;  %13307 = vrcp.f32 %v3843_v63 }
 0x5b7   : > { %v4759_v10 = vcombine.low %v14919_v29, %v4711_v51  ;;  %v13288_v13 = vpop.eup %13287  ;;  %v3858_v12 = vmul.f32 %v13286_v43, %v14973_v15  ;;  %v4768_v51 = vcombine.high %v15033_v16, %v15036_v3 }
 0x5b8   : > { %v3856_v9 = vmul.f32 %v13288_v13, %v14968_v23 }
 0x5b9   : > { %v15045_v53 = vrot.slane %v4759_v10, %v14325_v5 }
 0x5ba   : > { %v4727_v6 = vpop.trf.xlu0  ;;  %v13290_v20 = vpop.eup %13289  ;;  %v3881_v18 = vpack.c.bf16 %v3858_v12, %v3856_v9 }
 0x5bb   : > { %v4783_v29 = vcombine.low %v15042_v32, %v15045_v53  ;;  %v4827_v35 = vcombine.low %v14921_v45, %v4727_v6  ;;  %v13292_v2 = vpop.eup %13291  ;;  %v3862_v14 = vmul.f32 %v13290_v20, %v14983_v7 }
 0x5bc   : > { %v13294_v44 = vpop.eup %13293  ;;  %v3860_v34 = vmul.f32 %v13292_v2, %v14977_v11  ;;  %v4993_v7 = vsel %vm3314_vm1, %v3881_v18, 0 }
 0x5bd   : > { %v4834_v36 = vrot.slane %v4827_v35, %v14325_v5  ;;  %v4791_v54 = vrot.slane %v4783_v29, %v14341_v31  ;;  %v13296_v15 = vpop.eup %13295  ;;  %v3866_v23 = vmul.f32 %v13294_v44, %v14945_v46  ;;  %v4784_v46 = vcombine.high %v15042_v32, %v15045_v53 }
 0x5be   : > { %v3882_v50 = vpack.c.bf16 %v3862_v14, %v3860_v34  ;;  %v13298_v4 = vpop.eup %13297  ;;  %v3864_v11 = vmul.f32 %v13296_v15, %v14937_v47  ;;  %v4850_v53 = vrot.slane %v4836_v25, %v14341_v31  ;;  %v4782_v35 = vrot.slane %v4768_v51, %v14341_v31 }
 0x5bf   : > { %v4851_v45 = vcombine.low %v4826_v8, %v4834_v36  ;;  %v4799_v42 = vcombine.low %v4775_v39, %v4791_v54  ;;  %v4852_v38 = vcombine.high %v4826_v8, %v4834_v36  ;;  %v13300_v63 = vpop.eup %13299  ;;  %v4800_v41 = vcombine.high %v4775_v39, %v4791_v54 }
 0x5c0   : > { %v5040_v30 = vsel %vm3314_vm1, %v3882_v50, 0  ;;  %v3870_v55 = vmul.f32 %v13298_v4, %v14993_v58  ;;  %v3883_v59 = vpack.c.bf16 %v3866_v23, %v3864_v11  ;;  %v3868_v48 = vmul.f32 %v13300_v63, %v14985_v22  ;;  %v13302_v32 = vpop.eup %13301 }
 0x5c1   : > { %v4859_v61 = vrot.slane %v4851_v45, %v14341_v31  ;;  %v4874_v57 = vshrl.u32 %v4799_v42, 16  ;;  %v4866_v47 = vrot.slane %v4852_v38, %v14341_v31  ;;  %v13304_v37 = vpop.eup %13303  ;;  %v4798_v58 = vrot.slane %v4784_v46, %v14341_v31 }
 0x5c2   : > { %v4880_v6 = vshrl.u32 %v4800_v41, 16  ;;  %v3884_v3 = vpack.c.bf16 %v3870_v55, %v3868_v48  ;;  %v13306_v29 = vpop.eup %13305  ;;  %v5087_v43 = vsel %vm3314_vm1, %v3883_v59, 0  ;;  %v3874_v22 = vmul.f32 %v13302_v32, %v14964_v52 }
 0x5c3   : > { %v4867_v24 = vcombine.low %v4843_v19, %v4859_v61  ;;  %v4868_v28 = vcombine.high %v4843_v19, %v4859_v61  ;;  %v4869_v40 = vcombine.low %v4850_v53, %v4866_v47  ;;  %v13308_v36 = vpop.eup %13307  ;;  %v4801_v13 = vcombine.low %v4782_v35, %v4798_v58 }
 0x5c4   : > { %v5134_v8 = vsel %vm3314_vm1, %v3884_v3, 0  ;;  %v3872_v54 = vmul.f32 %v13304_v37, %v14959_v1  ;;  %v3878_v20 = vmul.f32 %v13306_v29, %v14999_v17  ;;  %v3876_v45 = vmul.f32 %v13308_v36, %v14991_v62  ;;  %v13157_v29 = vld [vmem:[#allocation8 + $0x38] sm:$0xff]  }
 0x5c5   : > { %v4873_v27 = vpack.i.b16 %v4867_v24, %v4799_v42  ;;  %v4875_v60 = vshrl.u32 %v4867_v24, 16  ;;  %v4881_v10 = vshrl.u32 %v4868_v28, 16  ;;  %v4879_v16 = vpack.i.b16 %v4868_v28, %v4800_v41 }
 0x5c6   : > { %v4887_v52 = vshrl.u32 %v4869_v40, 16  ;;  %v3885_v39 = vpack.c.bf16 %v3874_v22, %v3872_v54  ;;  %v4886_v12 = vshrl.u32 %v4801_v13, 16  ;;  %v4885_v2 = vpack.i.b16 %v4869_v40, %v4801_v13 }
 0x5c7   : > { %12692 = vmatmul.mubr.msk.bf16.vlgmr.msra.gmra.mxu0 %vm3314_vm1, %v4873_v27  ;;  %v4876_v49 = vpack.i.b16 %v4875_v60, %v4874_v57  ;;  %v4882_v56 = vpack.i.b16 %v4881_v10, %v4880_v6  ;;  %v3886_v19 = vpack.c.bf16 %v3878_v20, %v3876_v45  ;;  %v4870_v9 = vcombine.high %v4850_v53, %v4866_v47 }
 0x5c8   : > { %12702 = vmatpush3.bf16.xpose.msra.mxu0 %v4993_v7  ;;  %12703 = vmatprep.mubr.msk.bf16.mxu0 %vm13791_vm0, %v13785_v21  ;;  %v5181_v1 = vsel %vm3314_vm1, %v3885_v39, 0  ;;  %v4888_v42 = vpack.i.b16 %v4887_v52, %v4886_v12  ;;  %v4802_v17 = vcombine.high %v4782_v35, %v4798_v58  ;;  %v13158_v35 = vld [vmem:[#allocation8 + $0x30] sm:$0xff]  }
 0x5c9   : > { %12698 = vmatmul.mubr.msk.bf16.vlgmr.msra.gmra.mxu1 %vm3314_vm1, %v4876_v49  ;;  %12713 = vmatprep.subr.bf16.mxu0 %v13785_v21  ;;  %v5228_v61 = vsel %vm3314_vm1, %v3886_v19, 0  ;;  %v4893_v62 = vshrl.u32 %v4870_v9, 16 }
 0x5ca   : > { %12708 = vmatpush3.bf16.xpose.msra.mxu1 %v5040_v30  ;;  %12709 = vmatprep.mubr.msk.bf16.mxu1 %vm13791_vm0, %v13785_v21  ;;  %v4892_v14 = vshrl.u32 %v4802_v17, 16  ;;  %v4891_v44 = vpack.i.b16 %v4870_v9, %v4802_v17 }
 0x5cb   : > { %12719 = vmatprep.subr.bf16.mxu1 %v13785_v21 }
 0x5cc   : > { %v4894_v24 = vpack.i.b16 %v4893_v62, %v4892_v14 }
 0x5cf   : > { %12704 = vmatmul.mubr.msk.bf16.vlgmr.msra.gmra.mxu0 %vm3314_vm1, %v4879_v16 }
 0x5d0   : > { %12714 = vmatpush3.bf16.xpose.msra.mxu0 %v5087_v43  ;;  %12715 = vmatprep.mubr.msk.bf16.mxu0 %vm13791_vm0, %v13785_v21 }
 0x5d1   : > { %12710 = vmatmul.mubr.msk.bf16.vlgmr.msra.gmra.mxu1 %vm3314_vm1, %v4882_v56  ;;  %12725 = vmatprep.subr.bf16.mxu0 %v13785_v21 }
 0x5d2   : > { %12720 = vmatpush3.bf16.xpose.msra.mxu1 %v5134_v8  ;;  %12721 = vmatprep.mubr.msk.bf16.mxu1 %vm13791_vm0, %v13785_v21 }
 0x5d3   : > { %12731 = vmatprep.subr.bf16.mxu1 %v13785_v21 }
 0x5d7   : > { %12716 = vmatmul.mubr.msk.bf16.vlgmr.msra.gmra.mxu0 %vm3314_vm1, %v4885_v2 }
 0x5d8   : > { %12726 = vmatpush3.bf16.xpose.msra.mxu0 %v5181_v1  ;;  %12727 = vmatprep.mubr.msk.bf16.mxu0 %vm13791_vm0, %v13785_v21 }
 0x5d9   : > { %12722 = vmatmul.mubr.msk.bf16.vlgmr.msra.gmra.mxu1 %vm3314_vm1, %v4888_v42  ;;  %12737 = vmatprep.subr.bf16.mxu0 %v13785_v21 }
 0x5da   : > { %12732 = vmatpush3.bf16.xpose.msra.mxu1 %v5228_v61  ;;  %12733 = vmatprep.mubr.msk.bf16.mxu1 %vm13791_vm0, %v13785_v21 }
 0x5df   : > { %12728 = vmatmul.mubr.msk.bf16.vlgmr.msra.gmra.mxu0 %vm3314_vm1, %v4891_v44 }
 0x5e0   : > { %12753 = vmatprep.mubr.msk.bf16.mxu0 %vm13791_vm0, %v13785_v21  ;;  %12738 = vmatpush3.bf16.msra.mxu0 %v13157_v29 }
 0x5e1   : > { %12734 = vmatmul.mubr.msk.bf16.vlgmr.msra.gmra.mxu1 %vm3314_vm1, %v4894_v24  ;;  %12739 = vmatprep.subr.bf16.mxu0 %v13785_v21 }
 0x5e2   : > { %6444 = vmatprep.mubr.bf16.mxu1 %v13784_v0 }
 0x5e4   : > { %12740 = vmatpush3.bf16.msra.mxu0 %v13158_v35 }
 0x5e5   : > { %12741 = vmatprep.subr.bf16.mxu0 %v13785_v21 }
 0x687   : > { %v4935_v18 = vpop.f32.mrf.mxu0 }
 0x688   : > { %5271 = vxpose.xlu1.b32.start [1/2] (short) (narrow) %v4935_v18, 16 }
 0x689   : > { %v12693_v34 = vpop.f32.mrf.mxu0  ;;  %v4982_v15 = vpop.f32.mrf.mxu1 }
 0x68a   : > { %5303 = vxpose.xlu0.b32.start [1/2] (short) (narrow) %v4982_v15, 16 }
 0x68b   : > { %v4938_v57 = vpop.f32.mrf.mxu0  ;;  %v12699_v27 = vpop.f32.mrf.mxu1 }
 0x68c   : > { %5272 = vxpose.xlu1.b32.end [2/2] (short) (narrow) %v4938_v57, 16 }
 0x68d   : > { %v12694_v60 = vpop.f32.mrf.mxu0  ;;  %v4985_v50 = vpop.f32.mrf.mxu1 }
 0x68e   : > { %5304 = vxpose.xlu0.b32.end [2/2] (short) (narrow) %v4985_v50, 16 }
 0x68f   : > { %v12700_v4 = vpop.f32.mrf.mxu1  ;;  %v5029_v23 = vpop.f32.mrf.mxu0 }
 0x691   : > { %v12705_v38 = vpop.f32.mrf.mxu0  ;;  %v5076_v28 = vpop.f32.mrf.mxu1 }
 0x692   : > { %5367 = vxpose.xlu1.b32.start [1/2] (short) (narrow) %v5076_v28, 16  ;;  %5335 = vxpose.xlu0.b32.start [1/2] (short) (narrow) %v5029_v23, 16 }
 0x693   : > { %v5032_v7 = vpop.f32.mrf.mxu0  ;;  %v12711_v49 = vpop.f32.mrf.mxu1 }
 0x695   : > { %v12706_v63 = vpop.f32.mrf.mxu0  ;;  %v5079_v25 = vpop.f32.mrf.mxu1 }
 0x696   : > { %5368 = vxpose.xlu1.b32.end [2/2] (short) (narrow) %v5079_v25, 16  ;;  %5336 = vxpose.xlu0.b32.end [2/2] (short) (narrow) %v5032_v7, 16 }
 0x697   : > { %v12712_v11 = vpop.f32.mrf.mxu1  ;;  %v5123_v46 = vpop.f32.mrf.mxu0 }
 0x699   : > { %v12717_v41 = vpop.f32.mrf.mxu0  ;;  %v5170_v30 = vpop.f32.mrf.mxu1 }
 0x69a   : > { %5431 = vxpose.xlu1.b32.start [1/2] (short) (narrow) %v5170_v30, 16  ;;  %5399 = vxpose.xlu0.b32.start [1/2] (short) (narrow) %v5123_v46, 16 }
 0x69b   : > { %v5126_v55 = vpop.f32.mrf.mxu0  ;;  %v12723_v51 = vpop.f32.mrf.mxu1 }
 0x69d   : > { %v12718_v47 = vpop.f32.mrf.mxu0  ;;  %v5173_v10 = vpop.f32.mrf.mxu1 }
 0x69e   : > { %5432 = vxpose.xlu1.b32.end [2/2] (short) (narrow) %v5173_v10, 16  ;;  %5400 = vxpose.xlu0.b32.end [2/2] (short) (narrow) %v5126_v55, 16 }
 0x69f   : > { %v12724_v59 = vpop.f32.mrf.mxu1  ;;  %v5217_v48 = vpop.f32.mrf.mxu0 }
 0x6a1   : > { %v12729_v32 = vpop.f32.mrf.mxu0  ;;  %v5264_v53 = vpop.f32.mrf.mxu1 }
 0x6a2   : > { %5495 = vxpose.xlu1.b32.start [1/2] (short) (narrow) %v5264_v53, 16  ;;  %5463 = vxpose.xlu0.b32.start [1/2] (short) (narrow) %v5217_v48, 16 }
 0x6a3   : > { %v5220_v37 = vpop.f32.mrf.mxu0  ;;  %v12735_v58 = vpop.f32.mrf.mxu1 }
 0x6a5   : > { %v12730_v6 = vpop.f32.mrf.mxu0  ;;  %v5267_v16 = vpop.f32.mrf.mxu1 }
 0x6a6   : > { %5496 = vxpose.xlu1.b32.end [2/2] (short) (narrow) %v5267_v16, 16  ;;  %5464 = vxpose.xlu0.b32.end [2/2] (short) (narrow) %v5220_v37, 16 }
 0x6a7   : > { %v12736_v3 = vpop.f32.mrf.mxu1 }
 0x704   : > { %v5287_v40 = vpop.trf.xlu1 }
 0x706   : > { %v5319_v43 = vpop.trf.xlu0 }
 0x708   : > { %v5288_v56 = vpop.trf.xlu1 }
 0x70a   : > { %v5320_v22 = vpop.trf.xlu0 }
 0x70e   : > { %v5383_v36 = vpop.trf.xlu1  ;;  %v5351_v13 = vpop.trf.xlu0 }
 0x70f   : > { %v5543_v8 = vcombine.low %v5319_v43, %v5383_v36  ;;  %v5544_v54 = vcombine.high %v5319_v43, %v5383_v36  ;;  %v5527_v20 = vcombine.low %v5287_v40, %v5351_v13  ;;  %v5528_v52 = vcombine.high %v5287_v40, %v5351_v13 }
 0x711   : > { %v5551_v39 = vrot.slane %v5543_v8, %v14325_v5  ;;  %v5558_v45 = vrot.slane %v5544_v54, %v14325_v5  ;;  %v5535_v12 = vrot.slane %v5527_v20, %v14325_v5  ;;  %v5542_v2 = vrot.slane %v5528_v52, %v14325_v5 }
 0x712   : > { %v5384_v19 = vpop.trf.xlu1  ;;  %v5352_v9 = vpop.trf.xlu0 }
 0x713   : > { %v5591_v1 = vcombine.low %v5535_v12, %v5551_v39  ;;  %v5592_v42 = vcombine.high %v5535_v12, %v5551_v39  ;;  %v5607_v17 = vcombine.low %v5542_v2, %v5558_v45  ;;  %v5608_v61 = vcombine.high %v5542_v2, %v5558_v45 }
 0x714   : > { %v5679_v62 = vcombine.low %v5320_v22, %v5384_v19  ;;  %v5680_v14 = vcombine.high %v5320_v22, %v5384_v19  ;;  %v5663_v44 = vcombine.low %v5288_v56, %v5352_v9  ;;  %v5664_v24 = vcombine.high %v5288_v56, %v5352_v9 }
 0x715   : > { %v5599_v18 = vrot.slane %v5591_v1, %v14341_v31  ;;  %v5606_v34 = vrot.slane %v5592_v42, %v14341_v31  ;;  %v5615_v15 = vrot.slane %v5607_v17, %v14341_v31  ;;  %v5622_v57 = vrot.slane %v5608_v61, %v14341_v31 }
 0x716   : > { %v5687_v27 = vrot.slane %v5679_v62, %v14325_v5  ;;  %v5694_v60 = vrot.slane %v5680_v14, %v14325_v5  ;;  %v5671_v50 = vrot.slane %v5663_v44, %v14325_v5  ;;  %v5678_v4 = vrot.slane %v5664_v24, %v14325_v5  ;;  %v5447_v23 = vpop.trf.xlu1  ;;  %v5415_v38 = vpop.trf.xlu0 }
 0x717   : > { %v12353_v28 = vcombine.low %v5599_v18, %v5606_v34  ;;  %v12355_v7 = vcombine.high %v5599_v18, %v5606_v34  ;;  %v12357_v49 = vcombine.low %v5615_v15, %v5622_v57  ;;  %v12359_v63 = vcombine.high %v5615_v15, %v5622_v57 }
 0x718   : > { %v5727_v25 = vcombine.low %v5671_v50, %v5687_v27  ;;  %v5728_v11 = vcombine.high %v5671_v50, %v5687_v27  ;;  %v5743_v46 = vcombine.low %v5678_v4, %v5694_v60  ;;  %v5744_v41 = vcombine.high %v5678_v4, %v5694_v60 }
 0x719   : > { %v5807_v30 = vrot.slane %v12353_v28, %v14325_v5  ;;  %v5823_v55 = vrot.slane %v12355_v7, %v14325_v5  ;;  %v5839_v51 = vrot.slane %v12357_v49, %v14325_v5  ;;  %v5855_v47 = vrot.slane %v12359_v63, %v14325_v5 }
 0x71a   : > { %v5735_v10 = vrot.slane %v5727_v25, %v14341_v31  ;;  %v5742_v59 = vrot.slane %v5728_v11, %v14341_v31  ;;  %v5751_v48 = vrot.slane %v5743_v46, %v14341_v31  ;;  %v5758_v32 = vrot.slane %v5744_v41, %v14341_v31  ;;  %v5448_v53 = vpop.trf.xlu1  ;;  %v5416_v37 = vpop.trf.xlu0 }
 0x71b   : > { %v5864_v58 = vcombine.high %v5807_v30, %v5823_v55  ;;  %v5896_v6 = vcombine.high %v5839_v51, %v5855_v47  ;;  %v5863_v16 = vcombine.low %v5807_v30, %v5823_v55  ;;  %v5895_v3 = vcombine.low %v5839_v51, %v5855_v47 }
 0x71c   : > { %v12361_v29 = vcombine.low %v5735_v10, %v5742_v59  ;;  %v12363_v35 = vcombine.high %v5735_v10, %v5742_v59  ;;  %v12365_v40 = vcombine.low %v5751_v48, %v5758_v32  ;;  %v12367_v43 = vcombine.high %v5751_v48, %v5758_v32  ;;  %v13159_v10 = vld [vmem:[#allocation8 + $0x28] sm:$0xff]  }
 0x71d   : > { %v15142_v56 = vrot.slane %v5864_v58, %v14341_v31  ;;  %v15145_v22 = vrot.slane %v5896_v6, %v14341_v31  ;;  %v15148_v36 = vrot.slane %v5863_v16, %v14341_v31  ;;  %v15151_v13 = vrot.slane %v5895_v3, %v14341_v31  ;;  %12742 = vmatpush3.bf16.msra.mxu0 %v13159_v10  ;;  %v13160_v3 = vld [vmem:[#allocation8 + $0x20] sm:$0xff]  }
 0x71e   : > { %v5943_v8 = vrot.slane %v12361_v29, %v14325_v5  ;;  %v5959_v54 = vrot.slane %v12363_v35, %v14325_v5  ;;  %v5975_v20 = vrot.slane %v12365_v40, %v14325_v5  ;;  %v5991_v52 = vrot.slane %v12367_v43, %v14325_v5  ;;  %v5511_v39 = vpop.trf.xlu1  ;;  %v5479_v45 = vpop.trf.xlu0  ;;  %12743 = vmatprep.subr.bf16.mxu0 %v13785_v21 }
 0x71f   : > { %v5575_v12 = vcombine.low %v5447_v23, %v5511_v39  ;;  %v5576_v2 = vcombine.high %v5447_v23, %v5511_v39  ;;  %v5559_v19 = vcombine.low %v5415_v38, %v5479_v45  ;;  %v5560_v9 = vcombine.high %v5415_v38, %v5479_v45 }
 0x720   : > { %v5929_v1 = vcombine.low %v15142_v56, %v15145_v22  ;;  %v6000_v42 = vcombine.high %v5943_v8, %v5959_v54  ;;  %v6032_v17 = vcombine.high %v5975_v20, %v5991_v52  ;;  %v5928_v61 = vcombine.high %v15148_v36, %v15151_v13 }
 0x721   : > { %v5583_v62 = vrot.slane %v5575_v12, %v14325_v5  ;;  %v5590_v14 = vrot.slane %v5576_v2, %v14325_v5  ;;  %v5567_v44 = vrot.slane %v5559_v19, %v14325_v5  ;;  %v5574_v24 = vrot.slane %v5560_v9, %v14325_v5  ;;  %12744 = vmatpush3.bf16.msra.mxu0 %v13160_v3 }
 0x722   : > { %v5512_v18 = vpop.trf.xlu1  ;;  %v5480_v34 = vpop.trf.xlu0  ;;  %v6014_v15 = vrot.slane %v6000_v42, %v14341_v31  ;;  %v6046_v57 = vrot.slane %v6032_v17, %v14341_v31  ;;  %v5999_v27 = vcombine.low %v5943_v8, %v5959_v54  ;;  %v6031_v60 = vcombine.low %v5975_v20, %v5991_v52  ;;  %12745 = vmatprep.subr.bf16.mxu0 %v13785_v21 }
 0x723   : > { %v5623_v50 = vcombine.low %v5567_v44, %v5583_v62  ;;  %v5624_v4 = vcombine.high %v5567_v44, %v5583_v62  ;;  %v5639_v23 = vcombine.low %v5574_v24, %v5590_v14  ;;  %v5640_v38 = vcombine.high %v5574_v24, %v5590_v14  ;;  %v13161_v62 = vld [vmem:[#allocation8 + $0x18] sm:$0xff]  }
 0x724   : > { %v5711_v28 = vcombine.low %v5448_v53, %v5512_v18  ;;  %v5712_v7 = vcombine.high %v5448_v53, %v5512_v18  ;;  %v5695_v49 = vcombine.low %v5416_v37, %v5480_v34  ;;  %v5696_v63 = vcombine.high %v5416_v37, %v5480_v34 }
 0x725   : > { %v5631_v25 = vrot.slane %v5623_v50, %v14341_v31  ;;  %v5638_v11 = vrot.slane %v5624_v4, %v14341_v31  ;;  %v5647_v46 = vrot.slane %v5639_v23, %v14341_v31  ;;  %v5654_v41 = vrot.slane %v5640_v38, %v14341_v31  ;;  %12746 = vmatpush3.bf16.msra.mxu0 %v13161_v62  ;;  %v13180_v62 = vld [vmem:[#allocation10 + $0x20] ss:$8 sps:$4 sm:$0xff]  }
 0x726   : > { %v5719_v30 = vrot.slane %v5711_v28, %v14325_v5  ;;  %v5726_v55 = vrot.slane %v5712_v7, %v14325_v5  ;;  %v5703_v51 = vrot.slane %v5695_v49, %v14325_v5  ;;  %v5710_v47 = vrot.slane %v5696_v63, %v14325_v5  ;;  %v13162_v28 = vld [vmem:[#allocation8 + $0x10] sm:$0xff]   ;;  %12747 = vmatprep.subr.bf16.mxu0 %v13785_v21 }
 0x727   : > { %v12354_v59 = vcombine.low %v5631_v25, %v5638_v11  ;;  %v12356_v48 = vcombine.high %v5631_v25, %v5638_v11  ;;  %v12358_v32 = vcombine.low %v5647_v46, %v5654_v41  ;;  %v12360_v53 = vcombine.high %v5647_v46, %v5654_v41 }
 0x728   : > { %v5759_v37 = vcombine.low %v5703_v51, %v5719_v30  ;;  %v5760_v58 = vcombine.high %v5703_v51, %v5719_v30  ;;  %v5775_v6 = vcombine.low %v5710_v47, %v5726_v55  ;;  %v5776_v16 = vcombine.high %v5710_v47, %v5726_v55 }
 0x729   : > { %v5814_v29 = vrot.slane %v12354_v59, %v14325_v5  ;;  %v5830_v35 = vrot.slane %v12356_v48, %v14325_v5  ;;  %v5846_v40 = vrot.slane %v12358_v32, %v14325_v5  ;;  %v5862_v43 = vrot.slane %v12360_v53, %v14325_v5  ;;  %12748 = vmatpush3.bf16.msra.mxu0 %v13162_v28  ;;  %v13163_v32 = vld [vmem:[#allocation8 + $0x8] sm:$0xff]   ;;  %v13165_v53 = vld [vmem:[#allocation10 + $0x70] ss:$8 sps:$4 sm:$0xff]  }
 0x72a   : > { %v5767_v8 = vrot.slane %v5759_v37, %v14341_v31  ;;  %v5774_v54 = vrot.slane %v5760_v58, %v14341_v31  ;;  %v5783_v20 = vrot.slane %v5775_v6, %v14341_v31  ;;  %v5790_v52 = vrot.slane %v5776_v16, %v14341_v31  ;;  %12749 = vmatprep.subr.bf16.mxu0 %v13785_v21  ;;  %v13167_v37 = vld [vmem:[#allocation10 + $0x74] ss:$8 sps:$4 sm:$0xff]  }
 0x72b   : > { %v6065_v39 = vcombine.low %v6014_v15, %v6046_v57  ;;  %v15185_v45 = vrot.slane %v5999_v27, %v14341_v31  ;;  %v15188_v12 = vrot.slane %v6031_v60, %v14341_v31  ;;  %v5930_v2 = vcombine.high %v15142_v56, %v15145_v22  ;;  %6412 = vmatprep.subr.bf16.mxu1 %v13167_v37 }
 0x72c   : > { %v12362_v19 = vcombine.low %v5767_v8, %v5774_v54  ;;  %v12364_v9 = vcombine.high %v5767_v8, %v5774_v54  ;;  %v12366_v42 = vcombine.low %v5783_v20, %v5790_v52  ;;  %v12368_v17 = vcombine.high %v5783_v20, %v5790_v52  ;;  %6413 = vmatpush1.bf16.msra.mxu1 %v13165_v53  ;;  %v13168_v8 = vld [vmem:[#allocation10 + $0x60] ss:$8 sps:$4 sm:$0xff]   ;;  %v13173_v52 = vld [vmem:[#allocation10 + $0x54] ss:$8 sps:$4 sm:$0xff]  }
 0x72d   : > { %v13060_v14 = vpack.i.bf16 %v6065_v39, %v5929_v1  ;;  %v6064_v44 = vcombine.high %v15185_v45, %v15188_v12  ;;  %v6066_v24 = vcombine.high %v6014_v15, %v6046_v57  ;;  %v5879_v18 = vcombine.low %v5814_v29, %v5830_v35  ;;  %12750 = vmatpush3.bf16.msra.mxu0 %v13163_v32  ;;  %v13171_v39 = vld [vmem:[#allocation10 + $0x50] ss:$8 sps:$4 sm:$0xff]  }
 0x72e   : > { %v5950_v34 = vrot.slane %v12362_v19, %v14325_v5  ;;  %v5966_v27 = vrot.slane %v12364_v9, %v14325_v5  ;;  %v5982_v56 = vrot.slane %v12366_v42, %v14325_v5  ;;  %v5998_v22 = vrot.slane %v12368_v17, %v14325_v5  ;;  %12751 = vmatprep.subr.bf16.mxu0 %v13785_v21  ;;  %v13174_v19 = vld [vmem:[#allocation10 + $0x40] ss:$8 sps:$4 sm:$0xff]   ;;  %v13179_v9 = vld [vmem:[#allocation10 + $0x34] ss:$8 sps:$4 sm:$0xff]   ;;  %v13177_v42 = vld [vmem:[#allocation10 + $0x30] ss:$8 sps:$4 sm:$0xff]  }
 0x72f   : > { %13061 = vrot.lane.b32.xlu1 %v13060_v14, %s13792_s20  ;;  %v13055_v1 = vpack.i.bf16 %v6064_v44, %v5928_v61  ;;  %v13065_v60 = vpack.i.bf16 %v6066_v24, %v5930_v2  ;;  %v5887_v15 = vrot.slane %v5879_v18, %v14341_v31  ;;  %v5911_v57 = vcombine.low %v5846_v40, %v5862_v43  ;;  %v13176_v2 = vld [vmem:[#allocation10 + $0x44] ss:$8 sps:$4 sm:$0xff]   ;;  %v13185_v14 = vld [vmem:[#allocation10 + $0x14] ss:$8 sps:$4 sm:$0xff]   ;;  %v13183_v44 = vld [vmem:[#allocation10 + $0x10] ss:$8 sps:$4 sm:$0xff]  }
 0x730   : > { %v6015_v50 = vcombine.low %v5950_v34, %v5966_v27  ;;  %v6047_v4 = vcombine.low %v5982_v56, %v5998_v22  ;;  %v5880_v23 = vcombine.high %v5814_v29, %v5830_v35  ;;  %v5912_v38 = vcombine.high %v5846_v40, %v5862_v43  ;;  %v13170_v29 = vld [vmem:[#allocation10 + $0x64] ss:$8 sps:$4 sm:$0xff]   ;;  %v13186_v18 = vld [vmem:[#allocation10] ss:$8 sps:$4 sm:$0xff]  }
 0x731   : > { %13056 = vrot.lane.b32.xlu0 %v13055_v1, %s13793_s25  ;;  %v5919_v7 = vrot.slane %v5911_v57, %v14341_v31  ;;  %v6016_v49 = vcombine.high %v5950_v34, %v5966_v27  ;;  %v6048_v63 = vcombine.high %v5982_v56, %v5998_v22  ;;  %v5927_v25 = vcombine.low %v15148_v36, %v15151_v13  ;;  %v13164_v43 = vld [vmem:[#allocation8] sm:$0xff]   ;;  %v870_v27 = vld [vmem:[%s757_s10 + $0x8] sm:$0xff] }
 0x732   : > { %v6023_v61 = vrot.slane %v6015_v50, %v14341_v31  ;;  %v6055_v11 = vrot.slane %v6047_v4, %v14341_v31  ;;  %v5894_v46 = vrot.slane %v5880_v23, %v14341_v31  ;;  %v5926_v41 = vrot.slane %v5912_v38, %v14341_v31  ;;  %6414 = vmatprep.subr.bf16.mxu1 %v13170_v29  ;;  %v13182_v17 = vld [vmem:[#allocation10 + $0x24] ss:$8 sps:$4 sm:$0xff]   ;;  %v12369_v29 = vld [vmem:[%s16394_s19] ss:$0 sm:$0xff] }
 0x733   : > { %13066 = vrot.lane.b32.xlu1 %v13065_v60, %s13790_s18  ;;  %v6030_v30 = vrot.slane %v6016_v49, %v14341_v31  ;;  %v6062_v55 = vrot.slane %v6048_v63, %v14341_v31  ;;  %v5932_v51 = vcombine.high %v5887_v15, %v5919_v7  ;;  %v5931_v10 = vcombine.low %v5887_v15, %v5919_v7  ;;  %v13188_v24 = vld [vmem:[#allocation10 + $0x4] ss:$8 sps:$4 sm:$0xff]  }
 0x734   : > { %v6068_v47 = vcombine.high %v6023_v61, %v6055_v11  ;;  %v6067_v59 = vcombine.low %v6023_v61, %v6055_v11  ;;  %v6063_v48 = vcombine.low %v15185_v45, %v15188_v12  ;;  %v5934_v35 = vcombine.high %v5894_v46, %v5926_v41  ;;  %12752 = vmatpush3.bf16.msra.mxu0 %v13164_v43  ;;  %v869_v34 = vld [vmem:[%s757_s10] sm:$0xff] }
 0x735   : > { %v6070_v16 = vcombine.high %v6030_v30, %v6062_v55  ;;  %v6069_v3 = vcombine.low %v6030_v30, %v6062_v55  ;;  %v5933_v40 = vcombine.low %v5894_v46, %v5926_v41  ;;  %6415 = vmatpush1.bf16.msra.mxu1 %v13168_v8  ;;  %12757 = vmatprep.subr.bf16.mxu0 %v13785_v21  ;;  %v13385_v8 = vld [vmem:[%s14177_s29] sm:$0xff] }
 0x736   : > { %v13075_v58 = vpack.i.bf16 %v6068_v47, %v5932_v51  ;;  %v13070_v6 = vpack.i.bf16 %v6067_v59, %v5931_v10  ;;  %6416 = vmatprep.subr.bf16.mxu1 %v13173_v52  ;;  %v6303_v56 = vpack.c.bf16 %v870_v27, %v869_v34 }
 0x737   : > { %v13085_v54 = vpack.i.bf16 %v6070_v16, %v5934_v35  ;;  %v13080_v20 = vpack.i.bf16 %v6069_v3, %v5933_v40 }
 0x738   : > { %13076 = vrot.lane.b32.xlu0 %v13075_v58, %s13786_s26  ;;  %13071 = vrot.lane.b32.xlu1 %v13070_v6, %s13788_s11 }
 0x739   : > { %6417 = vmatpush1.bf16.msra.mxu1 %v13171_v39 }
 0x73a   : > { %6418 = vmatprep.subr.bf16.mxu1 %v13176_v2  ;;  %v13386_v2 = vld [vmem:[%s14177_s29 + $0x8] sm:$0xff]  ;;  %s16395_s29 = sld [smem:[#allocation39_spill]] }
 0x73c   : > { %13086 = vrot.lane.b32.xlu0 %v13085_v54, %s13787_s8  ;;  %13081 = vrot.lane.b32.xlu1 %v13080_v20, %s13789_s12 }
 0x73d   : > { %6419 = vmatpush1.bf16.msra.mxu1 %v13174_v19 }
 0x73e   : > { %6420 = vmatprep.subr.bf16.mxu1 %v13179_v9  ;;  %v6320_v9 = vld [vmem:[%s16302_s9] sm:$0x3] }
 0x741   : > { %6421 = vmatpush1.bf16.msra.mxu1 %v13177_v42 }
 0x742   : > { %6422 = vmatprep.subr.bf16.mxu1 %v13182_v17  ;;  %v15263_v17 = vrot.slane %v6320_v9, %v14228_v33 }
 0x745   : > { %6423 = vmatpush1.bf16.msra.mxu1 %v13180_v62 }
 0x746   : > { %6424 = vmatprep.subr.bf16.mxu1 %v13185_v14 }
 0x749   : > { %6425 = vmatpush1.bf16.msra.mxu1 %v13183_v44  ;;  %v13189_v44 = vld [vmem:[#allocation11 + $0x38] sm:$0xff]  }
 0x74a   : > { %6426 = vmatprep.subr.bf16.mxu1 %v13188_v24 }
 0x74d   : > { %6427 = vmatpush1.bf16.msra.mxu1 %v13186_v18 }
 0x74e   : > { %12777 = vmatprep.subr.bf16.mxu1 %v13785_v21 }
 0x750   : > { %6445 = vmatmul.mubr.bf16.vlgmr.msra.gmra.mxu1 %v6303_v56 }
 0x751   : > { %12779 = vmatprep.mubr.msk.bf16.mxu1 %vm13791_vm0, %v13785_v21 }
 0x7a1   : > { %v13062_v22 = vpop.permute.xlu1 %13061 }
 0x7a2   : > { %v13064_v50 = vunpack.i.h.bf16 %v13062_v22  ;;  %v13063_v4 = vunpack.i.l.bf16 %v13062_v22 }
 0x7a3   : > { %v13057_v1 = vpop.permute.xlu0 %13056 }
 0x7a4   : > { %v13059_v60 = vunpack.i.h.bf16 %v13057_v1  ;;  %v13058_v15 = vunpack.i.l.bf16 %v13057_v1 }
 0x7a5   : > { %v13067_v57 = vpop.permute.xlu1 %13066 }
 0x7a6   : > { %v6128_v23 = vsel %vm3314_vm1, %v6063_v48, %v13059_v60  ;;  %v6127_v38 = vsel %vm3314_vm1, %v5927_v25, %v13058_v15  ;;  %v13069_v28 = vunpack.i.h.bf16 %v13067_v57  ;;  %v13068_v7 = vunpack.i.l.bf16 %v13067_v57 }
 0x7a7   : > { %v6130_v61 = vsel %vm6129_vm4, %v6127_v38, %v13063_v4  ;;  %v6131_v11 = vsel %vm6129_vm4, %v6128_v23, %v13064_v50  ;;  %v6325_v15 = vrot.slane %v6320_v9, %v14215_v26  ;;  %v13190_v50 = vld [vmem:[#allocation11 + $0x30] sm:$0xff]   ;;  %v13191_v38 = vld [vmem:[#allocation11 + $0x28] sm:$0xff]  }
 0x7a8   : > { %v6133_v45 = vsel %vm6132_vm5, %v6130_v61, %v13068_v7  ;;  %v6134_v12 = vsel %vm6132_vm5, %v6131_v11, %v13069_v28  ;;  %v13192_v28 = vld [vmem:[#allocation11 + $0x20] sm:$0xff]   ;;  %v13193_v7 = vld [vmem:[#allocation11 + $0x18] sm:$0xff]  }
 0x7a9   : > { %v13196_v61 = vld [vmem:[#allocation11] sm:$0xff]  }
 0x7aa   : > { %v13072_v49 = vpop.permute.xlu1 %13071  ;;  %v13077_v63 = vpop.permute.xlu0 %13076 }
 0x7ab   : > { %v13074_v46 = vunpack.i.h.bf16 %v13072_v49  ;;  %v13073_v41 = vunpack.i.l.bf16 %v13072_v49  ;;  %v13079_v30 = vunpack.i.h.bf16 %v13077_v63  ;;  %v13078_v36 = vunpack.i.l.bf16 %v13077_v63  ;;  %v13194_v49 = vld [vmem:[#allocation11 + $0x10] sm:$0xff]   ;;  %v13195_v63 = vld [vmem:[#allocation11 + $0x8] sm:$0xff]  }
 0x7ad   : > { %v6136_v13 = vsel %vm6135_vm6, %v6133_v45, %v13073_v41  ;;  %v6137_v25 = vsel %vm6135_vm6, %v6134_v12, %v13074_v46 }
 0x7ae   : > { %v13082_v55 = vpop.permute.xlu1 %13081  ;;  %v13087_v51 = vpop.permute.xlu0 %13086  ;;  %v6139_v32 = vsel %vm6138_vm7, %v6136_v13, %v13078_v36  ;;  %v6140_v53 = vsel %vm6138_vm7, %v6137_v25, %v13079_v30 }
 0x7af   : > { %v13084_v47 = vunpack.i.h.bf16 %v13082_v55  ;;  %v13083_v10 = vunpack.i.l.bf16 %v13082_v55  ;;  %v13089_v59 = vunpack.i.h.bf16 %v13087_v51  ;;  %v13088_v48 = vunpack.i.l.bf16 %v13087_v51 }
 0x7b1   : > { %v6142_v37 = vsel %vm6141_vm8, %v6139_v32, %v13083_v10  ;;  %v6143_v58 = vsel %vm6141_vm8, %v6140_v53, %v13084_v47  ;;  %v12378_v47 = vld [vmem:[%s16395_s29] ss:$0 sm:$0xff]  ;;  %s12498_s29 = sshll.u32 %s13935_s23, 8  ;;  %s13796_s23 = smov [#allocation20]  }
 0x7b2   : > { %v6145_v6 = vsel %vm6144_vm9, %v6142_v37, %v13088_v48  ;;  %v6146_v16 = vsel %vm6144_vm9, %v6143_v58, %v13089_v59  ;;  %s13681_s24 = sshll.u32 %s13796_s23, 4  ;;  %s13682_s24 = int_to_ptr.vmem [resolvable:$false] %s13681_s24 }
 0x7b3   : > { %v6147_v3 = vpack.c.bf16 %v6146_v16, %v6145_v6  ;;  %v12379_v16 = vld [vmem:[%s16300_s7] ss:$0 sm:$0xff]  ;;  %p13684_p12 = scmp.lt.s32.totalorder %s16250_s2, %s13682_s24 }
 0x7b5   : > { %12754 = vmatmul.mubr.bf16.vlgmr.msra.gmra.mxu0 %v6147_v3 }
 0x7b6   : > { %12773 = vmatprep.mubr.msk.bf16.mxu0 %vm13791_vm0, %v13785_v21  ;;  %12758 = vmatpush3.bf16.msra.mxu0 %v13189_v44 }
 0x7b7   : > { %12759 = vmatprep.subr.bf16.mxu0 %v13785_v21 }
 0x7ba   : > { %12760 = vmatpush3.bf16.msra.mxu0 %v13190_v50 }
 0x7bb   : > { %12761 = vmatprep.subr.bf16.mxu0 %v13785_v21 }
 0x7be   : > { %12762 = vmatpush3.bf16.msra.mxu0 %v13191_v38 }
 0x7bf   : > { %12763 = vmatprep.subr.bf16.mxu0 %v13785_v21 }
 0x7c2   : > { %12764 = vmatpush3.bf16.msra.mxu0 %v13192_v28 }
 0x7c3   : > { %12765 = vmatprep.subr.bf16.mxu0 %v13785_v21 }
 0x7c6   : > { %12766 = vmatpush3.bf16.msra.mxu0 %v13193_v7 }
 0x7c7   : > { %12767 = vmatprep.subr.bf16.mxu0 %v13785_v21 }
 0x7ca   : > { %12768 = vmatpush3.bf16.msra.mxu0 %v13194_v49 }
 0x7cb   : > { %12769 = vmatprep.subr.bf16.mxu0 %v13785_v21 }
 0x7ce   : > { %12770 = vmatpush3.bf16.msra.mxu0 %v13195_v63 }
 0x7cf   : > { %12771 = vmatprep.subr.bf16.mxu0 %v13785_v21 }
 0x7d2   : > { %12772 = vmatpush3.bf16.msra.mxu0 %v13196_v61 }
 0x7d3   : > { %12801 = vmatprep.subr.bf16.mxu0 %v13785_v21 }
 0x810   : > { %v6446_v42 = vpop.f32.mrf.mxu1 }
 0x811   : > { %v15277_v23 = vadd.f32 %v6446_v42, %v6325_v15 }
 0x812   : > { %v6448_v62 = vpop.f32.mrf.mxu1 }
 0x813   : > { %v15266_v14 = vadd.f32 %v6448_v62, %v15263_v17 }
 0x814   : > { %v6450_v57 = vpop.f32.mrf.mxu1 }
 0x815   : > { %v15274_v4 = vadd.f32 %v6450_v57, %v6325_v15 }
 0x875   : > { %v6253_v35 = vpop.f32.mrf.mxu0 }
 0x876   : > { %v6254_v40 = vadd.f32 %v12369_v29, %v6253_v35 }
 0x877   : > { %v12755_v43 = vpop.f32.mrf.mxu0 }
 0x878   : > { %v6260_v54 = vadd.f32 %v13385_v8, %v6254_v40 }
 0x879   : > { %v6256_v20 = vpop.f32.mrf.mxu0 }
 0x87a   : > { %v6257_v52 = vadd.f32 %v12369_v29, %v6256_v20  ;;  %6264 = vadd.xlane.f32.xlu1 %v6260_v54 }
 0x87b   : > { %v12756_v39 = vpop.f32.mrf.mxu0 }
 0x87c   : > { %v6261_v19 = vadd.f32 %v13386_v2, %v6257_v52 }
 0x87e   : > { %6266 = vadd.xlane.f32.xlu0 %v6261_v19 }
 0x903   : > { %v6265_v24 = vpop.xlane.xlu1 %6264 }
 0x904   : > { %v6269_v18 = vmul.f32 0.0078125, %v6265_v24 }
 0x906   : > { %v15269_v34 = vsub.f32 %v6260_v54, %v6269_v18 }
 0x907   : > { %v6267_v27 = vpop.xlane.xlu0 %6266 }
 0x908   : > { %v6270_v56 = vmul.f32 0.0078125, %v6267_v27  ;;  %v6273_v22 = vmul.f32 %v15269_v34, %v15269_v34  ;;  %v6287_v32 = vmul.f32 %v12378_v47, %v15269_v34 }
 0x90a   : > { %v6272_v1 = vsub.f32 %v6261_v19, %v6270_v56  ;;  %6275 = vadd.xlane.f32.xlu0 %v6273_v22 }
 0x90c   : > { %v6274_v60 = vmul.f32 %v6272_v1, %v6272_v1  ;;  %v6288_v37 = vmul.f32 %v12378_v47, %v6272_v1 }
 0x90e   : > { %6277 = vadd.xlane.f32.xlu1 %v6274_v60 }
 0x91f   : > { %6904 = vrot.lane.b32.xlu1 %v15274_v4, %s13787_s8 }
 0x920   : > { %6902 = vrot.lane.b32.xlu0 %v15277_v23, %s13787_s8 }
 0x923   : > { %6908 = vrot.lane.b32.xlu1 %v15277_v23, %s13789_s12 }
 0x924   : > { %6910 = vrot.lane.b32.xlu0 %v15274_v4, %s13789_s12 }
 0x927   : > { %6914 = vrot.lane.b32.xlu1 %v15277_v23, %s13786_s26 }
 0x928   : > { %6916 = vrot.lane.b32.xlu0 %v15274_v4, %s13786_s26 }
 0x92b   : > { %6920 = vrot.lane.b32.xlu1 %v15277_v23, %s13788_s11 }
 0x92c   : > { %6922 = vrot.lane.b32.xlu0 %v15274_v4, %s13788_s11 }
 0x92f   : > { %6926 = vrot.lane.b32.xlu1 %v15277_v23, %s13790_s18 }
 0x930   : > { %6928 = vrot.lane.b32.xlu0 %v15274_v4, %s13790_s18 }
 0x933   : > { %6932 = vrot.lane.b32.xlu1 %v15277_v23, %s13792_s20 }
 0x934   : > { %6934 = vrot.lane.b32.xlu0 %v15274_v4, %s13792_s20 }
 0x937   : > { %6938 = vrot.lane.b32.xlu1 %v15277_v23, %s13793_s25 }
 0x938   : > { %6940 = vrot.lane.b32.xlu0 %v15274_v4, %s13793_s25 }
 0x993   : > { %v6276_v11 = vpop.xlane.xlu0 %6275 }
 0x994   : > { %v6279_v46 = vmul.f32 0.0078125, %v6276_v11 }
 0x996   : > { %v6289_v41 = vadd.f32 1e-05, %v6279_v46 }
 0x997   : > { %v6278_v45 = vpop.xlane.xlu1 %6277  ;;  %v6903_v12 = vpop.permute.xlu0 %6902 }
 0x998   : > { %13309 = vrsqrt.f32 %v6289_v41  ;;  %v6280_v30 = vmul.f32 0.0078125, %v6278_v45 }
 0x99a   : > { %v6290_v36 = vadd.f32 1e-05, %v6280_v30 }
 0x99b   : > { %v15313_v13 = vpop.permute.xlu1 %6904  ;;  %v15315_v25 = vpop.permute.xlu0 %6910 }
 0x99c   : > { %13311 = vrsqrt.f32 %v6290_v36 }
 0x99f   : > { %v6909_v55 = vpop.permute.xlu1 %6908  ;;  %v15317_v51 = vpop.permute.xlu0 %6916 }
 0x9a0   : > { %v6944_v52 = vcombine.low %v15277_v23, %v6909_v55  ;;  %v6945_v34 = vcombine.high %v15277_v23, %v6909_v55  ;;  %v7096_v46 = vcombine.low %v15313_v13, %v15317_v51  ;;  %v7080_v55 = vcombine.low %v15274_v4, %v15315_v25 }
 0x9a2   : > { %v6952_v62 = vrot.slane %v6944_v52, %v14325_v5  ;;  %v6959_v23 = vrot.slane %v6945_v34, %v14325_v5 }
 0x9a3   : > { %v6915_v10 = vpop.permute.xlu1 %6914  ;;  %v15322_v48 = vpop.permute.xlu0 %6922 }
 0x9a4   : > { %v6960_v54 = vcombine.low %v6903_v12, %v6915_v10  ;;  %v6961_v44 = vcombine.high %v6903_v12, %v6915_v10 }
 0x9a5   : > { %v13310_v59 = vpop.eup %13309 }
 0x9a6   : > { %v6293_v58 = vmul.f32 %v13310_v59, %v6287_v32  ;;  %v6968_v2 = vrot.slane %v6960_v54, %v14325_v5  ;;  %v6975_v57 = vrot.slane %v6961_v44, %v14325_v5  ;;  %v7097_v44 = vcombine.high %v15313_v13, %v15317_v51 }
 0x9a7   : > { %v6921_v53 = vpop.permute.xlu1 %6920  ;;  %v15328_v29 = vpop.permute.xlu0 %6928 }
 0x9a8   : > { %v15330_v40 = vadd.f32 %v12379_v16, %v6293_v58  ;;  %v7008_v27 = vcombine.low %v6952_v62, %v6968_v2  ;;  %v7009_v50 = vcombine.high %v6952_v62, %v6968_v2  ;;  %v7024_v45 = vcombine.low %v6959_v23, %v6975_v57 }
 0x9a9   : > { %v13312_v6 = vpop.eup %13311  ;;  %v7111_v13 = vrot.slane %v7097_v44, %v14325_v5 }
 0x9aa   : > { %v6294_v3 = vmul.f32 %v13312_v6, %v6288_v37  ;;  %v7016_v63 = vrot.slane %v7008_v27, %v14341_v31  ;;  %v7023_v36 = vrot.slane %v7009_v50, %v14341_v31 }
 0x9ab   : > { %v6927_v35 = vpop.permute.xlu1 %6926  ;;  %v15337_v39 = vpop.permute.xlu0 %6934 }
 0x9ac   : > { %v15332_v43 = vadd.f32 %v12379_v16, %v6294_v3  ;;  %v7112_v41 = vcombine.low %v15322_v48, %v15337_v39  ;;  %v7104_v16 = vrot.slane %v7096_v46, %v14325_v5  ;;  %v7025_v3 = vcombine.high %v6959_v23, %v6975_v57 }
 0x9ad   : > { %v7113_v62 = vcombine.high %v15322_v48, %v15337_v39 }
 0x9ae   : > { %v6455_v8 = vpack.c.bf16 %v15332_v43, %v15330_v40  ;;  %v7120_v6 = vrot.slane %v7112_v41, %v14325_v5 }
 0x9af   : > { %v6933_v20 = vpop.permute.xlu1 %6932  ;;  %v6941_v22 = vpop.permute.xlu0 %6940  ;;  %v7127_v39 = vrot.slane %v7113_v62, %v14325_v5 }
 0x9b0   : > { %12774 = vmatmul.mubr.bf16.vlgmr.msra.gmra.mxu0 %v6455_v8  ;;  %v6976_v19 = vcombine.low %v6921_v53, %v6933_v20  ;;  %v6977_v42 = vcombine.high %v6921_v53, %v6933_v20  ;;  %v7128_v7 = vcombine.low %v15328_v29, %v6941_v22  ;;  %v7088_v8 = vrot.slane %v7080_v55, %v14325_v5 }
 0x9b1   : > { %12803 = vmatprep.mubr.msk.bf16.mxu0 %vm13791_vm0, %v13785_v21  ;;  %v7129_v54 = vcombine.high %v15328_v29, %v6941_v22  ;;  %v7081_v29 = vcombine.high %v15274_v4, %v15315_v25 }
 0x9b2   : > { %v6984_v56 = vrot.slane %v6976_v19, %v14325_v5  ;;  %v6991_v15 = vrot.slane %v6977_v42, %v14325_v5  ;;  %v7136_v47 = vrot.slane %v7128_v7, %v14325_v5  ;;  %v7145_v51 = vcombine.high %v7088_v8, %v7104_v16 }
 0x9b3   : > { %v6939_v9 = vpop.permute.xlu1 %6938  ;;  %v7143_v34 = vrot.slane %v7129_v54, %v14325_v5  ;;  %v7095_v4 = vrot.slane %v7081_v29, %v14325_v5 }
 0x9b4   : > { %v6992_v24 = vcombine.low %v6927_v35, %v6939_v9  ;;  %v6993_v18 = vcombine.high %v6927_v35, %v6939_v9  ;;  %v7032_v35 = vrot.slane %v7024_v45, %v14341_v31  ;;  %v7176_v20 = vcombine.low %v7120_v6, %v7136_v47 }
 0x9b5   : > { %v7177_v27 = vcombine.high %v7120_v6, %v7136_v47  ;;  %v7192_v25 = vcombine.low %v7127_v39, %v7143_v34  ;;  %v7159_v23 = vrot.slane %v7145_v51, %v14341_v31 }
 0x9b6   : > { %v7000_v1 = vrot.slane %v6992_v24, %v14325_v5  ;;  %v7007_v60 = vrot.slane %v6993_v18, %v14325_v5  ;;  %v7144_v24 = vcombine.low %v7088_v8, %v7104_v16  ;;  %v7039_v18 = vrot.slane %v7025_v3, %v14341_v31 }
 0x9b7   : > { %v7191_v57 = vrot.slane %v7177_v27, %v14341_v31 }
 0x9b8   : > { %v7040_v38 = vcombine.low %v6984_v56, %v7000_v1  ;;  %v7041_v28 = vcombine.high %v6984_v56, %v7000_v1  ;;  %v7056_v49 = vcombine.low %v6991_v15, %v7007_v60  ;;  %v7057_v10 = vcombine.high %v6991_v15, %v7007_v60 }
 0x9b9   : > { %v7184_v56 = vrot.slane %v7176_v20, %v14341_v31  ;;  %v7152_v15 = vrot.slane %v7144_v24, %v14341_v31  ;;  %v7211_v41 = vcombine.high %v7159_v23, %v7191_v57  ;;  %v7210_v45 = vcombine.low %v7159_v23, %v7191_v57 }
 0x9ba   : > { %v7048_v61 = vrot.slane %v7040_v38, %v14341_v31  ;;  %v7055_v11 = vrot.slane %v7041_v28, %v14341_v31  ;;  %v7064_v59 = vrot.slane %v7056_v49, %v14341_v31  ;;  %v7071_v52 = vrot.slane %v7057_v10, %v14341_v31 }
 0x9bb   : > { %v7209_v28 = vcombine.high %v7152_v15, %v7184_v56  ;;  %v7208_v7 = vcombine.low %v7152_v15, %v7184_v56  ;;  %v7160_v49 = vcombine.low %v7095_v4, %v7111_v13  ;;  %v7227_v55 = vpack.c.bf16 %v7211_v41, %v7211_v41 }
 0x9bc   : > { %v7073_v12 = vcombine.high %v7016_v63, %v7048_v61  ;;  %v7072_v30 = vcombine.low %v7016_v63, %v7048_v61  ;;  %v7074_v37 = vcombine.low %v7023_v36, %v7055_v11  ;;  %v7075_v58 = vcombine.high %v7023_v36, %v7055_v11 }
 0x9bd   : > { %v7076_v9 = vcombine.low %v7032_v35, %v7064_v59  ;;  %v7077_v42 = vcombine.high %v7032_v35, %v7064_v59  ;;  %v7078_v60 = vcombine.low %v7039_v18, %v7071_v52  ;;  %v7079_v48 = vcombine.high %v7039_v18, %v7071_v52 }
 0x9be   : > { %v7217_v32 = vpack.c.bf16 %v7073_v12, %v7073_v12  ;;  %v7216_v53 = vpack.c.bf16 %v7072_v30, %v7072_v30  ;;  %v7218_v2 = vpack.c.bf16 %v7074_v37, %v7074_v37  ;;  %v7219_v19 = vpack.c.bf16 %v7075_v58, %v7075_v58 }
 0x9bf   : > { %v7220_v22 = vpack.c.bf16 %v7076_v9, %v7076_v9  ;;  %v7221_v1 = vpack.c.bf16 %v7077_v42, %v7077_v42  ;;  %v7222_v50 = vpack.c.bf16 %v7078_v60, %v7078_v60  ;;  %v7223_v38 = vpack.c.bf16 %v7079_v48, %v7079_v48 }
 0x9c0   : > { %7740 = vxpose.xlu0.c.b16.start.end [1/1] (short) (narrow) %v7217_v32, 16  ;;  %7724 = vxpose.xlu1.c.b16.start.end [1/1] (short) (narrow) %v7216_v53, 16  ;;  %v7193_v63 = vcombine.high %v7127_v39, %v7143_v34  ;;  %v7200_v61 = vrot.slane %v7192_v25, %v14341_v31  ;;  %v7225_v11 = vpack.c.bf16 %v7209_v28, %v7209_v28 }
 0x9c1   : > { %v7224_v46 = vpack.c.bf16 %v7208_v7, %v7208_v7  ;;  %v7161_v12 = vcombine.high %v7095_v4, %v7111_v13  ;;  %v7168_v30 = vrot.slane %v7160_v49, %v14341_v31  ;;  %v7226_v47 = vpack.c.bf16 %v7210_v45, %v7210_v45 }
 0x9c2   : > { %v7207_v36 = vrot.slane %v7193_v63, %v14341_v31 }
 0x9c3   : > { %v7213_v10 = vcombine.high %v7168_v30, %v7200_v61  ;;  %v7212_v59 = vcombine.low %v7168_v30, %v7200_v61  ;;  %v7175_v32 = vrot.slane %v7161_v12, %v14341_v31 }
 0x9c4   : > { %7756 = vxpose.xlu0.c.b16.start.end [1/1] (short) (narrow) %v7218_v2, 16  ;;  %7772 = vxpose.xlu1.c.b16.start.end [1/1] (short) (narrow) %v7219_v19, 16 }
 0x9c5   : > { %v7229_v53 = vpack.c.bf16 %v7213_v10, %v7213_v10  ;;  %v7228_v37 = vpack.c.bf16 %v7212_v59, %v7212_v59  ;;  %v7215_v58 = vcombine.high %v7175_v32, %v7207_v36  ;;  %v7214_v6 = vcombine.low %v7175_v32, %v7207_v36 }
 0x9c7   : > { %v7231_v16 = vpack.c.bf16 %v7215_v58, %v7215_v58  ;;  %v7230_v3 = vpack.c.bf16 %v7214_v6, %v7214_v6 }
 0x9c8   : > { %7788 = vxpose.xlu0.c.b16.start.end [1/1] (short) (narrow) %v7220_v22, 16  ;;  %7804 = vxpose.xlu1.c.b16.start.end [1/1] (short) (narrow) %v7221_v1, 16 }
 0x9cc   : > { %7820 = vxpose.xlu0.c.b16.start.end [1/1] (short) (narrow) %v7222_v50, 16  ;;  %7836 = vxpose.xlu1.c.b16.start.end [1/1] (short) (narrow) %v7223_v38, 16 }
 0x9d0   : > { %7868 = vxpose.xlu1.c.b16.start.end [1/1] (short) (narrow) %v7225_v11, 16  ;;  %7852 = vxpose.xlu0.c.b16.start.end [1/1] (short) (narrow) %v7224_v46, 16 }
 0x9d4   : > { %7900 = vxpose.xlu1.c.b16.start.end [1/1] (short) (narrow) %v7227_v55, 16  ;;  %7884 = vxpose.xlu0.c.b16.start.end [1/1] (short) (narrow) %v7226_v47, 16 }
 0x9d8   : > { %7932 = vxpose.xlu1.c.b16.start.end [1/1] (short) (narrow) %v7229_v53, 16  ;;  %7916 = vxpose.xlu0.c.b16.start.end [1/1] (short) (narrow) %v7228_v37, 16 }
 0x9dc   : > { %7964 = vxpose.xlu1.c.b16.start.end [1/1] (short) (narrow) %v7231_v16, 16  ;;  %7948 = vxpose.xlu0.c.b16.start.end [1/1] (short) (narrow) %v7230_v3, 16 }
 0xa22   : > { %v7732_v35 = vpop.trf.xlu1  ;;  %v7748_v8 = vpop.trf.xlu0 }
 0xa26   : > { %v7780_v54 = vpop.trf.xlu1  ;;  %v7764_v20 = vpop.trf.xlu0 }
 0xa2a   : > { %v7812_v52 = vpop.trf.xlu1  ;;  %v7796_v2 = vpop.trf.xlu0 }
 0xa2b   : > { %v8116_v18 = vcombine.low %v7748_v8, %v7812_v52  ;;  %v8117_v29 = vcombine.high %v7748_v8, %v7812_v52  ;;  %v7980_v27 = vcombine.low %v7732_v35, %v7796_v2  ;;  %v7981_v39 = vcombine.high %v7732_v35, %v7796_v2 }
 0xa2d   : > { %v8124_v51 = vrot.slane %v8116_v18, %v14325_v5  ;;  %v15390_v15 = vrot.slane %v8117_v29, %v14325_v5  ;;  %v7988_v57 = vrot.slane %v7980_v27, %v14325_v5  ;;  %v7995_v46 = vrot.slane %v7981_v39, %v14325_v5 }
 0xa2e   : > { %v7844_v19 = vpop.trf.xlu1  ;;  %v7828_v9 = vpop.trf.xlu0 }
 0xa2f   : > { %v8132_v34 = vcombine.low %v7780_v54, %v7844_v19  ;;  %v8133_v56 = vcombine.high %v7780_v54, %v7844_v19  ;;  %v7996_v22 = vcombine.low %v7764_v20, %v7828_v9  ;;  %v7997_v25 = vcombine.high %v7764_v20, %v7828_v9 }
 0xa31   : > { %v8140_v4 = vrot.slane %v8132_v34, %v14325_v5  ;;  %v15395_v50 = vrot.slane %v8133_v56, %v14325_v5  ;;  %v8004_v38 = vrot.slane %v7996_v22, %v14325_v5  ;;  %v8011_v36 = vrot.slane %v7997_v25, %v14325_v5 }
 0xa32   : > { %v7876_v42 = vpop.trf.xlu1  ;;  %v7860_v62 = vpop.trf.xlu0 }
 0xa33   : > { %v8180_v30 = vcombine.low %v8124_v51, %v8140_v4  ;;  %v8181_v10 = vcombine.high %v8124_v51, %v8140_v4  ;;  %v8197_v59 = vcombine.high %v15390_v15, %v15395_v50  ;;  %v8044_v32 = vcombine.low %v7988_v57, %v8004_v38 }
 0xa34   : > { %v8045_v53 = vcombine.high %v7988_v57, %v8004_v38  ;;  %v8061_v20 = vcombine.high %v7995_v46, %v8011_v36  ;;  %v8196_v38 = vcombine.low %v15390_v15, %v15395_v50 }
 0xa35   : > { %v8188_v2 = vrot.slane %v8180_v30, %v14341_v31  ;;  %v8195_v9 = vrot.slane %v8181_v10, %v14341_v31 }
 0xa36   : > { %v7908_v44 = vpop.trf.xlu1  ;;  %v7892_v24 = vpop.trf.xlu0 }
 0xa3a   : > { %v7940_v1 = vpop.trf.xlu1  ;;  %v7924_v60 = vpop.trf.xlu0 }
 0xa3b   : > { %v8148_v48 = vcombine.low %v7876_v42, %v7940_v1  ;;  %v8012_v13 = vcombine.low %v7860_v62, %v7924_v60  ;;  %v8149_v28 = vcombine.high %v7876_v42, %v7940_v1  ;;  %v8013_v41 = vcombine.high %v7860_v62, %v7924_v60 }
 0xa3c   : > { %v8052_v62 = vrot.slane %v8044_v32, %v14341_v31 }
 0xa3d   : > { %v8156_v23 = vrot.slane %v8148_v48, %v14325_v5  ;;  %v8020_v45 = vrot.slane %v8012_v13, %v14325_v5  ;;  %v8163_v37 = vrot.slane %v8149_v28, %v14325_v5  ;;  %v8027_v3 = vrot.slane %v8013_v41, %v14325_v5 }
 0xa3e   : > { %v7972_v7 = vpop.trf.xlu1  ;;  %v7956_v49 = vpop.trf.xlu0  ;;  %v8060_v28 = vcombine.low %v7995_v46, %v8011_v36  ;;  %v8204_v46 = vrot.slane %v8196_v38, %v14341_v31 }
 0xa3f   : > { %v8164_v63 = vcombine.low %v7908_v44, %v7972_v7  ;;  %v8165_v61 = vcombine.high %v7908_v44, %v7972_v7  ;;  %v8028_v11 = vcombine.low %v7892_v24, %v7956_v49  ;;  %v8029_v12 = vcombine.high %v7892_v24, %v7956_v49  ;;  %v6452_v38 = vpop.f32.mrf.mxu1 }
 0xa40   : > { %v8059_v24 = vrot.slane %v8045_v53, %v14341_v31  ;;  %v8211_v7 = vrot.slane %v8197_v59, %v14341_v31  ;;  %v8068_v36 = vrot.slane %v8060_v28, %v14341_v31  ;;  %v15461_v28 = vadd.f32 %v6452_v38, %v15263_v17 }
 0xa41   : > { %v8172_v55 = vrot.slane %v8164_v63, %v14325_v5  ;;  %v8036_v47 = vrot.slane %v8028_v11, %v14325_v5  ;;  %v8179_v58 = vrot.slane %v8165_v61, %v14325_v5  ;;  %v8043_v35 = vrot.slane %v8029_v12, %v14325_v5 }
 0xa42   : > { %v8075_v12 = vrot.slane %v8061_v20, %v14341_v31 }
 0xa43   : > { %v8212_v6 = vcombine.low %v8156_v23, %v8172_v55  ;;  %v8213_v16 = vcombine.high %v8156_v23, %v8172_v55  ;;  %v8076_v8 = vcombine.low %v8020_v45, %v8036_v47  ;;  %v8077_v54 = vcombine.high %v8020_v45, %v8036_v47 }
 0xa44   : > { %v8228_v18 = vcombine.low %v8163_v37, %v8179_v58  ;;  %v8229_v27 = vcombine.high %v8163_v37, %v8179_v58  ;;  %v8093_v56 = vcombine.high %v8027_v3, %v8043_v35  ;;  %v8092_v60 = vcombine.low %v8027_v3, %v8043_v35 }
 0xa45   : > { %v8227_v52 = vrot.slane %v8213_v16, %v14341_v31  ;;  %v8220_v19 = vrot.slane %v8212_v6, %v14341_v31  ;;  %v8091_v42 = vrot.slane %v8077_v54, %v14341_v31  ;;  %v8084_v44 = vrot.slane %v8076_v8, %v14341_v31 }
 0xa46   : > { %v8243_v49 = vrot.slane %v8229_v27, %v14341_v31  ;;  %v8107_v23 = vrot.slane %v8093_v56, %v14341_v31  ;;  %v8236_v61 = vrot.slane %v8228_v18, %v14341_v31  ;;  %v8100_v11 = vrot.slane %v8092_v60, %v14341_v31 }
 0xa47   : > { %v8244_v29 = vcombine.low %v8188_v2, %v8220_v19  ;;  %v8245_v34 = vcombine.high %v8188_v2, %v8220_v19  ;;  %v8108_v22 = vcombine.low %v8052_v62, %v8084_v44  ;;  %v8109_v1 = vcombine.high %v8052_v62, %v8084_v44 }
 0xa48   : > { %v8110_v39 = vcombine.low %v8059_v24, %v8091_v42  ;;  %v8246_v13 = vcombine.low %v8195_v9, %v8227_v52  ;;  %v8111_v41 = vcombine.high %v8059_v24, %v8091_v42  ;;  %v8247_v45 = vcombine.high %v8195_v9, %v8227_v52 }
 0xa49   : > { %v8257_v48 = vshrl.u32 %v8244_v29, 16  ;;  %v8254_v51 = vpack.i.b16 %v8244_v29, %v8108_v22  ;;  %v8256_v4 = vshrl.u32 %v8108_v22, 16  ;;  %v8264_v25 = vshrl.u32 %v8109_v1, 16 }
 0xa4a   : > { %v8265_v57 = vshrl.u32 %v8245_v34, 16  ;;  %v8272_v15 = vshrl.u32 %v8110_v39, 16  ;;  %v8273_v50 = vshrl.u32 %v8246_v13, 16  ;;  %v8262_v55 = vpack.i.b16 %v8245_v34, %v8109_v1 }
 0xa4b   : > { %8316 = vxpose.xlu1.c.b16.start.end [1/1] (short) (narrow) %v8254_v51, 16  ;;  %v8258_v63 = vpack.i.b16 %v8257_v48, %v8256_v4  ;;  %v8115_v47 = vcombine.high %v8075_v12, %v8107_v23  ;;  %v8251_v10 = vcombine.high %v8211_v7, %v8243_v49  ;;  %v8280_v59 = vshrl.u32 %v8111_v41, 16  ;;  %v12396_v48 = vld [vmem:[#allocation13] ss:$0 sm:$0xff] }
 0xa4c   : > { %v8266_v30 = vpack.i.b16 %v8265_v57, %v8264_v25  ;;  %v8281_v32 = vshrl.u32 %v8247_v45, 16  ;;  %v8112_v53 = vcombine.low %v8068_v36, %v8100_v11  ;;  %v8248_v37 = vcombine.low %v8204_v46, %v8236_v61 }
 0xa4d   : > { %8332 = vxpose.xlu0.c.b16.start.end [1/1] (short) (narrow) %v8258_v63, 16  ;;  %v8274_v58 = vpack.i.b16 %v8273_v50, %v8272_v15  ;;  %v8310_v6 = vpack.i.b16 %v8251_v10, %v8115_v47  ;;  %v8312_v16 = vshrl.u32 %v8115_v47, 16  ;;  %v8313_v3 = vshrl.u32 %v8251_v10, 16 }
 0xa4e   : > { %v8270_v35 = vpack.i.b16 %v8246_v13, %v8110_v39  ;;  %v8282_v54 = vpack.i.b16 %v8281_v32, %v8280_v59  ;;  %v8288_v20 = vshrl.u32 %v8112_v53, 16  ;;  %v8289_v52 = vshrl.u32 %v8248_v37, 16 }
 0xa4f   : > { %8364 = vxpose.xlu1.c.b16.start.end [1/1] (short) (narrow) %v8266_v30, 16  ;;  %v8314_v8 = vpack.i.b16 %v8313_v3, %v8312_v16  ;;  %v8113_v2 = vcombine.high %v8068_v36, %v8100_v11  ;;  %v8249_v19 = vcombine.high %v8204_v46, %v8236_v61  ;;  %v8278_v9 = vpack.i.b16 %v8247_v45, %v8111_v41 }
 0xa50   : > { %v8114_v42 = vcombine.low %v8075_v12, %v8107_v23  ;;  %v8290_v62 = vpack.i.b16 %v8289_v52, %v8288_v20  ;;  %v8250_v18 = vcombine.low %v8211_v7, %v8243_v49  ;;  %v8286_v29 = vpack.i.b16 %v8248_v37, %v8112_v53 }
 0xa51   : > { %8348 = vxpose.xlu0.c.b16.start.end [1/1] (short) (narrow) %v8262_v55, 16  ;;  %v8296_v44 = vshrl.u32 %v8113_v2, 16  ;;  %v8297_v24 = vshrl.u32 %v8249_v19, 16  ;;  %v8294_v22 = vpack.i.b16 %v8249_v19, %v8113_v2 }
 0xa52   : > { %v8304_v27 = vshrl.u32 %v8114_v42, 16  ;;  %v8305_v56 = vshrl.u32 %v8250_v18, 16  ;;  %v8302_v60 = vpack.i.b16 %v8250_v18, %v8114_v42 }
 0xa53   : > { %8396 = vxpose.xlu1.c.b16.start.end [1/1] (short) (narrow) %v8274_v58, 16  ;;  %v8298_v34 = vpack.i.b16 %v8297_v24, %v8296_v44 }
 0xa54   : > { %v8306_v1 = vpack.i.b16 %v8305_v56, %v8304_v27 }
 0xa55   : > { %8380 = vxpose.xlu0.c.b16.start.end [1/1] (short) (narrow) %v8270_v35, 16 }
 0xa57   : > { %8428 = vxpose.xlu1.c.b16.start.end [1/1] (short) (narrow) %v8282_v54, 16 }
 0xa59   : > { %8412 = vxpose.xlu0.c.b16.start.end [1/1] (short) (narrow) %v8278_v9, 16 }
 0xa5b   : > { %8460 = vxpose.xlu1.c.b16.start.end [1/1] (short) (narrow) %v8290_v62, 16 }
 0xa5d   : > { %8444 = vxpose.xlu0.c.b16.start.end [1/1] (short) (narrow) %v8286_v29, 16 }
 0xa5f   : > { %8492 = vxpose.xlu1.c.b16.start.end [1/1] (short) (narrow) %v8298_v34, 16 }
 0xa61   : > { %8476 = vxpose.xlu0.c.b16.start.end [1/1] (short) (narrow) %v8294_v22, 16 }
 0xa63   : > { %8524 = vxpose.xlu1.c.b16.start.end [1/1] (short) (narrow) %v8306_v1, 16 }
 0xa65   : > { %8508 = vxpose.xlu0.c.b16.start.end [1/1] (short) (narrow) %v8302_v60, 16 }
 0xa70   : > { %v6561_v39 = vpop.f32.mrf.mxu0 }
 0xa71   : > { %v15428_v13 = vadd.f32 %v12396_v48, %v6561_v39 }
 0xa72   : > { %v12775_v51 = vpop.f32.mrf.mxu0 }
 0xa73   : > { %6570 = vrot.lane.b32.xlu0 %v15428_v13, %s13787_s8  ;;  %6576 = vrot.lane.b32.xlu1 %v15428_v13, %s13789_s12 }
 0xa74   : > { %v6564_v4 = vpop.f32.mrf.mxu0 }
 0xa75   : > { %v15434_v25 = vadd.f32 %v12396_v48, %v6564_v4 }
 0xa76   : > { %v12776_v57 = vpop.f32.mrf.mxu0 }
 0xa77   : > { %6578 = vrot.lane.b32.xlu0 %v15434_v25, %s13789_s12  ;;  %6582 = vrot.lane.b32.xlu1 %v15428_v13, %s13786_s26 }
 0xa7b   : > { %6584 = vrot.lane.b32.xlu0 %v15434_v25, %s13786_s26  ;;  %6588 = vrot.lane.b32.xlu1 %v15428_v13, %s13788_s11 }
 0xa7f   : > { %6590 = vrot.lane.b32.xlu0 %v15434_v25, %s13788_s11  ;;  %6594 = vrot.lane.b32.xlu1 %v15428_v13, %s13790_s18 }
 0xa83   : > { %6596 = vrot.lane.b32.xlu0 %v15434_v25, %s13790_s18  ;;  %6600 = vrot.lane.b32.xlu1 %v15428_v13, %s13792_s20 }
 0xa87   : > { %6602 = vrot.lane.b32.xlu0 %v15434_v25, %s13792_s20  ;;  %6606 = vrot.lane.b32.xlu1 %v15428_v13, %s13793_s25 }
 0xa8b   : > { %6608 = vrot.lane.b32.xlu0 %v15434_v25, %s13793_s25  ;;  %6572 = vrot.lane.b32.xlu1 %v15434_v25, %s13787_s8 }
 0xaa9   : > { %8540 = vxpose.xlu0.c.b16.start.end [1/1] (short) (narrow) %v8310_v6, 16 }
 0xaad   : > { %v8324_v7 = vpop.trf.xlu1 }
 0xaae   : > { %8556 = vxpose.xlu1.c.b16.start.end [1/1] (short) (narrow) %v8314_v8, 16 }
 0xaaf   : > { %v8340_v17 = vpop.trf.xlu0 }
 0xab1   : > { %v8372_v23 = vpop.trf.xlu1 }
 0xab2   : > { %7234 = vrot.lane.b32.xlu0 %v15266_v14, %s13787_s8  ;;  %7236 = vrot.lane.b32.xlu1 %v15461_v28, %s13787_s8 }
 0xab3   : > { %v8356_v49 = vpop.trf.xlu0 }
 0xab5   : > { %v8404_v61 = vpop.trf.xlu1 }
 0xab6   : > { %7242 = vrot.lane.b32.xlu0 %v15461_v28, %s13789_s12  ;;  %7240 = vrot.lane.b32.xlu1 %v15266_v14, %s13789_s12  ;;  %v8640_v58 = vcombine.low %v8340_v17, %v8404_v61 }
 0xab7   : > { %v8388_v63 = vpop.trf.xlu0 }
 0xab8   : > { %v8572_v16 = vcombine.low %v8324_v7, %v8388_v63  ;;  %v15508_v52 = vrot.slane %v8640_v58, %v14325_v5 }
 0xab9   : > { %v8436_v41 = vpop.trf.xlu1 }
 0xaba   : > { %7248 = vrot.lane.b32.xlu0 %v15461_v28, %s13786_s26  ;;  %7246 = vrot.lane.b32.xlu1 %v15266_v14, %s13786_s26  ;;  %v8648_v6 = vcombine.low %v8372_v23, %v8436_v41  ;;  %v15516_v44 = vrot.slane %v8572_v16, %v14325_v5 }
 0xabb   : > { %v8420_v11 = vpop.trf.xlu0 }
 0xabc   : > { %v8580_v3 = vcombine.low %v8356_v49, %v8420_v11  ;;  %v15511_v2 = vrot.slane %v8648_v6, %v14325_v5 }
 0xabd   : > { %v15493_v12 = vpop.trf.xlu1 }
 0xabe   : > { %7254 = vrot.lane.b32.xlu0 %v15461_v28, %s13788_s11  ;;  %7252 = vrot.lane.b32.xlu1 %v15266_v14, %s13788_s11  ;;  %v15519_v24 = vrot.slane %v8580_v3, %v14325_v5  ;;  %v8672_v56 = vcombine.low %v15508_v52, %v15511_v2  ;;  %v8673_v22 = vcombine.high %v15508_v52, %v15511_v2 }
 0xabf   : > { %v15491_v45 = vpop.trf.xlu0 }
 0xac1   : > { %v15497_v15 = vpop.trf.xlu1 }
 0xac2   : > { %7260 = vrot.lane.b32.xlu0 %v15461_v28, %s13790_s18  ;;  %7258 = vrot.lane.b32.xlu1 %v15266_v14, %s13790_s18 }
 0xac3   : > { %v15495_v30 = vpop.trf.xlu0 }
 0xac5   : > { %v15501_v46 = vpop.trf.xlu1 }
 0xac6   : > { %7266 = vrot.lane.b32.xlu0 %v15461_v28, %s13792_s20  ;;  %7264 = vrot.lane.b32.xlu1 %v15266_v14, %s13792_s20 }
 0xac7   : > { %v15499_v50 = vpop.trf.xlu0 }
 0xaca   : > { %7272 = vrot.lane.b32.xlu0 %v15461_v28, %s13793_s25  ;;  %7270 = vrot.lane.b32.xlu1 %v15266_v14, %s13793_s25 }
 0xae5   : > { %v6571_v36 = vpop.permute.xlu0 %6570  ;;  %v6577_v55 = vpop.permute.xlu1 %6576 }
 0xae6   : > { %v6612_v19 = vcombine.low %v15428_v13, %v6577_v55  ;;  %v6613_v9 = vcombine.high %v15428_v13, %v6577_v55 }
 0xae8   : > { %v6620_v48 = vrot.slane %v6612_v19, %v14325_v5  ;;  %v6627_v39 = vrot.slane %v6613_v9, %v14325_v5 }
 0xae9   : > { %v6579_v47 = vpop.permute.xlu0 %6578  ;;  %v6583_v10 = vpop.permute.xlu1 %6582 }
 0xaea   : > { %v6628_v35 = vcombine.low %v6571_v36, %v6583_v10  ;;  %v6629_v8 = vcombine.high %v6571_v36, %v6583_v10  ;;  %v6748_v13 = vcombine.low %v15434_v25, %v6579_v47  ;;  %v6749_v51 = vcombine.high %v15434_v25, %v6579_v47 }
 0xaec   : > { %v6636_v18 = vrot.slane %v6628_v35, %v14325_v5  ;;  %v6643_v29 = vrot.slane %v6629_v8, %v14325_v5  ;;  %v6756_v58 = vrot.slane %v6748_v13, %v14325_v5  ;;  %v6763_v6 = vrot.slane %v6749_v51, %v14325_v5 }
 0xaed   : > { %v15503_v59 = vpop.permute.xlu0 %6584  ;;  %v6589_v32 = vpop.permute.xlu1 %6588 }
 0xaee   : > { %v6676_v7 = vcombine.low %v6620_v48, %v6636_v18  ;;  %v6677_v49 = vcombine.high %v6620_v48, %v6636_v18  ;;  %v6692_v23 = vcombine.low %v6627_v39, %v6643_v29  ;;  %v6693_v63 = vcombine.high %v6627_v39, %v6643_v29 }
 0xaf1   : > { %v15505_v53 = vpop.permute.xlu0 %6590  ;;  %v6595_v37 = vpop.permute.xlu1 %6594 }
 0xaf5   : > { %v6597_v54 = vpop.permute.xlu0 %6596  ;;  %v6601_v20 = vpop.permute.xlu1 %6600 }
 0xaf6   : > { %v6644_v42 = vcombine.low %v6589_v32, %v6601_v20  ;;  %v6645_v62 = vcombine.high %v6589_v32, %v6601_v20 }
 0xaf8   : > { %v6652_v4 = vrot.slane %v6644_v42, %v14325_v5  ;;  %v6659_v57 = vrot.slane %v6645_v62, %v14325_v5  ;;  %v6700_v62 = vrot.slane %v6692_v23, %v14341_v31 }
 0xaf9   : > { %v6603_v34 = vpop.permute.xlu0 %6602  ;;  %v6607_v27 = vpop.permute.xlu1 %6606 }
 0xafa   : > { %v6660_v1 = vcombine.low %v6595_v37, %v6607_v27  ;;  %v6661_v60 = vcombine.high %v6595_v37, %v6607_v27  ;;  %v6780_v41 = vcombine.low %v15505_v53, %v6603_v34  ;;  %v6781_v25 = vcombine.high %v15505_v53, %v6603_v34 }
 0xafb   : > { %v6684_v53 = vrot.slane %v6676_v7, %v14341_v31 }
 0xafc   : > { %v6668_v38 = vrot.slane %v6660_v1, %v14325_v5  ;;  %v6675_v17 = vrot.slane %v6661_v60, %v14325_v5  ;;  %v6788_v9 = vrot.slane %v6780_v41, %v14325_v5  ;;  %v6795_v18 = vrot.slane %v6781_v25, %v14325_v5 }
 0xafd   : > { %v6609_v61 = vpop.permute.xlu0 %6608  ;;  %v6573_v11 = vpop.permute.xlu1 %6572 }
 0xafe   : > { %v6708_v36 = vcombine.low %v6652_v4, %v6668_v38  ;;  %v6709_v55 = vcombine.high %v6652_v4, %v6668_v38  ;;  %v6724_v10 = vcombine.low %v6659_v57, %v6675_v17  ;;  %v6725_v47 = vcombine.high %v6659_v57, %v6675_v17 }
 0xaff   : > { %v6796_v32 = vcombine.low %v6597_v54, %v6609_v61  ;;  %v6797_v37 = vcombine.high %v6597_v54, %v6609_v61  ;;  %v6764_v16 = vcombine.low %v6573_v11, %v15503_v59  ;;  %v6765_v3 = vcombine.high %v6573_v11, %v15503_v59 }
 0xb00   : > { %v6716_v35 = vrot.slane %v6708_v36, %v14341_v31  ;;  %v6732_v8 = vrot.slane %v6724_v10, %v14341_v31  ;;  %v6691_v54 = vrot.slane %v6677_v49, %v14341_v31  ;;  %v6723_v42 = vrot.slane %v6709_v55, %v14341_v31 }
 0xb01   : > { %v6804_v20 = vrot.slane %v6796_v32, %v14325_v5  ;;  %v6811_v19 = vrot.slane %v6797_v37, %v14325_v5  ;;  %v6707_v59 = vrot.slane %v6693_v63, %v14341_v31  ;;  %v6739_v29 = vrot.slane %v6725_v47, %v14341_v31 }
 0xb02   : > { %v6772_v1 = vrot.slane %v6764_v16, %v14325_v5  ;;  %v6779_v60 = vrot.slane %v6765_v3, %v14325_v5  ;;  %v6740_v48 = vcombine.low %v6684_v53, %v6716_v35  ;;  %v6744_v39 = vcombine.low %v6700_v62, %v6732_v8 }
 0xb03   : > { %v6844_v34 = vcombine.low %v6788_v9, %v6804_v20  ;;  %v6845_v27 = vcombine.high %v6788_v9, %v6804_v20  ;;  %v6860_v13 = vcombine.low %v6795_v18, %v6811_v19  ;;  %v6861_v51 = vcombine.high %v6795_v18, %v6811_v19 }
 0xb04   : > { %v6741_v4 = vcombine.high %v6684_v53, %v6716_v35  ;;  %v6742_v57 = vcombine.low %v6691_v54, %v6723_v42  ;;  %v6743_v38 = vcombine.high %v6691_v54, %v6723_v42  ;;  %v6745_v17 = vcombine.high %v6700_v62, %v6732_v8 }
 0xb05   : > { %v6746_v7 = vcombine.low %v6707_v59, %v6739_v29  ;;  %v6747_v49 = vcombine.high %v6707_v59, %v6739_v29  ;;  %v6852_v23 = vrot.slane %v6844_v34, %v14341_v31  ;;  %v6859_v63 = vrot.slane %v6845_v27, %v14341_v31 }
 0xb06   : > { %v6812_v61 = vcombine.low %v6756_v58, %v6772_v1  ;;  %v6813_v11 = vcombine.high %v6756_v58, %v6772_v1  ;;  %v6828_v41 = vcombine.low %v6763_v6, %v6779_v60  ;;  %v6829_v36 = vcombine.high %v6763_v6, %v6779_v60 }
 0xb07   : > { %v8588_v55 = vcombine.low %v15491_v45, %v15499_v50  ;;  %v12405_v10 = vpack.c.bf16 %v6744_v39, %v6740_v48  ;;  %v6868_v25 = vrot.slane %v6860_v13, %v14341_v31  ;;  %v6875_v47 = vrot.slane %v6861_v51, %v14341_v31 }
 0xb08   : > { %v6820_v32 = vrot.slane %v6812_v61, %v14341_v31  ;;  %v6827_v37 = vrot.slane %v6813_v11, %v14341_v31  ;;  %v6836_v16 = vrot.slane %v6828_v41, %v14341_v31  ;;  %v6843_v3 = vrot.slane %v6829_v36, %v14341_v31 }
 0xb09   : > { %v8604_v58 = vcombine.low %v15516_v44, %v15519_v24  ;;  %v12406_v6 = vpack.c.bf16 %v6746_v7, %v6742_v57  ;;  %v12409_v35 = vpack.c.bf16 %v6745_v17, %v6741_v4  ;;  %v12410_v8 = vpack.c.bf16 %v6747_v49, %v6743_v38 }
 0xb0a   : > { %v6876_v50 = vcombine.low %v6820_v32, %v6852_v23  ;;  %v6877_v20 = vcombine.high %v6820_v32, %v6852_v23  ;;  %v6878_v19 = vcombine.low %v6827_v37, %v6859_v63  ;;  %v6879_v53 = vcombine.high %v6827_v37, %v6859_v63 }
 0xb0b   : > { %v8548_v45 = vpop.trf.xlu0  ;;  %v6880_v54 = vcombine.low %v6836_v16, %v6868_v25  ;;  %v6881_v9 = vcombine.high %v6836_v16, %v6868_v25  ;;  %v6882_v42 = vcombine.low %v6843_v3, %v6875_v47  ;;  %v6883_v62 = vcombine.high %v6843_v3, %v6875_v47 }
 0xb0c   : > { %v8595_v59 = vrot.slane %v8588_v55, %v14325_v5  ;;  %v8656_v18 = vcombine.low %v15493_v12, %v15501_v46  ;;  %v7571_v29 = vrot.slane %v12405_v10, %v14325_v5  ;;  %v8596_v34 = vcombine.low %v15495_v30, %v8548_v45 }
 0xb0d   : > { %v12407_v27 = vpack.c.bf16 %v6880_v54, %v6876_v50  ;;  %v12408_v1 = vpack.c.bf16 %v6882_v42, %v6878_v19  ;;  %v12411_v60 = vpack.c.bf16 %v6881_v9, %v6877_v20  ;;  %v12412_v48 = vpack.c.bf16 %v6883_v62, %v6879_v53 }
 0xb0e   : > { %v7579_v39 = vrot.slane %v12406_v6, %v14325_v5  ;;  %v7639_v13 = vrot.slane %v12409_v35, %v14325_v5  ;;  %v7647_v51 = vrot.slane %v12410_v8, %v14325_v5  ;;  %v8603_v4 = vrot.slane %v8596_v34, %v14325_v5 }
 0xb0f   : > { %v7587_v38 = vrot.slane %v12407_v27, %v14325_v5  ;;  %v7595_v12 = vrot.slane %v12408_v1, %v14325_v5  ;;  %v7655_v46 = vrot.slane %v12411_v60, %v14325_v5  ;;  %v7663_v30 = vrot.slane %v12412_v48, %v14325_v5 }
 0xb10   : > { %v8564_v57 = vpop.trf.xlu1  ;;  %v8605_v17 = vcombine.high %v15516_v44, %v15519_v24  ;;  %v8620_v7 = vcombine.low %v8595_v59, %v8603_v4  ;;  %v8621_v49 = vcombine.high %v8595_v59, %v8603_v4  ;;  %v8680_v36 = vrot.slane %v8672_v56, %v14341_v31 }
 0xb11   : > { %v8664_v23 = vcombine.low %v15497_v15, %v8564_v57  ;;  %v7612_v63 = vcombine.low %v7587_v38, %v7595_v12  ;;  %v7613_v61 = vcombine.high %v7587_v38, %v7595_v12  ;;  %v7680_v11 = vcombine.low %v7655_v46, %v7663_v30 }
 0xb12   : > { %v7681_v41 = vcombine.high %v7655_v46, %v7663_v30  ;;  %v8687_v55 = vrot.slane %v8673_v22, %v14341_v31  ;;  %v8663_v44 = vrot.slane %v8656_v18, %v14325_v5  ;;  %v7596_v10 = vcombine.low %v7571_v29, %v7579_v39 }
 0xb13   : > { %v8671_v24 = vrot.slane %v8664_v23, %v14325_v5  ;;  %v7597_v15 = vcombine.high %v7571_v29, %v7579_v39  ;;  %v7664_v25 = vcombine.low %v7639_v13, %v7647_v51  ;;  %v7665_v47 = vcombine.high %v7639_v13, %v7647_v51 }
 0xb14   : > { %v8628_v32 = vrot.slane %v8620_v7, %v14341_v31  ;;  %v8635_v37 = vrot.slane %v8621_v49, %v14341_v31  ;;  %v7620_v56 = vrot.slane %v7612_v63, %v14341_v31  ;;  %v7688_v6 = vrot.slane %v7680_v11, %v14341_v31 }
 0xb15   : > { %v8688_v16 = vcombine.low %v8663_v44, %v8671_v24  ;;  %v8689_v3 = vcombine.high %v8663_v44, %v8671_v24  ;;  %v7627_v52 = vrot.slane %v7613_v61, %v14341_v31  ;;  %v7695_v2 = vrot.slane %v7681_v41, %v14341_v31 }
 0xb16   : > { %v8612_v22 = vrot.slane %v8604_v58, %v14341_v31  ;;  %v8619_v35 = vrot.slane %v8605_v17, %v14341_v31  ;;  %v7604_v50 = vrot.slane %v7596_v10, %v14341_v31  ;;  %v7672_v20 = vrot.slane %v7664_v25, %v14341_v31 }
 0xb17   : > { %v8696_v8 = vrot.slane %v8688_v16, %v14341_v31  ;;  %v8703_v45 = vrot.slane %v8689_v3, %v14341_v31  ;;  %v7611_v19 = vrot.slane %v7597_v15, %v14341_v31  ;;  %v7679_v53 = vrot.slane %v7665_v47, %v14341_v31 }
 0xb18   : > { %v8636_v54 = vcombine.low %v8612_v22, %v8628_v32  ;;  %v15607_v42 = vcombine.low %v8619_v35, %v8635_v37  ;;  %v7628_v58 = vcombine.low %v7604_v50, %v7620_v56  ;;  %v7696_v59 = vcombine.low %v7672_v20, %v7688_v6 }
 0xb19   : > { %v8704_v9 = vcombine.low %v8680_v36, %v8696_v8  ;;  %v15609_v62 = vcombine.low %v8687_v55, %v8703_v45  ;;  %v15611_v18 = vcombine.low %v7611_v19, %v7627_v52  ;;  %v15613_v29 = vcombine.low %v7679_v53, %v7695_v2 }
 0xb1a   : > { %v15617_v60 = vcombine.high %v8687_v55, %v8703_v45  ;;  %v8712_v48 = vshrl.u32 %v8636_v54, 16  ;;  %v15619_v39 = vcombine.high %v8619_v35, %v8635_v37  ;;  %v7702_v13 = vpack.i.b16 %v7696_v59, %v7628_v58 }
 0xb1b   : > { %v8710_v34 = vpack.i.b16 %v8704_v9, %v8636_v54  ;;  %v8726_v27 = vpack.i.b16 %v15609_v62, %v15607_v42  ;;  %v8713_v1 = vshrl.u32 %v8704_v9, 16  ;;  %v7714_v51 = vpack.i.b16 %v15613_v29, %v15611_v18 }
 0xb1c   : > { %v8734_v57 = vpack.i.b16 %v15617_v60, %v15619_v39  ;;  %v7703_v38 = vshrl.u32 %v7628_v58, 16  ;;  %v7704_v12 = vshrl.u32 %v7696_v59, 16  ;;  %v15632_v46 = vcombine.high %v7611_v19, %v7627_v52 }
 0xb1d   : > { %12778 = vmatpush3.bf16.msra.mxu1 %v8710_v34  ;;  %12802 = vmatpush3.bf16.msra.mxu0 %v8726_v27  ;;  %v8714_v4 = vpack.i.b16 %v8713_v1, %v8712_v48  ;;  %v15634_v30 = vcombine.high %v7679_v53, %v7695_v2  ;;  %v8705_v49 = vcombine.high %v8680_v36, %v8696_v8  ;;  %v8729_v2 = vshrl.u32 %v15609_v62, 16 }
 0xb1e   : > { %12783 = vmatprep.subr.bf16.mxu1 %v13785_v21  ;;  %12813 = vmatprep.subr.bf16.mxu0 %v13785_v21  ;;  %v8637_v23 = vcombine.high %v8612_v22, %v8628_v32  ;;  %v7705_v63 = vpack.i.b16 %v7704_v12, %v7703_v38  ;;  %v7629_v36 = vcombine.high %v7604_v50, %v7620_v56  ;;  %v8728_v22 = vshrl.u32 %v15607_v42, 16 }
 0xb1f   : > { %v7720_v61 = vpack.i.b16 %v15634_v30, %v15632_v46  ;;  %v7697_v44 = vcombine.high %v7672_v20, %v7688_v6  ;;  %v8721_v15 = vshrl.u32 %v8705_v49, 16  ;;  %v7715_v53 = vshrl.u32 %v15611_v18, 16 }
 0xb20   : > { %12780 = vmatmul.mubr.msk.bf16.vlgmr.msra.gmra.mxu1 %vm3314_vm1, %v7702_v13  ;;  %12804 = vmatmul.mubr.msk.bf16.vlgmr.msra.gmra.mxu0 %vm3314_vm1, %v7714_v51  ;;  %v8718_v41 = vpack.i.b16 %v8705_v49, %v8637_v23  ;;  %v8720_v25 = vshrl.u32 %v8637_v23, 16  ;;  %v7709_v3 = vshrl.u32 %v7629_v36, 16  ;;  %v8730_v45 = vpack.i.b16 %v8729_v2, %v8728_v22 }
 0xb21   : > { %12784 = vmatpush3.bf16.msra.mxu1 %v8714_v4  ;;  %12814 = vmatpush3.bf16.msra.mxu0 %v8734_v57  ;;  %v7708_v47 = vpack.i.b16 %v7697_v44, %v7629_v36  ;;  %v7710_v56 = vshrl.u32 %v7697_v44, 16  ;;  %v7716_v54 = vshrl.u32 %v15613_v29, 16  ;;  %v8737_v58 = vshrl.u32 %v15617_v60, 16 }
 0xb22   : > { %12785 = vmatprep.mubr.msk.bf16.mxu1 %vm13791_vm0, %v13785_v21  ;;  %12789 = vmatprep.subr.bf16.mxu1 %v13785_v21  ;;  %v8722_v37 = vpack.i.b16 %v8721_v15, %v8720_v25  ;;  %v8736_v13 = vshrl.u32 %v15619_v39, 16  ;;  %v7722_v39 = vshrl.u32 %v15634_v30, 16 }
 0xb23   : > { %12815 = vmatprep.mubr.msk.bf16.mxu0 %vm13791_vm0, %v13785_v21  ;;  %12825 = vmatprep.subr.bf16.mxu0 %v13785_v21  ;;  %v7711_v35 = vpack.i.b16 %v7710_v56, %v7709_v3  ;;  %v7717_v29 = vpack.i.b16 %v7716_v54, %v7715_v53 }
 0xb24   : > { %v15636_v17 = vpop.permute.xlu0 %7234  ;;  %v15638_v7 = vpop.permute.xlu1 %7236  ;;  %v8738_v12 = vpack.i.b16 %v8737_v58, %v8736_v13 }
 0xb28   : > { %v15645_v11 = vpop.permute.xlu0 %7242  ;;  %v15647_v55 = vpop.permute.xlu1 %7240  ;;  %12786 = vmatmul.mubr.msk.bf16.vlgmr.msra.gmra.mxu1 %vm3314_vm1, %v7705_v63  ;;  %12816 = vmatmul.mubr.msk.bf16.vlgmr.msra.gmra.mxu0 %vm3314_vm1, %v7720_v61 }
 0xb29   : > { %12790 = vmatpush3.bf16.msra.mxu1 %v8718_v41  ;;  %12791 = vmatprep.mubr.msk.bf16.mxu1 %vm13791_vm0, %v13785_v21  ;;  %v7276_v20 = vcombine.low %v15266_v14, %v15647_v55  ;;  %v7277_v4 = vcombine.high %v15266_v14, %v15647_v55  ;;  %v7412_v56 = vcombine.low %v15461_v28, %v15645_v11 }
 0xb2a   : > { %12795 = vmatprep.subr.bf16.mxu1 %v13785_v21  ;;  %12827 = vmatprep.mubr.msk.bf16.mxu0 %vm13791_vm0, %v13785_v21 }
 0xb2b   : > { %v7284_v1 = vrot.slane %v7276_v20, %v14325_v5  ;;  %v7291_v36 = vrot.slane %v7277_v4, %v14325_v5 }
 0xb2c   : > { %v15656_v24 = vpop.permute.xlu0 %7248  ;;  %v7247_v10 = vpop.permute.xlu1 %7246 }
 0xb2d   : > { %v7292_v8 = vcombine.low %v15636_v17, %v7247_v10  ;;  %v7293_v48 = vcombine.high %v15636_v17, %v7247_v10  ;;  %v7721_v17 = vshrl.u32 %v15632_v46, 16  ;;  %v7428_v10 = vcombine.low %v15638_v7, %v15656_v24 }
 0xb2f   : > { %v7300_v9 = vrot.slane %v7292_v8, %v14325_v5  ;;  %v7307_v23 = vrot.slane %v7293_v48, %v14325_v5  ;;  %v7723_v25 = vpack.i.b16 %v7722_v39, %v7721_v17  ;;  %v7436_v53 = vrot.slane %v7428_v10, %v14325_v5 }
 0xb30   : > { %v15658_v32 = vpop.permute.xlu0 %7254  ;;  %v7253_v16 = vpop.permute.xlu1 %7252  ;;  %12792 = vmatmul.mubr.msk.bf16.vlgmr.msra.gmra.mxu1 %vm3314_vm1, %v7708_v47 }
 0xb31   : > { %12796 = vmatpush3.bf16.msra.mxu1 %v8722_v37  ;;  %12797 = vmatprep.mubr.msk.bf16.mxu1 %vm13791_vm0, %v13785_v21  ;;  %v7340_v57 = vcombine.low %v7284_v1, %v7300_v9  ;;  %v7341_v63 = vcombine.high %v7284_v1, %v7300_v9  ;;  %v7356_v47 = vcombine.low %v7291_v36, %v7307_v23 }
 0xb32   : > { %12807 = vmatprep.subr.bf16.mxu1 %v13785_v21  ;;  %v7357_v54 = vcombine.high %v7291_v36, %v7307_v23 }
 0xb33   : > { %v7348_v44 = vrot.slane %v7340_v57, %v14341_v31  ;;  %v7355_v3 = vrot.slane %v7341_v63, %v14341_v31  ;;  %v7364_v9 = vrot.slane %v7356_v47, %v14341_v31 }
 0xb34   : > { %v15664_v6 = vpop.permute.xlu0 %7260  ;;  %v7259_v52 = vpop.permute.xlu1 %7258 }
 0xb38   : > { %v7265_v50 = vpop.permute.xlu1 %7264  ;;  %12798 = vmatmul.mubr.msk.bf16.vlgmr.msra.gmra.mxu1 %vm3314_vm1, %v7711_v35  ;;  %v15672_v19 = vpop.permute.xlu0 %7266 }
 0xb39   : > { %12808 = vmatpush3.bf16.msra.mxu1 %v8730_v45  ;;  %12809 = vmatprep.mubr.msk.bf16.mxu1 %vm13791_vm0, %v13785_v21  ;;  %v7308_v42 = vcombine.low %v7253_v16, %v7265_v50  ;;  %v7309_v59 = vcombine.high %v7253_v16, %v7265_v50  ;;  %v7444_v15 = vcombine.low %v15658_v32, %v15672_v19 }
 0xb3a   : > { %12819 = vmatprep.subr.bf16.mxu1 %v13785_v21  ;;  %v7445_v13 = vcombine.high %v15658_v32, %v15672_v19 }
 0xb3b   : > { %v7316_v60 = vrot.slane %v7308_v42, %v14325_v5  ;;  %v7323_v49 = vrot.slane %v7309_v59, %v14325_v5  ;;  %v7452_v20 = vrot.slane %v7444_v15, %v14325_v5  ;;  %v7420_v42 = vrot.slane %v7412_v56, %v14325_v5 }
 0xb3c   : > { %v7271_v62 = vpop.permute.xlu1 %7270  ;;  %v7273_v38 = vpop.permute.xlu0 %7272  ;;  %v7459_v19 = vrot.slane %v7445_v13, %v14325_v5 }
 0xb3d   : > { %v7324_v34 = vcombine.low %v7259_v52, %v7271_v62  ;;  %v7325_v27 = vcombine.high %v7259_v52, %v7271_v62  ;;  %v7460_v14 = vcombine.low %v15664_v6, %v7273_v38  ;;  %v7461_v62 = vcombine.high %v15664_v6, %v7273_v38 }
 0xb3e   : > { %v7371_v6 = vrot.slane %v7357_v54, %v14341_v31 }
 0xb3f   : > { %v7332_v51 = vrot.slane %v7324_v34, %v14325_v5  ;;  %v7339_v18 = vrot.slane %v7325_v27, %v14325_v5  ;;  %v7468_v52 = vrot.slane %v7460_v14, %v14325_v5  ;;  %v7475_v4 = vrot.slane %v7461_v62, %v14325_v5 }
 0xb40   : > { %12810 = vmatmul.mubr.msk.bf16.vlgmr.msra.gmra.mxu1 %vm3314_vm1, %v7717_v29  ;;  %v7413_v29 = vcombine.high %v15461_v28, %v15645_v11 }
 0xb41   : > { %v7372_v61 = vcombine.low %v7316_v60, %v7332_v51  ;;  %v7373_v41 = vcombine.high %v7316_v60, %v7332_v51  ;;  %12820 = vmatpush3.bf16.msra.mxu1 %v8738_v12  ;;  %v7388_v55 = vcombine.low %v7323_v49, %v7339_v18  ;;  %12821 = vmatprep.mubr.msk.bf16.mxu1 %vm13791_vm0, %v13785_v21 }
 0xb42   : > { %12831 = vmatprep.subr.bf16.mxu1 %v13785_v21  ;;  %v7389_v2 = vcombine.high %v7323_v49, %v7339_v18  ;;  %v7508_v58 = vcombine.low %v7452_v20, %v7468_v52  ;;  %v7429_v51 = vcombine.high %v15638_v7, %v15656_v24  ;;  %v7476_v18 = vcombine.low %v7420_v42, %v7436_v53 }
 0xb43   : > { %v7380_v46 = vrot.slane %v7372_v61, %v14341_v31  ;;  %v7387_v30 = vrot.slane %v7373_v41, %v14341_v31  ;;  %v7396_v22 = vrot.slane %v7388_v55, %v14341_v31  ;;  %v7509_v57 = vcombine.high %v7452_v20, %v7468_v52 }
 0xb44   : > { %v7403_v59 = vrot.slane %v7389_v2, %v14341_v31  ;;  %v7516_v60 = vrot.slane %v7508_v58, %v14341_v31  ;;  %v7443_v7 = vrot.slane %v7429_v51, %v14325_v5  ;;  %v7477_v24 = vcombine.high %v7420_v42, %v7436_v53 }
 0xb45   : > { %v7405_v37 = vcombine.high %v7348_v44, %v7380_v46  ;;  %v7404_v16 = vcombine.low %v7348_v44, %v7380_v46  ;;  %v7407_v45 = vcombine.high %v7355_v3, %v7387_v30  ;;  %v7406_v50 = vcombine.low %v7355_v3, %v7387_v30 }
 0xb46   : > { %v7409_v1 = vcombine.high %v7364_v9, %v7396_v22  ;;  %v7408_v48 = vcombine.low %v7364_v9, %v7396_v22  ;;  %v7411_v49 = vcombine.high %v7371_v6, %v7403_v59  ;;  %v7410_v32 = vcombine.low %v7371_v6, %v7403_v59 }
 0xb47   : > { %v7549_v35 = vpack.c.bf16 %v7405_v37, %v7405_v37  ;;  %v7548_v8 = vpack.c.bf16 %v7404_v16, %v7404_v16  ;;  %v7551_v34 = vpack.c.bf16 %v7407_v45, %v7407_v45  ;;  %v7550_v27 = vpack.c.bf16 %v7406_v50, %v7406_v50 }
 0xb48   : > { %12822 = vmatmul.mubr.msk.bf16.vlgmr.msra.gmra.mxu1 %vm3314_vm1, %v7723_v25  ;;  %v7553_v38 = vpack.c.bf16 %v7409_v1, %v7409_v1  ;;  %v7552_v12 = vpack.c.bf16 %v7408_v48, %v7408_v48  ;;  %v7484_v17 = vrot.slane %v7476_v18, %v14341_v31  ;;  %v7427_v28 = vrot.slane %v7413_v29, %v14325_v5 }
 0xb49   : > { %9308 = vxpose.xlu1.c.b16.start.end [1/1] (short) (narrow) %v7549_v35, 16  ;;  %9292 = vxpose.xlu0.c.b16.start.end [1/1] (short) (narrow) %v7548_v8, 16  ;;  %v7524_v11 = vcombine.low %v7459_v19, %v7475_v4  ;;  %v7523_v39 = vrot.slane %v7509_v57, %v14341_v31  ;;  %v7555_v23 = vpack.c.bf16 %v7411_v49, %v7411_v49 }
 0xb4a   : > { %12833 = vmatprep.mubr.msk.bf16.mxu1 %vm13791_vm0, %v13785_v21  ;;  %v7554_v63 = vpack.c.bf16 %v7410_v32, %v7410_v32  ;;  %v7541_v61 = vcombine.high %v7484_v17, %v7516_v60  ;;  %v7540_v41 = vcombine.low %v7484_v17, %v7516_v60  ;;  %v7492_v14 = vcombine.low %v7427_v28, %v7443_v7 }
 0xb4b   : > { %v7491_v55 = vrot.slane %v7477_v24, %v14341_v31  ;;  %v7525_v36 = vcombine.high %v7459_v19, %v7475_v4  ;;  %v7532_v44 = vrot.slane %v7524_v11, %v14341_v31  ;;  %v7493_v25 = vcombine.high %v7427_v28, %v7443_v7 }
 0xb4c   : > { %v7557_v46 = vpack.c.bf16 %v7541_v61, %v7541_v61  ;;  %v7556_v30 = vpack.c.bf16 %v7540_v41, %v7540_v41  ;;  %v7500_v47 = vrot.slane %v7492_v14, %v14341_v31 }
 0xb4d   : > { %9340 = vxpose.xlu1.c.b16.start.end [1/1] (short) (narrow) %v7551_v34, 16  ;;  %9324 = vxpose.xlu0.c.b16.start.end [1/1] (short) (narrow) %v7550_v27, 16  ;;  %v7543_v10 = vcombine.high %v7491_v55, %v7523_v39  ;;  %v7542_v15 = vcombine.low %v7491_v55, %v7523_v39  ;;  %v7539_v37 = vrot.slane %v7525_v36, %v14341_v31 }
 0xb4e   : > { %v7545_v56 = vcombine.high %v7500_v47, %v7532_v44  ;;  %v7544_v52 = vcombine.low %v7500_v47, %v7532_v44  ;;  %v7507_v2 = vrot.slane %v7493_v25, %v14341_v31 }
 0xb4f   : > { %v7559_v16 = vpack.c.bf16 %v7543_v10, %v7543_v10  ;;  %v7558_v3 = vpack.c.bf16 %v7542_v15, %v7542_v15 }
 0xb50   : > { %v7561_v22 = vpack.c.bf16 %v7545_v56, %v7545_v56  ;;  %v7560_v35 = vpack.c.bf16 %v7544_v52, %v7544_v52  ;;  %v7547_v8 = vcombine.high %v7507_v2, %v7539_v37  ;;  %v7546_v45 = vcombine.low %v7507_v2, %v7539_v37 }
 0xb51   : > { %9372 = vxpose.xlu1.c.b16.start.end [1/1] (short) (narrow) %v7553_v38, 16  ;;  %9356 = vxpose.xlu0.c.b16.start.end [1/1] (short) (narrow) %v7552_v12, 16 }
 0xb52   : > { %v7563_v50 = vpack.c.bf16 %v7547_v8, %v7547_v8  ;;  %v7562_v20 = vpack.c.bf16 %v7546_v45, %v7546_v45 }
 0xb55   : > { %9404 = vxpose.xlu1.c.b16.start.end [1/1] (short) (narrow) %v7555_v23, 16  ;;  %9388 = vxpose.xlu0.c.b16.start.end [1/1] (short) (narrow) %v7554_v63, 16 }
 0xb59   : > { %9436 = vxpose.xlu1.c.b16.start.end [1/1] (short) (narrow) %v7557_v46, 16  ;;  %9420 = vxpose.xlu0.c.b16.start.end [1/1] (short) (narrow) %v7556_v30, 16 }
 0xb5d   : > { %9468 = vxpose.xlu1.c.b16.start.end [1/1] (short) (narrow) %v7559_v16, 16  ;;  %9452 = vxpose.xlu0.c.b16.start.end [1/1] (short) (narrow) %v7558_v3, 16 }
 0xb61   : > { %9500 = vxpose.xlu1.c.b16.start.end [1/1] (short) (narrow) %v7561_v22, 16  ;;  %9484 = vxpose.xlu0.c.b16.start.end [1/1] (short) (narrow) %v7560_v35, 16 }
 0xb65   : > { %9532 = vxpose.xlu1.c.b16.start.end [1/1] (short) (narrow) %v7563_v50, 16  ;;  %9516 = vxpose.xlu0.c.b16.start.end [1/1] (short) (narrow) %v7562_v20, 16 }
 0xbab   : > { %v9316_v53 = vpop.trf.xlu1  ;;  %v9300_v54 = vpop.trf.xlu0 }
 0xbaf   : > { %v9348_v9 = vpop.trf.xlu1  ;;  %v9332_v42 = vpop.trf.xlu0 }
 0xbb3   : > { %v9380_v62 = vpop.trf.xlu1  ;;  %v9364_v58 = vpop.trf.xlu0 }
 0xbb4   : > { %v9685_v59 = vcombine.high %v9316_v53, %v9380_v62  ;;  %v9549_v34 = vcombine.high %v9300_v54, %v9364_v58  ;;  %v9684_v19 = vcombine.low %v9316_v53, %v9380_v62  ;;  %v9548_v28 = vcombine.low %v9300_v54, %v9364_v58 }
 0xbb6   : > { %v15740_v51 = vrot.slane %v9685_v59, %v14325_v5  ;;  %v15749_v29 = vrot.slane %v9549_v34, %v14325_v5  ;;  %v9692_v63 = vrot.slane %v9684_v19, %v14325_v5  ;;  %v9556_v15 = vrot.slane %v9548_v28, %v14325_v5 }
 0xbb7   : > { %v9412_v27 = vpop.trf.xlu1  ;;  %v9396_v1 = vpop.trf.xlu0 }
 0xbb8   : > { %v9701_v48 = vcombine.high %v9348_v9, %v9412_v27  ;;  %v9565_v13 = vcombine.high %v9332_v42, %v9396_v1  ;;  %v9700_v32 = vcombine.low %v9348_v9, %v9412_v27  ;;  %v9564_v7 = vcombine.low %v9332_v42, %v9396_v1 }
 0xbba   : > { %v15743_v18 = vrot.slane %v9701_v48, %v14325_v5  ;;  %v15746_v6 = vrot.slane %v9565_v13, %v14325_v5  ;;  %v9708_v11 = vrot.slane %v9700_v32, %v14325_v5  ;;  %v9572_v61 = vrot.slane %v9564_v7, %v14325_v5 }
 0xbbb   : > { %v9444_v4 = vpop.trf.xlu1  ;;  %v9428_v57 = vpop.trf.xlu0 }
 0xbbc   : > { %v9765_v60 = vcombine.high %v15740_v51, %v15743_v18  ;;  %v9629_v38 = vcombine.high %v15749_v29, %v15746_v6  ;;  %v9748_v25 = vcombine.low %v9692_v63, %v9708_v11  ;;  %v9612_v2 = vcombine.low %v9556_v15, %v9572_v61 }
 0xbbd   : > { %v9749_v9 = vcombine.high %v9692_v63, %v9708_v11  ;;  %v9613_v62 = vcombine.high %v9556_v15, %v9572_v61 }
 0xbbe   : > { %v9756_v42 = vrot.slane %v9748_v25, %v14341_v31  ;;  %v9620_v59 = vrot.slane %v9612_v2, %v14341_v31  ;;  %v9643_v63 = vrot.slane %v9629_v38, %v14341_v31 }
 0xbbf   : > { %v9476_v12 = vpop.trf.xlu1  ;;  %v9460_v49 = vpop.trf.xlu0 }
 0xbc3   : > { %v9508_v24 = vpop.trf.xlu1  ;;  %v9492_v17 = vpop.trf.xlu0 }
 0xbc4   : > { %v9716_v39 = vcombine.low %v9444_v4, %v9508_v24  ;;  %v9717_v23 = vcombine.high %v9444_v4, %v9508_v24  ;;  %v9580_v41 = vcombine.low %v9428_v57, %v9492_v17  ;;  %v9581_v14 = vcombine.high %v9428_v57, %v9492_v17 }
 0xbc6   : > { %v9724_v47 = vrot.slane %v9716_v39, %v14325_v5  ;;  %v9731_v37 = vrot.slane %v9717_v23, %v14325_v5  ;;  %v9588_v22 = vrot.slane %v9580_v41, %v14325_v5  ;;  %v9595_v35 = vrot.slane %v9581_v14, %v14325_v5 }
 0xbc7   : > { %v9540_v55 = vpop.trf.xlu1  ;;  %v9524_v36 = vpop.trf.xlu0 }
 0xbc8   : > { %v9732_v44 = vcombine.low %v9476_v12, %v9540_v55  ;;  %v9733_v46 = vcombine.high %v9476_v12, %v9540_v55  ;;  %v9596_v30 = vcombine.low %v9460_v49, %v9524_v36  ;;  %v9597_v10 = vcombine.high %v9460_v49, %v9524_v36 }
 0xbc9   : > { %v9763_v12 = vrot.slane %v9749_v9, %v14341_v31  ;;  %v9627_v49 = vrot.slane %v9613_v62, %v14341_v31  ;;  %v9764_v55 = vcombine.low %v15740_v51, %v15743_v18  ;;  %v9779_v36 = vrot.slane %v9765_v60, %v14341_v31 }
 0xbca   : > { %v9740_v16 = vrot.slane %v9732_v44, %v14325_v5  ;;  %v9747_v3 = vrot.slane %v9733_v46, %v14325_v5  ;;  %v9604_v56 = vrot.slane %v9596_v30, %v14325_v5  ;;  %v9611_v52 = vrot.slane %v9597_v10, %v14325_v5 }
 0xbcb   : > { %v9628_v44 = vcombine.low %v15749_v29, %v15746_v6  ;;  %v9772_v29 = vrot.slane %v9764_v55, %v14341_v31 }
 0xbcc   : > { %v9780_v8 = vcombine.low %v9724_v47, %v9740_v16  ;;  %v9781_v45 = vcombine.high %v9724_v47, %v9740_v16  ;;  %v9797_v50 = vcombine.high %v9731_v37, %v9747_v3  ;;  %v9644_v20 = vcombine.low %v9588_v22, %v9604_v56 }
 0xbcd   : > { %v9645_v53 = vcombine.high %v9588_v22, %v9604_v56  ;;  %v9661_v54 = vcombine.high %v9595_v35, %v9611_v52  ;;  %v9796_v32 = vcombine.low %v9731_v37, %v9747_v3  ;;  %v9660_v7 = vcombine.low %v9595_v35, %v9611_v52 }
 0xbce   : > { %v9788_v58 = vrot.slane %v9780_v8, %v14341_v31  ;;  %v9652_v34 = vrot.slane %v9644_v20, %v14341_v31  ;;  %v9795_v27 = vrot.slane %v9781_v45, %v14341_v31  ;;  %v9811_v11 = vrot.slane %v9797_v50, %v14341_v31 }
 0xbcf   : > { %v9659_v1 = vrot.slane %v9645_v53, %v14341_v31  ;;  %v9675_v24 = vrot.slane %v9661_v54, %v14341_v31  ;;  %v9804_v46 = vrot.slane %v9796_v32, %v14341_v31  ;;  %v9668_v30 = vrot.slane %v9660_v7, %v14341_v31 }
 0xbd0   : > { %v9812_v48 = vcombine.low %v9756_v42, %v9788_v58  ;;  %v9676_v13 = vcombine.low %v9620_v59, %v9652_v34  ;;  %v9677_v4 = vcombine.high %v9620_v59, %v9652_v34  ;;  %v9813_v57 = vcombine.high %v9756_v42, %v9788_v58 }
 0xbd1   : > { %v9678_v39 = vcombine.low %v9627_v49, %v9659_v1  ;;  %v9814_v23 = vcombine.low %v9763_v12, %v9795_v27  ;;  %v9815_v10 = vcombine.high %v9763_v12, %v9795_v27  ;;  %v15788_v15 = vcombine.low %v9643_v63, %v9675_v24 }
 0xbd2   : > { %v9825_v19 = vshrl.u32 %v9812_v48, 16  ;;  %v9822_v17 = vpack.i.b16 %v9812_v48, %v9676_v13  ;;  %v9824_v28 = vshrl.u32 %v9676_v13, 16  ;;  %v9832_v41 = vshrl.u32 %v9677_v4, 16 }
 0xbd3   : > { %v9833_v14 = vshrl.u32 %v9813_v57, 16  ;;  %v9830_v38 = vpack.i.b16 %v9813_v57, %v9677_v4  ;;  %v9840_v25 = vshrl.u32 %v9678_v39, 16  ;;  %v9841_v47 = vshrl.u32 %v9814_v23, 16 }
 0xbd4   : > { %9884 = vxpose.xlu0.c.b16.start.end [1/1] (short) (narrow) %v9822_v17, 16  ;;  %v9826_v61 = vpack.i.b16 %v9825_v19, %v9824_v28  ;;  %v9679_v37 = vcombine.high %v9627_v49, %v9659_v1  ;;  %v15790_v16 = vcombine.low %v9779_v36, %v9811_v11  ;;  %v9872_v18 = vshrl.u32 %v15788_v15, 16 }
 0xbd5   : > { %v9834_v51 = vpack.i.b16 %v9833_v14, %v9832_v41  ;;  %v15793_v60 = vcombine.high %v9643_v63, %v9675_v24  ;;  %v15795_v6 = vcombine.high %v9779_v36, %v9811_v11  ;;  %v9636_v3 = vrot.slane %v9628_v44, %v14341_v31 }
 0xbd6   : > { %9900 = vxpose.xlu1.c.b16.start.end [1/1] (short) (narrow) %v9826_v61, 16  ;;  %v9870_v56 = vpack.i.b16 %v15790_v16, %v15788_v15  ;;  %v9873_v52 = vshrl.u32 %v15790_v16, 16  ;;  %v9838_v2 = vpack.i.b16 %v9814_v23, %v9678_v39  ;;  %v9848_v45 = vshrl.u32 %v9679_v37, 16 }
 0xbd7   : > { %v9878_v22 = vpack.i.b16 %v15795_v6, %v15793_v60  ;;  %v9880_v35 = vshrl.u32 %v15793_v60, 16  ;;  %v9881_v8 = vshrl.u32 %v15795_v6, 16  ;;  %v9849_v50 = vshrl.u32 %v9815_v10, 16 }
 0xbd8   : > { %9916 = vxpose.xlu0.c.b16.start.end [1/1] (short) (narrow) %v9830_v38, 16  ;;  %v15806_v20 = vpack.i.b16 %v9873_v52, %v9872_v18  ;;  %v9842_v53 = vpack.i.b16 %v9841_v47, %v9840_v25  ;;  %v9680_v54 = vcombine.low %v9636_v3, %v9668_v30  ;;  %v9816_v9 = vcombine.low %v9772_v29, %v9804_v46 }
 0xbd9   : > { %v15808_v42 = vpack.i.b16 %v9881_v8, %v9880_v35  ;;  %v9846_v62 = vpack.i.b16 %v9815_v10, %v9679_v37  ;;  %v9850_v34 = vpack.i.b16 %v9849_v50, %v9848_v45  ;;  %v9681_v48 = vcombine.high %v9636_v3, %v9668_v30 }
 0xbda   : > { %9932 = vxpose.xlu1.c.b16.start.end [1/1] (short) (narrow) %v9834_v51, 16  ;;  %v9856_v27 = vshrl.u32 %v9680_v54, 16  ;;  %v9857_v1 = vshrl.u32 %v9816_v9, 16  ;;  %v9817_v13 = vcombine.high %v9772_v29, %v9804_v46  ;;  %v9854_v12 = vpack.i.b16 %v9816_v9, %v9680_v54 }
 0xbdb   : > { %v9864_v7 = vshrl.u32 %v9681_v48, 16 }
 0xbdc   : > { %9948 = vxpose.xlu0.c.b16.start.end [1/1] (short) (narrow) %v9838_v2, 16  ;;  %v9858_v19 = vpack.i.b16 %v9857_v1, %v9856_v27  ;;  %v9865_v24 = vshrl.u32 %v9817_v13, 16  ;;  %v9862_v11 = vpack.i.b16 %v9817_v13, %v9681_v48 }
 0xbde   : > { %9964 = vxpose.xlu1.c.b16.start.end [1/1] (short) (narrow) %v9842_v53, 16  ;;  %v9866_v63 = vpack.i.b16 %v9865_v24, %v9864_v7 }
 0xbe0   : > { %v8777_v58 = vpop.f32.mrf.mxu1  ;;  %v8953_v59 = vpop.f32.mrf.mxu0  ;;  %9980 = vxpose.xlu0.c.b16.start.end [1/1] (short) (narrow) %v9846_v62, 16 }
 0xbe1   : > { %v15810_v30 = vmul.f32 0.25, %v8777_v58  ;;  %v15812_v10 = vmul.f32 0.25, %v8953_v59 }
 0xbe2   : > { %v12781_v4 = vpop.f32.mrf.mxu1  ;;  %v12805_v57 = vpop.f32.mrf.mxu0  ;;  %9996 = vxpose.xlu1.c.b16.start.end [1/1] (short) (narrow) %v9850_v34, 16 }
 0xbe3   : > { %v9108_v37 = vsel %vm3314_vm1, %v15810_v30, -inf  ;;  %v9132_v29 = vsel %vm3314_vm1, %v15812_v10, -inf }
 0xbe4   : > { %v8780_v49 = vpop.f32.mrf.mxu1  ;;  %v8956_v32 = vpop.f32.mrf.mxu0  ;;  %10012 = vxpose.xlu0.c.b16.start.end [1/1] (short) (narrow) %v9854_v12, 16 }
 0xbe5   : > { %v15814_v47 = vmul.f32 0.25, %v8956_v32  ;;  %v15818_v18 = vmul.f32 0.25, %v8780_v49 }
 0xbe6   : > { %v12782_v17 = vpop.f32.mrf.mxu1  ;;  %v12806_v28 = vpop.f32.mrf.mxu0  ;;  %10028 = vxpose.xlu1.c.b16.start.end [1/1] (short) (narrow) %v9858_v19, 16 }
 0xbe7   : > { %v9135_v2 = vsel %vm3314_vm1, %v15814_v47, -inf  ;;  %v9111_v45 = vsel %vm3314_vm1, %v15818_v18, -inf }
 0xbe8   : > { %v8821_v39 = vpop.f32.mrf.mxu1  ;;  %v9041_v23 = vpop.f32.mrf.mxu0  ;;  %10044 = vxpose.xlu0.c.b16.start.end [1/1] (short) (narrow) %v9862_v11, 16 }
 0xbe9   : > { %v15822_v52 = vmul.f32 0.25, %v8821_v39  ;;  %v15830_v53 = vmul.f32 0.25, %v9041_v23 }
 0xbea   : > { %v12787_v61 = vpop.f32.mrf.mxu1  ;;  %v12817_v41 = vpop.f32.mrf.mxu0  ;;  %10060 = vxpose.xlu1.c.b16.start.end [1/1] (short) (narrow) %v9866_v63, 16 }
 0xbeb   : > { %v9114_v54 = vsel %vm3314_vm1, %v15822_v52, -inf  ;;  %v9144_v27 = vsel %vm3314_vm1, %v15830_v53, -inf }
 0xbec   : > { %v8824_v14 = vpop.f32.mrf.mxu1  ;;  %v9044_v55 = vpop.f32.mrf.mxu0 }
 0xbed   : > { %v15826_v8 = vmul.f32 0.25, %v8824_v14  ;;  %v15834_v62 = vmul.f32 0.25, %v9044_v55 }
 0xbee   : > { %v12788_v36 = vpop.f32.mrf.mxu1  ;;  %v12818_v44 = vpop.f32.mrf.mxu0 }
 0xbef   : > { %v9117_v58 = vsel %vm3314_vm1, %v15826_v8, -inf  ;;  %v9147_v13 = vsel %vm3314_vm1, %v15834_v62, -inf }
 0xbf0   : > { %v8865_v46 = vpop.f32.mrf.mxu1 }
 0xbf1   : > { %v15838_v34 = vmul.f32 0.25, %v8865_v46 }
 0xbf2   : > { %v12793_v38 = vpop.f32.mrf.mxu1 }
 0xbf3   : > { %v9120_v12 = vsel %vm3314_vm1, %v15838_v34, -inf }
 0xbf4   : > { %v8868_v25 = vpop.f32.mrf.mxu1 }
 0xbf5   : > { %9109 = vmax.xlane.f32.xlu0 %v9108_v37  ;;  %v15842_v48 = vmul.f32 0.25, %v8868_v25 }
 0xbf6   : > { %v12794_v51 = vpop.f32.mrf.mxu1 }
 0xbf7   : > { %9133 = vmax.xlane.f32.xlu1 %v9132_v29  ;;  %v9123_v19 = vsel %vm3314_vm1, %v15842_v48, -inf }
 0xbf8   : > { %v8909_v3 = vpop.f32.mrf.mxu1 }
 0xbf9   : > { %9136 = vmax.xlane.f32.xlu0 %v9135_v2  ;;  %v15846_v57 = vmul.f32 0.25, %v8909_v3 }
 0xbfa   : > { %v12799_v35 = vpop.f32.mrf.mxu1 }
 0xbfb   : > { %9112 = vmax.xlane.f32.xlu1 %v9111_v45  ;;  %v9126_v17 = vsel %vm3314_vm1, %v15846_v57, -inf }
 0xbfc   : > { %v8912_v50 = vpop.f32.mrf.mxu1 }
 0xbfd   : > { %9115 = vmax.xlane.f32.xlu0 %v9114_v54  ;;  %v15850_v32 = vmul.f32 0.25, %v8912_v50 }
 0xbfe   : > { %v12800_v9 = vpop.f32.mrf.mxu1 }
 0xbff   : > { %9118 = vmax.xlane.f32.xlu1 %v9117_v58  ;;  %v9129_v39 = vsel %vm3314_vm1, %v15850_v32, -inf }
 0xc00   : > { %v8997_v59 = vpop.f32.mrf.mxu1 }
 0xc01   : > { %9145 = vmax.xlane.f32.xlu0 %v9144_v27  ;;  %v15854_v24 = vmul.f32 0.25, %v8997_v59 }
 0xc02   : > { %v12811_v1 = vpop.f32.mrf.mxu1 }
 0xc03   : > { %9148 = vmax.xlane.f32.xlu1 %v9147_v13  ;;  %v9138_v61 = vsel %vm3314_vm1, %v15854_v24, -inf }
 0xc04   : > { %v9000_v4 = vpop.f32.mrf.mxu1 }
 0xc05   : > { %9121 = vmax.xlane.f32.xlu0 %v9120_v12  ;;  %v15858_v11 = vmul.f32 0.25, %v9000_v4 }
 0xc06   : > { %v12812_v49 = vpop.f32.mrf.mxu1 }
 0xc07   : > { %9124 = vmax.xlane.f32.xlu1 %v9123_v19  ;;  %v9141_v55 = vsel %vm3314_vm1, %v15858_v11, -inf }
 0xc08   : > { %v9085_v7 = vpop.f32.mrf.mxu1 }
 0xc09   : > { %9127 = vmax.xlane.f32.xlu0 %v9126_v17  ;;  %v15862_v63 = vmul.f32 0.25, %v9085_v7 }
 0xc0a   : > { %v12823_v28 = vpop.f32.mrf.mxu1 }
 0xc0b   : > { %9130 = vmax.xlane.f32.xlu1 %v9129_v39  ;;  %v9150_v36 = vsel %vm3314_vm1, %v15862_v63, -inf }
 0xc0c   : > { %v9088_v23 = vpop.f32.mrf.mxu1 }
 0xc0d   : > { %9139 = vmax.xlane.f32.xlu0 %v9138_v61  ;;  %v15866_v14 = vmul.f32 0.25, %v9088_v23 }
 0xc0e   : > { %v12824_v41 = vpop.f32.mrf.mxu1 }
 0xc0f   : > { %9142 = vmax.xlane.f32.xlu1 %v9141_v55  ;;  %v9153_v44 = vsel %vm3314_vm1, %v15866_v14, -inf }
 0xc11   : > { %9151 = vmax.xlane.f32.xlu0 %v9150_v36 }
 0xc13   : > { %9154 = vmax.xlane.f32.xlu1 %v9153_v44 }
 0xc36   : > { %v9892_v46 = vpop.trf.xlu0 }
 0xc38   : > { %v9908_v38 = vpop.trf.xlu1 }
 0xc3a   : > { %v9924_v25 = vpop.trf.xlu0 }
 0xc3c   : > { %v9940_v37 = vpop.trf.xlu1 }
 0xc3e   : > { %10076 = vxpose.xlu0.c.b16.start.end [1/1] (short) (narrow) %v9870_v56, 16  ;;  %v9956_v51 = vpop.trf.xlu0 }
 0xc3f   : > { %v10140_v29 = vcombine.low %v9892_v46, %v9956_v51 }
 0xc40   : > { %10092 = vxpose.xlu1.c.b16.start.end [1/1] (short) (narrow) %v15806_v20, 16  ;;  %v9972_v3 = vpop.trf.xlu1 }
 0xc41   : > { %v10208_v2 = vcombine.low %v9908_v38, %v9972_v3  ;;  %v15879_v45 = vrot.slane %v10140_v29, %v14325_v5 }
 0xc42   : > { %v9988_v35 = vpop.trf.xlu0 }
 0xc43   : > { %v10148_v50 = vcombine.low %v9924_v25, %v9988_v35  ;;  %v15882_v9 = vrot.slane %v10208_v2, %v14325_v5 }
 0xc44   : > { %v10004_v54 = vpop.trf.xlu1 }
 0xc45   : > { %v10216_v58 = vcombine.low %v9940_v37, %v10004_v54  ;;  %v15885_v59 = vrot.slane %v10148_v50, %v14325_v5 }
 0xc46   : > { %v15898_v1 = vpop.trf.xlu0 }
 0xc47   : > { %v15888_v15 = vrot.slane %v10216_v58, %v14325_v5  ;;  %v10172_v16 = vcombine.low %v15879_v45, %v15885_v59  ;;  %v10173_v56 = vcombine.high %v15879_v45, %v15885_v59 }
 0xc48   : > { %v15900_v13 = vpop.trf.xlu1 }
 0xc49   : > { %v10240_v20 = vcombine.low %v15882_v9, %v15888_v15  ;;  %v10241_v27 = vcombine.high %v15882_v9, %v15888_v15 }
 0xc4a   : > { %v15902_v4 = vpop.trf.xlu0 }
 0xc4c   : > { %v15904_v12 = vpop.trf.xlu1 }
 0xc7e   : > { %v9110_v49 = vpop.xlane.xlu0 %9109 }
 0xc7f   : > { %v9156_v19 = vsub.f32 %v15810_v30, %v9110_v49 }
 0xc80   : > { %v9134_v7 = vpop.xlane.xlu1 %9133 }
 0xc81   : > { %v9172_v17 = vmul.f32 1.442695, %v9156_v19  ;;  %v9164_v28 = vsub.f32 %v15812_v10, %v9134_v7 }
 0xc82   : > { %v9137_v39 = vpop.xlane.xlu0 %9136 }
 0xc83   : > { %13313 = vpow2.f32 %v9172_v17  ;;  %v9188_v23 = vmul.f32 1.442695, %v9164_v28  ;;  %v9165_v61 = vsub.f32 %v15814_v47, %v9137_v39 }
 0xc84   : > { %v9113_v41 = vpop.xlane.xlu1 %9112 }
 0xc85   : > { %13315 = vpow2.f32 %v9188_v23  ;;  %v9157_v55 = vsub.f32 %v15818_v18, %v9113_v41  ;;  %v9190_v36 = vmul.f32 1.442695, %v9165_v61 }
 0xc86   : > { %v9116_v44 = vpop.xlane.xlu0 %9115 }
 0xc87   : > { %v9174_v46 = vmul.f32 1.442695, %v9157_v55  ;;  %v9158_v38 = vsub.f32 %v15822_v52, %v9116_v44 }
 0xc88   : > { %v9119_v25 = vpop.xlane.xlu1 %9118 }
 0xc89   : > { %13317 = vpow2.f32 %v9174_v46  ;;  %v9176_v30 = vmul.f32 1.442695, %v9158_v38  ;;  %v9159_v37 = vsub.f32 %v15826_v8, %v9119_v25 }
 0xc8a   : > { %13319 = vpow2.f32 %v9190_v36  ;;  %v9146_v10 = vpop.xlane.xlu0 %9145 }
 0xc8b   : > { %13321 = vpow2.f32 %v9176_v30  ;;  %v9178_v51 = vmul.f32 1.442695, %v9159_v37  ;;  %v9168_v47 = vsub.f32 %v15830_v53, %v9146_v10 }
 0xc8c   : > { %v9149_v29 = vpop.xlane.xlu1 %9148 }
 0xc8d   : > { %v9196_v3 = vmul.f32 1.442695, %v9168_v47  ;;  %v9169_v18 = vsub.f32 %v15834_v62, %v9149_v29  ;;  %13323 = vpow2.f32 %v9178_v51 }
 0xc8e   : > { %v9122_v2 = vpop.xlane.xlu0 %9121 }
 0xc8f   : > { %13325 = vpow2.f32 %v9196_v3  ;;  %v9198_v35 = vmul.f32 1.442695, %v9169_v18  ;;  %v9160_v52 = vsub.f32 %v15838_v34, %v9122_v2 }
 0xc90   : > { %v15915_v50 = vpop.eup %13313  ;;  %v9125_v54 = vpop.xlane.xlu1 %9124 }
 0xc91   : > { %v9180_v8 = vmul.f32 1.442695, %v9160_v52  ;;  %v9161_v58 = vsub.f32 %v15842_v48, %v9125_v54  ;;  %v9204_v49 = vsel %vm3314_vm1, %v15915_v50, 0.0  ;;  %13327 = vpow2.f32 %v9198_v35 }
 0xc92   : > { %v15920_v53 = vpop.eup %13315  ;;  %9205 = vadd.xlane.f32.xlu0 %v9204_v49  ;;  %v9128_v62 = vpop.xlane.xlu0 %9127 }
 0xc93   : > { %13329 = vpow2.f32 %v9180_v8  ;;  %v9182_v19 = vmul.f32 1.442695, %v9161_v58  ;;  %v9162_v7 = vsub.f32 %v15846_v57, %v9128_v62  ;;  %v9228_v39 = vsel %vm3314_vm1, %v15920_v53, 0.0 }
 0xc94   : > { %v9131_v17 = vpop.xlane.xlu1 %9130 }
 0xc95   : > { %v9184_v34 = vmul.f32 1.442695, %v9162_v7  ;;  %v9163_v28 = vsub.f32 %v15850_v32, %v9131_v17  ;;  %13331 = vpow2.f32 %v9182_v19 }
 0xc96   : > { %v15926_v48 = vpop.eup %13317  ;;  %9229 = vadd.xlane.f32.xlu0 %v9228_v39  ;;  %v9140_v23 = vpop.xlane.xlu0 %9139 }
 0xc97   : > { %v15928_v61 = vpop.eup %13319  ;;  %13333 = vpow2.f32 %v9184_v34  ;;  %v9186_v41 = vmul.f32 1.442695, %v9163_v28  ;;  %v9166_v55 = vsub.f32 %v15854_v24, %v9140_v23  ;;  %v9207_v57 = vsel %vm3314_vm1, %v15926_v48, 0.0 }
 0xc98   : > { %v15933_v36 = vpop.eup %13321  ;;  %9208 = vadd.xlane.f32.xlu1 %v9207_v57  ;;  %v9143_v32 = vpop.xlane.xlu1 %9142  ;;  %v9231_v10 = vsel %vm3314_vm1, %v15928_v61, 0.0 }
 0xc99   : > { %v9192_v44 = vmul.f32 1.442695, %v9166_v55  ;;  %v9167_v46 = vsub.f32 %v15858_v11, %v9143_v32  ;;  %v9210_v38 = vsel %vm3314_vm1, %v15933_v36, 0.0  ;;  %13335 = vpow2.f32 %v9186_v41 }
 0xc9a   : > { %9211 = vadd.xlane.f32.xlu0 %v9210_v38  ;;  %v9152_v25 = vpop.xlane.xlu0 %9151  ;;  %v15938_v30 = vpop.eup %13323 }
 0xc9b   : > { %13337 = vpow2.f32 %v9192_v44  ;;  %v9194_v24 = vmul.f32 1.442695, %v9167_v46  ;;  %v9170_v37 = vsub.f32 %v15862_v63, %v9152_v25  ;;  %v9213_v63 = vsel %vm3314_vm1, %v15938_v30, 0.0 }
 0xc9c   : > { %v15943_v51 = vpop.eup %13325  ;;  %v9155_v47 = vpop.xlane.xlu1 %9154  ;;  %9232 = vadd.xlane.f32.xlu1 %v9231_v10 }
 0xc9d   : > { %v9200_v11 = vmul.f32 1.442695, %v9170_v37  ;;  %v9171_v29 = vsub.f32 %v15866_v14, %v9155_v47  ;;  %v9240_v3 = vsel %vm3314_vm1, %v15943_v51, 0.0  ;;  %13339 = vpow2.f32 %v9194_v24 }
 0xc9e   : > { %9241 = vadd.xlane.f32.xlu0 %v9240_v3  ;;  %v15948_v18 = vpop.eup %13327 }
 0xc9f   : > { %13341 = vpow2.f32 %v9200_v11  ;;  %v9202_v2 = vmul.f32 1.442695, %v9171_v29  ;;  %v9243_v54 = vsel %vm3314_vm1, %v15948_v18, 0.0 }
 0xca0   : > { %v15952_v35 = vpop.eup %13329  ;;  %9214 = vadd.xlane.f32.xlu1 %v9213_v63  ;;  %v10084_v57 = vpop.trf.xlu0 }
 0xca1   : > { %v9216_v52 = vsel %vm3314_vm1, %v15952_v35, 0.0  ;;  %13343 = vpow2.f32 %v9202_v2 }
 0xca2   : > { %9217 = vadd.xlane.f32.xlu0 %v9216_v52  ;;  %v15956_v14 = vpop.eup %13331  ;;  %v15990_v44 = vpop.trf.xlu1 }
 0xca3   : > { %v9219_v62 = vsel %vm3314_vm1, %v15956_v14, 0.0 }
 0xca4   : > { %v15960_v8 = vpop.eup %13333  ;;  %9244 = vadd.xlane.f32.xlu1 %v9243_v54 }
 0xca5   : > { %v9222_v58 = vsel %vm3314_vm1, %v15960_v8, 0.0 }
 0xca6   : > { %9223 = vadd.xlane.f32.xlu0 %v9222_v58  ;;  %v15964_v49 = vpop.eup %13335 }
 0xca7   : > { %v9225_v34 = vsel %vm3314_vm1, %v15964_v49, 0.0 }
 0xca8   : > { %v15968_v19 = vpop.eup %13337  ;;  %9220 = vadd.xlane.f32.xlu1 %v9219_v62 }
 0xca9   : > { %v9234_v7 = vsel %vm3314_vm1, %v15968_v19, 0.0 }
 0xcaa   : > { %9235 = vadd.xlane.f32.xlu0 %v9234_v7  ;;  %v15972_v17 = vpop.eup %13339 }
 0xcab   : > { %v9237_v23 = vsel %vm3314_vm1, %v15972_v17, 0.0 }
 0xcac   : > { %v15976_v28 = vpop.eup %13341  ;;  %9226 = vadd.xlane.f32.xlu1 %v9225_v34 }
 0xcad   : > { %v9246_v39 = vsel %vm3314_vm1, %v15976_v28, 0.0 }
 0xcae   : > { %9247 = vadd.xlane.f32.xlu0 %v9246_v39  ;;  %v15982_v41 = vpop.eup %13343 }
 0xcaf   : > { %v9249_v55 = vsel %vm3314_vm1, %v15982_v41, 0.0 }
 0xcb0   : > { %9238 = vadd.xlane.f32.xlu1 %v9237_v23  ;;  %v10156_v23 = vcombine.low %v15898_v1, %v10084_v57  ;;  %v10224_v1 = vcombine.low %v15900_v13, %v15990_v44  ;;  %v10187_v13 = vrot.slane %v10173_v56, %v14341_v31 }
 0xcb2   : > { %v10231_v44 = vrot.slane %v10224_v1, %v14325_v5 }
 0xcb4   : > { %9250 = vadd.xlane.f32.xlu1 %v9249_v55 }
 0xcdb   : > { %10108 = vxpose.xlu0.c.b16.start.end [1/1] (short) (narrow) %v9878_v22, 16 }
 0xce1   : > { %10124 = vxpose.xlu1.c.b16.start.end [1/1] (short) (narrow) %v15808_v42, 16 }
 0xd1b   : > { %v9206_v32 = vpop.xlane.xlu0 %9205 }
 0xd1c   : > { %13345 = vrcp.f32 %v9206_v32 }
 0xd1f   : > { %v9230_v46 = vpop.xlane.xlu0 %9229 }
 0xd21   : > { %v9209_v38 = vpop.xlane.xlu1 %9208 }
 0xd22   : > { %13347 = vrcp.f32 %v9209_v38 }
 0xd23   : > { %v9212_v25 = vpop.xlane.xlu0 %9211 }
 0xd24   : > { %13349 = vrcp.f32 %v9212_v25 }
 0xd25   : > { %v9233_v24 = vpop.xlane.xlu1 %9232 }
 0xd27   : > { %v9242_v37 = vpop.xlane.xlu0 %9241 }
 0xd29   : > { %v9215_v10 = vpop.xlane.xlu1 %9214  ;;  %v13346_v11 = vpop.eup %13345 }
 0xd2a   : > { %13351 = vrcp.f32 %v9215_v10  ;;  %v9253_v42 = vmul.f32 %v13346_v11, %v15915_v50  ;;  %v10163_v10 = vrot.slane %v10156_v23, %v14325_v5 }
 0xd2b   : > { %v9218_v47 = vpop.xlane.xlu0 %9217 }
 0xd2c   : > { %13353 = vrcp.f32 %v9218_v47 }
 0xd2d   : > { %v9245_v60 = vpop.xlane.xlu1 %9244 }
 0xd2f   : > { %v13348_v6 = vpop.eup %13347  ;;  %v9224_v22 = vpop.xlane.xlu0 %9223 }
 0xd30   : > { %v9255_v29 = vmul.f32 %v13348_v6, %v15926_v48 }
 0xd31   : > { %v9221_v3 = vpop.xlane.xlu1 %9220  ;;  %v13350_v54 = vpop.eup %13349 }
 0xd32   : > { %v9284_v2 = vpack.c.bf16 %v9255_v29, %v9253_v42  ;;  %13355 = vrcp.f32 %v9221_v3  ;;  %v9257_v7 = vmul.f32 %v13350_v54, %v15933_v36  ;;  %v10248_v3 = vrot.slane %v10240_v20, %v14341_v31 }
 0xd33   : > { %v9236_v63 = vpop.xlane.xlu0 %9235  ;;  %v10255_v20 = vrot.slane %v10241_v27, %v14341_v31 }
 0xd34   : > { %v10304_v52 = vsel %vm3314_vm1, %v9284_v2, 0 }
 0xd35   : > { %v9227_v58 = vpop.xlane.xlu1 %9226  ;;  %12826 = vmatpush3.bf16.xpose.msra.mxu0 %v10304_v52 }
 0xd36   : > { %12837 = vmatprep.subr.bf16.mxu0 %v13785_v21  ;;  %13357 = vrcp.f32 %v9227_v58 }
 0xd37   : > { %v13352_v62 = vpop.eup %13351  ;;  %13359 = vrcp.f32 %v9224_v22  ;;  %v9248_v48 = vpop.xlane.xlu0 %9247 }
 0xd38   : > { %v9259_v50 = vmul.f32 %v13352_v62, %v15938_v30  ;;  %13361 = vrcp.f32 %v9233_v24  ;;  %v10180_v24 = vrot.slane %v10172_v16, %v14341_v31 }
 0xd39   : > { %v9239_v34 = vpop.xlane.xlu1 %9238  ;;  %13363 = vrcp.f32 %v9230_v46  ;;  %v13354_v11 = vpop.eup %13353 }
 0xd3a   : > { %v9285_v39 = vpack.c.bf16 %v9259_v50, %v9257_v7  ;;  %13365 = vrcp.f32 %v9239_v34  ;;  %v9261_v45 = vmul.f32 %v13354_v11, %v15952_v35 }
 0xd3b   : > { %13367 = vrcp.f32 %v9236_v63 }
 0xd3c   : > { %v10351_v55 = vsel %vm3314_vm1, %v9285_v39, 0  ;;  %13369 = vrcp.f32 %v9242_v37 }
 0xd3d   : > { %12832 = vmatpush3.bf16.xpose.msra.mxu1 %v10351_v55  ;;  %v10116_v32 = vpop.trf.xlu0  ;;  %v9251_v25 = vpop.xlane.xlu1 %9250  ;;  %13371 = vrcp.f32 %v9245_v60 }
 0xd3e   : > { %v10164_v38 = vcombine.low %v15902_v4, %v10116_v32  ;;  %12843 = vmatprep.subr.bf16.mxu1 %v13785_v21  ;;  %13373 = vrcp.f32 %v9251_v25 }
 0xd3f   : > { %v13356_v6 = vpop.eup %13355  ;;  %13375 = vrcp.f32 %v9248_v48 }
 0xd40   : > { %v10171_v36 = vrot.slane %v10164_v38, %v14325_v5  ;;  %v9263_v16 = vmul.f32 %v13356_v6, %v15956_v14 }
 0xd42   : > { %v10188_v30 = vcombine.low %v10163_v10, %v10171_v36  ;;  %v10189_v47 = vcombine.high %v10163_v10, %v10171_v36  ;;  %v9286_v35 = vpack.c.bf16 %v9263_v16, %v9261_v45 }
 0xd43   : > { %v10132_v57 = vpop.trf.xlu1  ;;  %v13358_v22 = vpop.eup %13357 }
 0xd44   : > { %v10232_v4 = vcombine.low %v15904_v12, %v10132_v57  ;;  %v13360_v42 = vpop.eup %13359  ;;  %v10196_v46 = vrot.slane %v10188_v30, %v14341_v31  ;;  %v10203_v29 = vrot.slane %v10189_v47, %v14341_v31  ;;  %v9267_v2 = vmul.f32 %v13358_v22, %v15964_v49 }
 0xd45   : > { %v9265_v59 = vmul.f32 %v13360_v42, %v15960_v8  ;;  %v13362_v34 = vpop.eup %13361  ;;  %v10398_v11 = vsel %vm3314_vm1, %v9286_v35, 0 }
 0xd46   : > { %v10239_v12 = vrot.slane %v10232_v4, %v14325_v5  ;;  %v10204_v56 = vcombine.low %v10180_v24, %v10196_v46  ;;  %v10205_v37 = vcombine.high %v10180_v24, %v10196_v46  ;;  %v16027_v54 = vcombine.low %v10187_v13, %v10203_v29  ;;  %v13364_v15 = vpop.eup %13363 }
 0xd47   : > { %v16029_v58 = vcombine.high %v10187_v13, %v10203_v29  ;;  %v9287_v60 = vpack.c.bf16 %v9267_v2, %v9265_v59  ;;  %v13366_v48 = vpop.eup %13365  ;;  %v9271_v57 = vmul.f32 %v13362_v34, %v15928_v61  ;;  %v9269_v46 = vmul.f32 %v13364_v15, %v15920_v53 }
 0xd48   : > { %v10256_v63 = vcombine.low %v10231_v44, %v10239_v12  ;;  %v10257_v52 = vcombine.high %v10231_v44, %v10239_v12  ;;  %v10279_v39 = vshrl.u32 %v10204_v56, 16  ;;  %v10285_v23 = vshrl.u32 %v10205_v37, 16  ;;  %v13368_v4 = vpop.eup %13367 }
 0xd49   : > { %v10291_v55 = vshrl.u32 %v16027_v54, 16  ;;  %v10297_v9 = vshrl.u32 %v16029_v58, 16  ;;  %v10445_v24 = vsel %vm3314_vm1, %v9287_v60, 0  ;;  %v9275_v29 = vmul.f32 %v13366_v48, %v15972_v17  ;;  %v13370_v13 = vpop.eup %13369 }
 0xd4a   : > { %v10264_v14 = vrot.slane %v10256_v63, %v14341_v31  ;;  %v10271_v49 = vrot.slane %v10257_v52, %v14341_v31  ;;  %v13372_v61 = vpop.eup %13371  ;;  %v9288_v44 = vpack.c.bf16 %v9271_v57, %v9269_v46  ;;  %v9273_v12 = vmul.f32 %v13368_v4, %v15968_v19  ;;  %v13197_v57 = vld [vmem:[#allocation14 + $0x38] sm:$0xff]  }
 0xd4b   : > { %v13374_v16 = vpop.eup %13373  ;;  %v9279_v17 = vmul.f32 %v13372_v61, %v15948_v18  ;;  %v9277_v19 = vmul.f32 %v13370_v13, %v15943_v51 }
 0xd4c   : > { %v10272_v8 = vcombine.low %v10248_v3, %v10264_v14  ;;  %v10273_v62 = vcombine.high %v10248_v3, %v10264_v14  ;;  %v10274_v7 = vcombine.low %v10255_v20, %v10271_v49  ;;  %v16037_v50 = vcombine.high %v10255_v20, %v10271_v49  ;;  %v13376_v2 = vpop.eup %13375 }
 0xd4d   : > { %v9289_v3 = vpack.c.bf16 %v9275_v29, %v9273_v12  ;;  %v10492_v53 = vsel %vm3314_vm1, %v9288_v44, 0  ;;  %v9283_v52 = vmul.f32 %v13374_v16, %v15982_v41  ;;  %v9290_v45 = vpack.c.bf16 %v9279_v17, %v9277_v19 }
 0xd4e   : > { %v10278_v27 = vpack.i.b16 %v10272_v8, %v10204_v56  ;;  %v10280_v32 = vshrl.u32 %v10272_v8, 16  ;;  %v10284_v38 = vpack.i.b16 %v10273_v62, %v10205_v37  ;;  %v10286_v25 = vshrl.u32 %v10273_v62, 16 }
 0xd4f   : > { %v10290_v10 = vpack.i.b16 %v10274_v7, %v16027_v54  ;;  %v10292_v36 = vshrl.u32 %v10274_v7, 16  ;;  %v10296_v30 = vpack.i.b16 %v16037_v50, %v16029_v58  ;;  %v10298_v47 = vshrl.u32 %v16037_v50, 16 }
 0xd50   : > { %12828 = vmatmul.mubr.msk.bf16.vlgmr.msra.gmra.mxu0 %vm3314_vm1, %v10278_v27  ;;  %v10281_v1 = vpack.i.b16 %v10280_v32, %v10279_v39  ;;  %v10287_v6 = vpack.i.b16 %v10286_v25, %v10285_v23  ;;  %v10539_v63 = vsel %vm3314_vm1, %v9289_v3, 0  ;;  %v9281_v18 = vmul.f32 %v13376_v2, %v15976_v28 }
 0xd51   : > { %12838 = vmatpush3.bf16.xpose.msra.mxu0 %v10398_v11  ;;  %12839 = vmatprep.mubr.msk.bf16.mxu0 %vm13791_vm0, %v13785_v21  ;;  %v10293_v22 = vpack.i.b16 %v10292_v36, %v10291_v55  ;;  %v10299_v42 = vpack.i.b16 %v10298_v47, %v10297_v9  ;;  %v10586_v56 = vsel %vm3314_vm1, %v9290_v45, 0 }
 0xd52   : > { %12834 = vmatmul.mubr.msk.bf16.vlgmr.msra.gmra.mxu1 %vm3314_vm1, %v10281_v1  ;;  %12849 = vmatprep.subr.bf16.mxu0 %v13785_v21  ;;  %v9291_v59 = vpack.c.bf16 %v9283_v52, %v9281_v18 }
 0xd53   : > { %12844 = vmatpush3.bf16.xpose.msra.mxu1 %v10445_v24  ;;  %12845 = vmatprep.mubr.msk.bf16.mxu1 %vm13791_vm0, %v13785_v21 }
 0xd54   : > { %12855 = vmatprep.subr.bf16.mxu1 %v13785_v21  ;;  %v10633_v51 = vsel %vm3314_vm1, %v9291_v59, 0 }
 0xd58   : > { %12840 = vmatmul.mubr.msk.bf16.vlgmr.msra.gmra.mxu0 %vm3314_vm1, %v10284_v38 }
 0xd59   : > { %12850 = vmatpush3.bf16.xpose.msra.mxu0 %v10492_v53  ;;  %12851 = vmatprep.mubr.msk.bf16.mxu0 %vm13791_vm0, %v13785_v21 }
 0xd5a   : > { %12846 = vmatmul.mubr.msk.bf16.vlgmr.msra.gmra.mxu1 %vm3314_vm1, %v10287_v6  ;;  %12861 = vmatprep.subr.bf16.mxu0 %v13785_v21  ;;  %v13198_v6 = vld [vmem:[#allocation14 + $0x30] sm:$0xff]  }
 0xd5b   : > { %12856 = vmatpush3.bf16.xpose.msra.mxu1 %v10539_v63  ;;  %12857 = vmatprep.mubr.msk.bf16.mxu1 %vm13791_vm0, %v13785_v21 }
 0xd5c   : > { %12867 = vmatprep.subr.bf16.mxu1 %v13785_v21 }
 0xd60   : > { %12852 = vmatmul.mubr.msk.bf16.vlgmr.msra.gmra.mxu0 %vm3314_vm1, %v10290_v10 }
 0xd61   : > { %12862 = vmatpush3.bf16.xpose.msra.mxu0 %v10586_v56  ;;  %12863 = vmatprep.mubr.msk.bf16.mxu0 %vm13791_vm0, %v13785_v21 }
 0xd62   : > { %12858 = vmatmul.mubr.msk.bf16.vlgmr.msra.gmra.mxu1 %vm3314_vm1, %v10293_v22  ;;  %12873 = vmatprep.subr.bf16.mxu0 %v13785_v21 }
 0xd63   : > { %12868 = vmatpush3.bf16.xpose.msra.mxu1 %v10633_v51  ;;  %12869 = vmatprep.mubr.msk.bf16.mxu1 %vm13791_vm0, %v13785_v21 }
 0xd68   : > { %12864 = vmatmul.mubr.msk.bf16.vlgmr.msra.gmra.mxu0 %vm3314_vm1, %v10296_v30 }
 0xd69   : > { %12889 = vmatprep.mubr.msk.bf16.mxu0 %vm13791_vm0, %v13785_v21  ;;  %12874 = vmatpush3.bf16.msra.mxu0 %v13197_v57 }
 0xd6a   : > { %12870 = vmatmul.mubr.msk.bf16.vlgmr.msra.gmra.mxu1 %vm3314_vm1, %v10299_v42  ;;  %12875 = vmatprep.subr.bf16.mxu0 %v13785_v21 }
 0xd6b   : > { %11842 = vmatprep.mubr.bf16.mxu1 %v13784_v0 }
 0xd6d   : > { %12876 = vmatpush3.bf16.msra.mxu0 %v13198_v6 }
 0xd6e   : > { %12877 = vmatprep.subr.bf16.mxu0 %v13785_v21 }
 0xe10   : > { %v10340_v28 = vpop.f32.mrf.mxu0 }
 0xe11   : > { %10676 = vxpose.xlu0.b32.start [1/2] (short) (narrow) %v10340_v28, 16 }
 0xe12   : > { %v12829_v41 = vpop.f32.mrf.mxu0  ;;  %v10387_v37 = vpop.f32.mrf.mxu1 }
 0xe13   : > { %10708 = vxpose.xlu1.b32.start [1/2] (short) (narrow) %v10387_v37, 16 }
 0xe14   : > { %v10343_v54 = vpop.f32.mrf.mxu0  ;;  %v12835_v58 = vpop.f32.mrf.mxu1 }
 0xe15   : > { %10677 = vxpose.xlu0.b32.end [2/2] (short) (narrow) %v10343_v54, 16 }
 0xe16   : > { %v12830_v20 = vpop.f32.mrf.mxu0  ;;  %v10390_v14 = vpop.f32.mrf.mxu1 }
 0xe17   : > { %10709 = vxpose.xlu1.b32.end [2/2] (short) (narrow) %v10390_v14, 16 }
 0xe18   : > { %v12836_v49 = vpop.f32.mrf.mxu1  ;;  %v10434_v35 = vpop.f32.mrf.mxu0 }
 0xe19   : > { %10740 = vxpose.xlu0.b32.start [1/2] (short) (narrow) %v10434_v35, 16 }
 0xe1a   : > { %v12841_v60 = vpop.f32.mrf.mxu0  ;;  %v10481_v8 = vpop.f32.mrf.mxu1 }
 0xe1b   : > { %10772 = vxpose.xlu1.b32.start [1/2] (short) (narrow) %v10481_v8, 16 }
 0xe1c   : > { %v10437_v62 = vpop.f32.mrf.mxu0  ;;  %v12847_v7 = vpop.f32.mrf.mxu1 }
 0xe1d   : > { %10741 = vxpose.xlu0.b32.end [2/2] (short) (narrow) %v10437_v62, 16 }
 0xe1e   : > { %v12842_v0 = vpop.f32.mrf.mxu0  ;;  %v10484_v50 = vpop.f32.mrf.mxu1 }
 0xe1f   : > { %10773 = vxpose.xlu1.b32.end [2/2] (short) (narrow) %v10484_v50, 16 }
 0xe20   : > { %v12848_v34 = vpop.f32.mrf.mxu1  ;;  %v10528_v39 = vpop.f32.mrf.mxu0 }
 0xe21   : > { %10804 = vxpose.xlu0.b32.start [1/2] (short) (narrow) %v10528_v39, 16 }
 0xe22   : > { %v12853_v23 = vpop.f32.mrf.mxu0  ;;  %v10575_v55 = vpop.f32.mrf.mxu1 }
 0xe23   : > { %10836 = vxpose.xlu1.b32.start [1/2] (short) (narrow) %v10575_v55, 16 }
 0xe24   : > { %v10531_v9 = vpop.f32.mrf.mxu0  ;;  %v12859_v15 = vpop.f32.mrf.mxu1 }
 0xe25   : > { %10805 = vxpose.xlu0.b32.end [2/2] (short) (narrow) %v10531_v9, 16 }
 0xe26   : > { %v12854_v27 = vpop.f32.mrf.mxu0  ;;  %v10578_v32 = vpop.f32.mrf.mxu1 }
 0xe27   : > { %10837 = vxpose.xlu1.b32.end [2/2] (short) (narrow) %v10578_v32, 16 }
 0xe28   : > { %v12860_v38 = vpop.f32.mrf.mxu1  ;;  %v10622_v25 = vpop.f32.mrf.mxu0 }
 0xe29   : > { %10868 = vxpose.xlu0.b32.start [1/2] (short) (narrow) %v10622_v25, 16 }
 0xe2a   : > { %v12865_v48 = vpop.f32.mrf.mxu0  ;;  %v10669_v10 = vpop.f32.mrf.mxu1 }
 0xe2b   : > { %10900 = vxpose.xlu1.b32.start [1/2] (short) (narrow) %v10669_v10, 16 }
 0xe2c   : > { %v10625_v36 = vpop.f32.mrf.mxu0  ;;  %v12871_v30 = vpop.f32.mrf.mxu1 }
 0xe2d   : > { %10869 = vxpose.xlu0.b32.end [2/2] (short) (narrow) %v10625_v36, 16 }
 0xe2e   : > { %v12866_v47 = vpop.f32.mrf.mxu0  ;;  %v10672_v11 = vpop.f32.mrf.mxu1 }
 0xe2f   : > { %10901 = vxpose.xlu1.b32.end [2/2] (short) (narrow) %v10672_v11, 16 }
 0xe30   : > { %v12872_v1 = vpop.f32.mrf.mxu1 }
 0xe8d   : > { %v10692_v4 = vpop.trf.xlu0 }
 0xe8f   : > { %v10724_v22 = vpop.trf.xlu1 }
 0xe91   : > { %v10693_v42 = vpop.trf.xlu0 }
 0xe93   : > { %v10725_v24 = vpop.trf.xlu1 }
 0xe95   : > { %v10756_v46 = vpop.trf.xlu0 }
 0xe96   : > { %v10932_v29 = vcombine.low %v10692_v4, %v10756_v46  ;;  %v10933_v13 = vcombine.high %v10692_v4, %v10756_v46 }
 0xe97   : > { %v10788_v61 = vpop.trf.xlu1 }
 0xe98   : > { %v10948_v44 = vcombine.low %v10724_v22, %v10788_v61  ;;  %v10949_v12 = vcombine.high %v10724_v22, %v10788_v61  ;;  %v10940_v16 = vrot.slane %v10932_v29, %v14325_v5  ;;  %v10947_v2 = vrot.slane %v10933_v13, %v14325_v5 }
 0xe99   : > { %v10757_v3 = vpop.trf.xlu0 }
 0xe9a   : > { %v10956_v53 = vrot.slane %v10948_v44, %v14325_v5  ;;  %v10963_v17 = vrot.slane %v10949_v12, %v14325_v5  ;;  %v11068_v63 = vcombine.low %v10693_v42, %v10757_v3  ;;  %v11069_v19 = vcombine.high %v10693_v42, %v10757_v3 }
 0xe9b   : > { %v10789_v52 = vpop.trf.xlu1 }
 0xe9c   : > { %v10996_v45 = vcombine.low %v10940_v16, %v10956_v53  ;;  %v10997_v18 = vcombine.high %v10940_v16, %v10956_v53  ;;  %v11012_v59 = vcombine.low %v10947_v2, %v10963_v17  ;;  %v11013_v56 = vcombine.high %v10947_v2, %v10963_v17 }
 0xe9d   : > { %v11084_v51 = vcombine.low %v10725_v24, %v10789_v52  ;;  %v11085_v28 = vcombine.high %v10725_v24, %v10789_v52  ;;  %v10820_v41 = vpop.trf.xlu0  ;;  %v11076_v14 = vrot.slane %v11068_v63, %v14325_v5  ;;  %v11083_v49 = vrot.slane %v11069_v19, %v14325_v5 }
 0xe9e   : > { %v11004_v37 = vrot.slane %v10996_v45, %v14341_v31  ;;  %v11011_v54 = vrot.slane %v10997_v18, %v14341_v31  ;;  %v11020_v58 = vrot.slane %v11012_v59, %v14341_v31  ;;  %v11027_v20 = vrot.slane %v11013_v56, %v14341_v31 }
 0xe9f   : > { %v11092_v35 = vrot.slane %v11084_v51, %v14325_v5  ;;  %v11099_v60 = vrot.slane %v11085_v28, %v14325_v5  ;;  %v10852_v8 = vpop.trf.xlu1 }
 0xea0   : > { %v12429_v62 = vcombine.low %v11004_v37, %v11011_v54  ;;  %v12431_v7 = vcombine.high %v11004_v37, %v11011_v54  ;;  %v12433_v0 = vcombine.low %v11020_v58, %v11027_v20  ;;  %v12435_v50 = vcombine.high %v11020_v58, %v11027_v20 }
 0xea1   : > { %v11132_v34 = vcombine.low %v11076_v14, %v11092_v35  ;;  %v11133_v39 = vcombine.high %v11076_v14, %v11092_v35  ;;  %v11148_v23 = vcombine.low %v11083_v49, %v11099_v60  ;;  %v11149_v55 = vcombine.high %v11083_v49, %v11099_v60  ;;  %v10821_v9 = vpop.trf.xlu0 }
 0xea2   : > { %v11212_v15 = vrot.slane %v12429_v62, %v14325_v5  ;;  %v11228_v27 = vrot.slane %v12431_v7, %v14325_v5  ;;  %v11244_v32 = vrot.slane %v12433_v0, %v14325_v5  ;;  %v11260_v38 = vrot.slane %v12435_v50, %v14325_v5 }
 0xea3   : > { %v11140_v25 = vrot.slane %v11132_v34, %v14341_v31  ;;  %v11147_v48 = vrot.slane %v11133_v39, %v14341_v31  ;;  %v11156_v10 = vrot.slane %v11148_v23, %v14341_v31  ;;  %v11163_v36 = vrot.slane %v11149_v55, %v14341_v31  ;;  %v10853_v30 = vpop.trf.xlu1 }
 0xea4   : > { %v11269_v47 = vcombine.high %v11212_v15, %v11228_v27  ;;  %v11301_v11 = vcombine.high %v11244_v32, %v11260_v38  ;;  %v11268_v1 = vcombine.low %v11212_v15, %v11228_v27  ;;  %v11300_v57 = vcombine.low %v11244_v32, %v11260_v38 }
 0xea5   : > { %v12437_v6 = vcombine.low %v11140_v25, %v11147_v48  ;;  %v12439_v4 = vcombine.high %v11140_v25, %v11147_v48  ;;  %v12441_v22 = vcombine.low %v11156_v10, %v11163_v36  ;;  %v12443_v42 = vcombine.high %v11156_v10, %v11163_v36  ;;  %v10884_v24 = vpop.trf.xlu0 }
 0xea6   : > { %v10964_v46 = vcombine.low %v10820_v41, %v10884_v24  ;;  %v10965_v29 = vcombine.high %v10820_v41, %v10884_v24  ;;  %v16110_v13 = vrot.slane %v11269_v47, %v14341_v31  ;;  %v16113_v61 = vrot.slane %v11301_v11, %v14341_v31 }
 0xea7   : > { %v11348_v44 = vrot.slane %v12437_v6, %v14325_v5  ;;  %v11364_v12 = vrot.slane %v12439_v4, %v14325_v5  ;;  %v16118_v3 = vrot.slane %v12441_v22, %v14325_v5  ;;  %v16121_v16 = vrot.slane %v12443_v42, %v14325_v5  ;;  %v10916_v2 = vpop.trf.xlu1 }
 0xea8   : > { %v10972_v53 = vrot.slane %v10964_v46, %v14325_v5  ;;  %v10979_v17 = vrot.slane %v10965_v29, %v14325_v5  ;;  %v10980_v63 = vcombine.low %v10852_v8, %v10916_v2  ;;  %v10981_v19 = vcombine.high %v10852_v8, %v10916_v2 }
 0xea9   : > { %v10885_v52 = vpop.trf.xlu0  ;;  %v11334_v45 = vcombine.low %v16110_v13, %v16113_v61  ;;  %v11405_v18 = vcombine.high %v11348_v44, %v11364_v12  ;;  %v11437_v59 = vcombine.high %v16118_v3, %v16121_v16  ;;  %v16130_v56 = vrot.slane %v11268_v1, %v14341_v31 }
 0xeaa   : > { %v10988_v51 = vrot.slane %v10980_v63, %v14325_v5  ;;  %v10995_v28 = vrot.slane %v10981_v19, %v14325_v5  ;;  %v11100_v41 = vcombine.low %v10821_v9, %v10885_v52  ;;  %v11101_v37 = vcombine.high %v10821_v9, %v10885_v52 }
 0xeab   : > { %v10917_v54 = vpop.trf.xlu1  ;;  %v11419_v58 = vrot.slane %v11405_v18, %v14341_v31  ;;  %v11451_v20 = vrot.slane %v11437_v59, %v14341_v31  ;;  %v16137_v14 = vrot.slane %v11300_v57, %v14341_v31  ;;  %v11404_v49 = vcombine.low %v11348_v44, %v11364_v12  ;;  %v13199_v57 = vld [vmem:[#allocation14 + $0x28] sm:$0xff]   ;;  %v13200_v12 = vld [vmem:[#allocation14 + $0x20] sm:$0xff]  }
 0xeac   : > { %v11028_v35 = vcombine.low %v10972_v53, %v10988_v51  ;;  %v11029_v60 = vcombine.high %v10972_v53, %v10988_v51  ;;  %v11044_v8 = vcombine.low %v10979_v17, %v10995_v28  ;;  %v11045_v62 = vcombine.high %v10979_v17, %v10995_v28  ;;  %12878 = vmatpush3.bf16.msra.mxu0 %v13199_v57 }
 0xead   : > { %v11108_v7 = vrot.slane %v11100_v41, %v14325_v5  ;;  %v11115_v0 = vrot.slane %v11101_v37, %v14325_v5  ;;  %v11116_v50 = vcombine.low %v10853_v30, %v10917_v54  ;;  %v11117_v34 = vcombine.high %v10853_v30, %v10917_v54  ;;  %12879 = vmatprep.subr.bf16.mxu0 %v13785_v21 }
 0xeae   : > { %v11036_v39 = vrot.slane %v11028_v35, %v14341_v31  ;;  %v11043_v23 = vrot.slane %v11029_v60, %v14341_v31  ;;  %v11052_v55 = vrot.slane %v11044_v8, %v14341_v31  ;;  %v11059_v9 = vrot.slane %v11045_v62, %v14341_v31 }
 0xeaf   : > { %v11124_v15 = vrot.slane %v11116_v50, %v14325_v5  ;;  %v11131_v27 = vrot.slane %v11117_v34, %v14325_v5  ;;  %v11470_v32 = vcombine.low %v11419_v58, %v11451_v20  ;;  %v11333_v38 = vcombine.high %v16130_v56, %v16137_v14 }
 0xeb0   : > { %v12430_v25 = vcombine.low %v11036_v39, %v11043_v23  ;;  %v12432_v48 = vcombine.high %v11036_v39, %v11043_v23  ;;  %v12434_v10 = vcombine.low %v11052_v55, %v11059_v9  ;;  %v12436_v36 = vcombine.high %v11052_v55, %v11059_v9  ;;  %12880 = vmatpush3.bf16.msra.mxu0 %v13200_v12  ;;  %v13202_v23 = vld [vmem:[#allocation14 + $0x10] sm:$0xff]  }
 0xeb1   : > { %v11164_v30 = vcombine.low %v11108_v7, %v11124_v15  ;;  %v11165_v47 = vcombine.high %v11108_v7, %v11124_v15  ;;  %v11180_v11 = vcombine.low %v11115_v0, %v11131_v27  ;;  %v11181_v1 = vcombine.high %v11115_v0, %v11131_v27  ;;  %12881 = vmatprep.subr.bf16.mxu0 %v13785_v21 }
 0xeb2   : > { %v11219_v6 = vrot.slane %v12430_v25, %v14325_v5  ;;  %v11235_v4 = vrot.slane %v12432_v48, %v14325_v5  ;;  %v11251_v22 = vrot.slane %v12434_v10, %v14325_v5  ;;  %v11267_v42 = vrot.slane %v12436_v36, %v14325_v5 }
 0xeb3   : > { %v11172_v24 = vrot.slane %v11164_v30, %v14341_v31  ;;  %v11179_v46 = vrot.slane %v11165_v47, %v14341_v31  ;;  %v11188_v29 = vrot.slane %v11180_v11, %v14341_v31  ;;  %v11195_v44 = vrot.slane %v11181_v1, %v14341_v31  ;;  %v13203_v47 = vld [vmem:[#allocation14 + $0x8] sm:$0xff]  }
 0xeb4   : > { %v13095_v2 = vpack.i.bf16 %v11470_v32, %v11334_v45  ;;  %v16158_v53 = vrot.slane %v11404_v49, %v14341_v31  ;;  %v11436_v17 = vcombine.low %v16118_v3, %v16121_v16  ;;  %v11335_v63 = vcombine.high %v16110_v13, %v16113_v61  ;;  %v13201_v16 = vld [vmem:[#allocation14 + $0x18] sm:$0xff]  }
 0xeb5   : > { %v12438_v19 = vcombine.low %v11172_v24, %v11179_v46  ;;  %v12440_v52 = vcombine.high %v11172_v24, %v11179_v46  ;;  %v12442_v18 = vcombine.low %v11188_v29, %v11195_v44  ;;  %v12444_v59 = vcombine.high %v11188_v29, %v11195_v44  ;;  %12882 = vmatpush3.bf16.msra.mxu0 %v13201_v16 }
 0xeb6   : > { %13096 = vrot.lane.b32.xlu1 %v13095_v2, %s13792_s20  ;;  %v16167_v51 = vrot.slane %v11436_v17, %v14341_v31  ;;  %v11471_v45 = vcombine.high %v11419_v58, %v11451_v20  ;;  %v11284_v28 = vcombine.low %v11219_v6, %v11235_v4  ;;  %v11316_v41 = vcombine.low %v11251_v22, %v11267_v42  ;;  %s13683_s20 = scalar_lea.vmem %s13682_s24, 512 }
 0xeb7   : > { %v11355_v37 = vrot.slane %v12438_v19, %v14325_v5  ;;  %v11371_v3 = vrot.slane %v12440_v52, %v14325_v5  ;;  %v11387_v13 = vrot.slane %v12442_v18, %v14325_v5  ;;  %v11403_v61 = vrot.slane %v12444_v59, %v14325_v5  ;;  %12883 = vmatprep.subr.bf16.mxu0 %v13785_v21 }
 0xeb8   : > { %v11469_v54 = vcombine.high %v16158_v53, %v16167_v51  ;;  %v13100_v49 = vpack.i.bf16 %v11471_v45, %v11335_v63  ;;  %v11292_v35 = vrot.slane %v11284_v28, %v14341_v31  ;;  %v11324_v58 = vrot.slane %v11316_v41, %v14341_v31 }
 0xeb9   : > { %v11420_v20 = vcombine.low %v11355_v37, %v11371_v3  ;;  %v11452_v60 = vcombine.low %v11387_v13, %v11403_v61  ;;  %v11285_v8 = vcombine.high %v11219_v6, %v11235_v4  ;;  %v11317_v62 = vcombine.high %v11251_v22, %v11267_v42  ;;  %12884 = vmatpush3.bf16.msra.mxu0 %v13202_v23  ;;  %v13204_v4 = vld [vmem:[#allocation14] sm:$0xff]  }
 0xeba   : > { %v13090_v7 = vpack.i.bf16 %v11469_v54, %v11333_v38  ;;  %13101 = vrot.lane.b32.xlu1 %v13100_v49, %s13790_s18  ;;  %v11421_v5 = vcombine.high %v11355_v37, %v11371_v3  ;;  %v11337_v0 = vcombine.high %v11292_v35, %v11324_v58  ;;  %v11336_v39 = vcombine.low %v11292_v35, %v11324_v58  ;;  %s13677_s18 = scalar_lea.vmem %s16250_s2, 256 }
 0xebb   : > { %v11428_v50 = vrot.slane %v11420_v20, %v14341_v31  ;;  %v11460_v34 = vrot.slane %v11452_v60, %v14341_v31  ;;  %v11453_v9 = vcombine.high %v11387_v13, %v11403_v61  ;;  %v11332_v15 = vcombine.low %v16130_v56, %v16137_v14  ;;  %12885 = vmatprep.subr.bf16.mxu0 %v13785_v21  ;;  %p13678_p6 = scmp.ne.s32.totalorder %s16250_s2, %s13677_s18  ;;  %p13685_p7 = scmp.lt.s32.totalorder %s13683_s20, %s13677_s18 }
 0xebc   : > { %13091 = vrot.lane.b32.xlu0 %v13090_v7, %s13793_s25  ;;  %v11435_v55 = vrot.slane %v11421_v5, %v14341_v31  ;;  %v11468_v27 = vcombine.low %v16158_v53, %v16167_v51  ;;  %v11299_v25 = vrot.slane %v11285_v8, %v14341_v31  ;;  %v11331_v48 = vrot.slane %v11317_v62, %v14341_v31 }
 0xebd   : > { %v11473_v32 = vcombine.high %v11428_v50, %v11460_v34  ;;  %v11472_v38 = vcombine.low %v11428_v50, %v11460_v34  ;;  %v11467_v10 = vrot.slane %v11453_v9, %v14341_v31  ;;  %12886 = vmatpush3.bf16.msra.mxu0 %v13203_v47  ;;  %p13679_p0 = pnand %p13678_p6, %p16400_p11  ;;  %p13686_p2 = por %p13685_p7, %p13684_p12 }
 0xebe   : > { %v11339_v56 = vcombine.high %v11299_v25, %v11331_v48  ;;  %v11338_v14 = vcombine.low %v11299_v25, %v11331_v48  ;;  %12887 = vmatprep.subr.bf16.mxu0 %v13785_v21 }
 0xebf   : > { %v13110_v36 = vpack.i.bf16 %v11473_v32, %v11337_v0  ;;  %v13105_v30 = vpack.i.bf16 %v11472_v38, %v11336_v39  ;;  %v11475_v11 = vcombine.high %v11435_v55, %v11467_v10  ;;  %v11474_v1 = vcombine.low %v11435_v55, %v11467_v10  ;;  %v12445_v0 = vld [vmem:[#allocation16] ss:$0 sm:$0xff]  ;;  %v13205_v32 = vld [vmem:[#allocation17 + $0x70] ss:$8 sps:$4 sm:$0xff]   ;;  %p13680_p3 = pneg %p13679_p0 }
 0xec0   : > { %v13207_v38 = vld [vmem:[#allocation17 + $0x74] ss:$8 sps:$4 sm:$0xff]  }
 0xec1   : > { %13111 = vrot.lane.b32.xlu1 %v13110_v36, %s13786_s26  ;;  %13106 = vrot.lane.b32.xlu0 %v13105_v30, %s13788_s11  ;;  %v13120_v57 = vpack.i.bf16 %v11475_v11, %v11339_v56  ;;  %v13115_v6 = vpack.i.bf16 %v11474_v1, %v11338_v14  ;;  %v13208_v11 = vld [vmem:[#allocation17 + $0x60] ss:$8 sps:$4 sm:$0xff]   ;;  %v13210_v1 = vld [vmem:[#allocation17 + $0x64] ss:$8 sps:$4 sm:$0xff]   ;;  %v13211_v56 = vld [vmem:[#allocation17 + $0x50] ss:$8 sps:$4 sm:$0xff]   ;;  %p13687_p5 = pnand %p13686_p2, %p13680_p3 }
 0xec2   : > { %12888 = vmatpush3.bf16.msra.mxu0 %v13204_v4  ;;  %11810 = vmatprep.subr.bf16.mxu1 %v13207_v38  ;;  %v13213_v14 = vld [vmem:[#allocation17 + $0x54] ss:$8 sps:$4 sm:$0xff]  }
 0xec3   : > { %11811 = vmatpush1.bf16.msra.mxu1 %v13205_v32  ;;  %v13219_v4 = vld [vmem:[#allocation17 + $0x34] ss:$8 sps:$4 sm:$0xff]  }
 0xec4   : > { %11812 = vmatprep.subr.bf16.mxu1 %v13210_v1 }
 0xec5   : > { %13121 = vrot.lane.b32.xlu1 %v13120_v57, %s13787_s8  ;;  %13116 = vrot.lane.b32.xlu0 %v13115_v6, %s13789_s12  ;;  %v13216_v57 = vld [vmem:[#allocation17 + $0x44] ss:$8 sps:$4 sm:$0xff]   ;;  %v13214_v6 = vld [vmem:[#allocation17 + $0x40] ss:$8 sps:$4 sm:$0xff]   ;;  %s16399_s8 = sld [smem:[#allocation50_spill]]  ;;  %s12080_s12 = scalar_lea.sflag [#allocation4], %s14164_s21 }
 0xec7   : > { %11813 = vmatpush1.bf16.msra.mxu1 %v13208_v11 }
 0xec8   : > { %11814 = vmatprep.subr.bf16.mxu1 %v13213_v14 }
 0xecb   : > { %11815 = vmatpush1.bf16.msra.mxu1 %v13211_v56  ;;  %s16248_s11 = scalar_lea.hbm %s16399_s8, %s12498_s29 }
 0xecc   : > { %11816 = vmatprep.subr.bf16.mxu1 %v13216_v57 }
 0xecf   : > { %11817 = vmatpush1.bf16.msra.mxu1 %v13214_v6 }
 0xed0   : > { %11818 = vmatprep.subr.bf16.mxu1 %v13219_v4 }
 0xf28   : > { %v13097_v31 = vpop.permute.xlu1 %13096 }
 0xf29   : > { %v13099_v29 = vunpack.i.h.bf16 %v13097_v31  ;;  %v13098_v44 = vunpack.i.l.bf16 %v13097_v31  ;;  %v13217_v31 = vld [vmem:[#allocation17 + $0x30] ss:$8 sps:$4 sm:$0xff]  }
 0xf2a   : > { %11819 = vmatpush1.bf16.msra.mxu1 %v13217_v31 }
 0xf2c   : > { %v13102_v42 = vpop.permute.xlu1 %13101 }
 0xf2d   : > { %v13104_v53 = vunpack.i.h.bf16 %v13102_v42  ;;  %v13103_v17 = vunpack.i.l.bf16 %v13102_v42  ;;  %v13220_v42 = vld [vmem:[#allocation17 + $0x20] ss:$8 sps:$4 sm:$0xff]  }
 0xf2e   : > { %v13092_v22 = vpop.permute.xlu0 %13091 }
 0xf2f   : > { %v13094_v24 = vunpack.i.h.bf16 %v13092_v22  ;;  %v13093_v46 = vunpack.i.l.bf16 %v13092_v22  ;;  %v13222_v22 = vld [vmem:[#allocation17 + $0x24] ss:$8 sps:$4 sm:$0xff]  }
 0xf30   : > { %11820 = vmatprep.subr.bf16.mxu1 %v13222_v22 }
 0xf31   : > { %v11533_v12 = vsel %vm3314_vm1, %v11468_v27, %v13094_v24  ;;  %v11532_v2 = vsel %vm3314_vm1, %v11332_v15, %v13093_v46  ;;  %v13225_v24 = vld [vmem:[#allocation17 + $0x14] ss:$8 sps:$4 sm:$0xff]   ;;  %11821 = vmatpush1.bf16.msra.mxu1 %v13220_v42  ;;  %v13223_v46 = vld [vmem:[#allocation17 + $0x10] ss:$8 sps:$4 sm:$0xff]  }
 0xf32   : > { %v11534_v19 = vsel %vm6129_vm4, %v11532_v2, %v13098_v44  ;;  %v11535_v52 = vsel %vm6129_vm4, %v11533_v12, %v13099_v29  ;;  %11822 = vmatprep.subr.bf16.mxu1 %v13225_v24  ;;  %v13228_v29 = vld [vmem:[#allocation17 + $0x4] ss:$8 sps:$4 sm:$0xff]   ;;  %v13226_v44 = vld [vmem:[#allocation17] ss:$8 sps:$4 sm:$0xff]   ;;  %v13229_v12 = vld [vmem:[#allocation19 + $0x78] sm:$0xff]  }
 0xf33   : > { %v13112_v63 = vpop.permute.xlu1 %13111  ;;  %v13107_v21 = vpop.permute.xlu0 %13106  ;;  %v11536_v51 = vsel %vm6132_vm5, %v11534_v19, %v13103_v17  ;;  %v11537_v45 = vsel %vm6132_vm5, %v11535_v52, %v13104_v53  ;;  %v13230_v2 = vld [vmem:[#allocation19 + $0x38] sm:$0xff]   ;;  %v13231_v53 = vld [vmem:[#allocation19 + $0x70] sm:$0xff]   ;;  %12599 = vmatprep.subr.bf16.mxu0 %v13229_v12  ;;  %v13235_v19 = vld [vmem:[#allocation19 + $0x60] sm:$0xff]  }
 0xf34   : > { %v13109_v18 = vunpack.i.h.bf16 %v13107_v21  ;;  %v13108_v59 = vunpack.i.l.bf16 %v13107_v21  ;;  %v13114_v28 = vunpack.i.h.bf16 %v13112_v63  ;;  %v13113_v41 = vunpack.i.l.bf16 %v13112_v63  ;;  %v13232_v17 = vld [vmem:[#allocation19 + $0x30] sm:$0xff]   ;;  %v13233_v63 = vld [vmem:[#allocation19 + $0x68] sm:$0xff]   ;;  %v13236_v52 = vld [vmem:[#allocation19 + $0x20] sm:$0xff]  }
 0xf35   : > { %11823 = vmatpush1.bf16.msra.mxu1 %v13223_v46  ;;  %v13234_v21 = vld [vmem:[#allocation19 + $0x28] sm:$0xff]  }
 0xf36   : > { %v11538_v37 = vsel %vm6135_vm6, %v11536_v51, %v13108_v59  ;;  %v11539_v3 = vsel %vm6135_vm6, %v11537_v45, %v13109_v18  ;;  %11824 = vmatprep.subr.bf16.mxu1 %v13228_v29  ;;  %v13237_v18 = vld [vmem:[#allocation19 + $0x58] sm:$0xff]  }
 0xf37   : > { %v13122_v13 = vpop.permute.xlu1 %13121  ;;  %v13117_v61 = vpop.permute.xlu0 %13116  ;;  %v11540_v58 = vsel %vm6138_vm7, %v11538_v37, %v13113_v41  ;;  %v11541_v20 = vsel %vm6138_vm7, %v11539_v3, %v13114_v28  ;;  %v13238_v59 = vld [vmem:[#allocation19 + $0x18] sm:$0xff]  }
 0xf38   : > { %v13124_v16 = vunpack.i.h.bf16 %v13122_v13  ;;  %v13123_v54 = vunpack.i.l.bf16 %v13122_v13  ;;  %v13119_v49 = vunpack.i.h.bf16 %v13117_v61  ;;  %v13118_v35 = vunpack.i.l.bf16 %v13117_v61  ;;  %v12454_v13 = vld [vmem:[%s16307_s14] ss:$0 sm:$0xff] }
 0xf39   : > { %11825 = vmatpush1.bf16.msra.mxu1 %v13226_v44 }
 0xf3a   : > { %v11542_v60 = vsel %vm6141_vm8, %v11540_v58, %v13118_v35  ;;  %v11543_v8 = vsel %vm6141_vm8, %v11541_v20, %v13119_v49  ;;  %v12455_v58 = vld [vmem:[%s16308_s15] ss:$0 sm:$0xff] }
 0xf3b   : > { %v11544_v62 = vsel %vm6144_vm9, %v11542_v60, %v13123_v54  ;;  %v11545_v7 = vsel %vm6144_vm9, %v11543_v8, %v13124_v16 }
 0xf3c   : > { %v11546_v5 = vpack.c.bf16 %v11545_v7, %v11544_v62  ;;  %v13239_v7 = vld [vmem:[#allocation19 + $0x50] sm:$0xff]  }
 0xf3e   : > { %12890 = vmatmul.mubr.bf16.vlgmr.msra.gmra.mxu0 %v11546_v5  ;;  %v13240_v5 = vld [vmem:[#allocation19 + $0x10] sm:$0xff]  }
 0xf3f   : > { %12600 = vmatpush3.bf16.msra.mxu0 %v13230_v2 }
 0xf40   : > { %12601 = vmatprep.subr.bf16.mxu0 %v13231_v53 }
 0xf43   : > { %12602 = vmatpush3.bf16.msra.mxu0 %v13232_v17 }
 0xf44   : > { %12603 = vmatprep.subr.bf16.mxu0 %v13233_v63 }
 0xf47   : > { %12604 = vmatpush3.bf16.msra.mxu0 %v13234_v21 }
 0xf48   : > { %12605 = vmatprep.subr.bf16.mxu0 %v13235_v19 }
 0xf4b   : > { %12606 = vmatpush3.bf16.msra.mxu0 %v13236_v52 }
 0xf4c   : > { %12607 = vmatprep.subr.bf16.mxu0 %v13237_v18 }
 0xf4f   : > { %12608 = vmatpush3.bf16.msra.mxu0 %v13238_v59 }
 0xf50   : > { %12609 = vmatprep.subr.bf16.mxu0 %v13239_v7 }
 0xf53   : > { %12610 = vmatpush3.bf16.msra.mxu0 %v13240_v5 }
 0xffe   : > { %v11652_v50 = vpop.f32.mrf.mxu0 }
 0xfff   : > { %v11653_v34 = vadd.f32 %v12445_v0, %v11652_v50  ;;  %v13242_v50 = vld [vmem:[#allocation19 + $0x8] sm:$0xff]  }
0x1000   : > { %v12891_v39 = vpop.f32.mrf.mxu0 }
0x1001   : > { %v11659_v23 = vadd.f32 %v11653_v34, %v15330_v40  ;;  %v13243_v34 = vld [vmem:[#allocation19 + $0x40] sm:$0xff]  }
0x1002   : > { %v11655_v55 = vpop.f32.mrf.mxu0  ;;  %v13244_v39 = vld [vmem:[#allocation19] sm:$0xff]  }
0x1003   : > { %v11656_v9 = vadd.f32 %v12445_v0, %v11655_v55  ;;  %11663 = vadd.xlane.f32.xlu0 %v11659_v23  ;;  %v13241_v0 = vld [vmem:[#allocation19 + $0x48] sm:$0xff]  }
0x1004   : > { %v12892_v15 = vpop.f32.mrf.mxu0  ;;  %12611 = vmatprep.subr.bf16.mxu0 %v13241_v0 }
0x1005   : > { %v11660_v27 = vadd.f32 %v11656_v9, %v15332_v43  ;;  %12612 = vmatpush3.bf16.msra.mxu0 %v13242_v50 }
0x1006   : > { %12613 = vmatprep.subr.bf16.mxu0 %v13243_v34 }
0x1007   : > { %11665 = vadd.xlane.f32.xlu1 %v11660_v27 }
0x1009   : > { %12614 = vmatpush3.bf16.msra.mxu0 %v13244_v39 }
0x108c   : > { %v11664_v25 = vpop.xlane.xlu0 %11663 }
0x108d   : > { %v11667_v48 = vmul.f32 0.0078125, %v11664_v25 }
0x108f   : > { %v16213_v10 = vsub.f32 %v11659_v23, %v11667_v48  ;;  %v11718_v23 = vld [vmem:[%s16310_s17] sm:$0x3] }
0x1090   : > { %v11666_v36 = vpop.xlane.xlu1 %11665  ;;  %v11727_v9 = vrot.slane %v11718_v23, %v14228_v33  ;;  %v11723_v15 = vrot.slane %v11718_v23, %v14215_v26  ;;  %v12472_v26 = vld [vmem:[%s16396_s4] ss:$0 sm:$0xff] }
0x1091   : > { %v11668_v30 = vmul.f32 0.0078125, %v11666_v36  ;;  %v11671_v40 = vmul.f32 %v16213_v10, %v16213_v10  ;;  %v11685_v16 = vmul.f32 %v12454_v13, %v16213_v10 }
0x1093   : > { %v16217_v47 = vsub.f32 %v11660_v27, %v11668_v30  ;;  %11673 = vadd.xlane.f32.xlu0 %v11671_v40 }
0x1095   : > { %v11672_v43 = vmul.f32 %v16217_v47, %v16217_v47  ;;  %v11686_v54 = vmul.f32 %v12454_v13, %v16217_v47 }
0x1097   : > { %11675 = vadd.xlane.f32.xlu0 %v11672_v43 }
0x111c   : > { %v11674_v51 = vpop.xlane.xlu0 %11673 }
0x111d   : > { %v11677_v45 = vmul.f32 0.0078125, %v11674_v51 }
0x111f   : > { %v11687_v28 = vadd.f32 1e-05, %v11677_v45  ;;  %v12489_v45 = vld [vmem:[%s16397_s0] ss:$0 sm:$0xff] }
0x1120   : > { %v11676_v41 = vpop.xlane.xlu0 %11675 }
0x1121   : > { %13377 = vrsqrt.f32 %v11687_v28  ;;  %v11678_v37 = vmul.f32 0.0078125, %v11676_v41 }
0x1123   : > { %v11688_v3 = vadd.f32 1e-05, %v11678_v37  ;;  %v12490_v37 = vld [vmem:[%s16398_s1] ss:$0 sm:$0xff] }
0x1125   : > { %13379 = vrsqrt.f32 %v11688_v3 }
0x112e   : > { %v13378_v61 = vpop.eup %13377 }
0x112f   : > { %v11691_v49 = vmul.f32 %v13378_v61, %v11685_v16 }
0x1131   : > { %v11699_v60 = vadd.f32 %v12455_v58, %v11691_v49 }
0x1132   : > { %v13380_v35 = vpop.eup %13379 }
0x1133   : > { %v11692_v20 = vmul.f32 %v13380_v35, %v11686_v54 }
0x1135   : > { %v11700_v8 = vadd.f32 %v12455_v58, %v11692_v20 }
0x1137   : > { %v11701_v62 = vpack.c.bf16 %v11700_v8, %v11699_v60 }
0x1139   : > { %11843 = vmatmul.mubr.bf16.vlgmr.msra.gmra.mxu1 %v11701_v62 }
0x11f9   : > { %v11844_v55 = vpop.f32.mrf.mxu1 }
0x11fa   : > { %v11845_v48 = vadd.f32 %v11844_v55, %v11723_v15 }
0x11fb   : > { %v11846_v27 = vpop.f32.mrf.mxu1 }
0x11fc   : > { %v11847_v38 = vadd.f32 %v11846_v27, %v11727_v9  ;;  %v11853_v43 = vmax.f32 %v11845_v48, 0.0 }
0x11fd   : > { %v11848_v32 = vpop.f32.mrf.mxu1 }
0x11fe   : > { %v11849_v25 = vadd.f32 %v11848_v32, %v11723_v15  ;;  %v11854_v40 = vmax.f32 %v11847_v38, 0.0 }
0x11ff   : > { %v11850_v10 = vpop.f32.mrf.mxu1 }
0x1200   : > { %v11851_v36 = vadd.f32 %v11850_v10, %v11727_v9  ;;  %v11855_v30 = vmax.f32 %v11849_v25, 0.0 }
0x1202   : > { %v11856_v47 = vmax.f32 %v11851_v36, 0.0  ;;  %v11857_v1 = vpack.c.bf16 %v11855_v30, %v11853_v43 }
0x1204   : > { %v11858_v11 = vpack.c.bf16 %v11856_v47, %v11854_v40 }
0x1206   : > { %12026 = vmatprep.mubr.bf16.mxu0 %v11858_v11 }
0x1207   : > { %12027 = vmatmul.mubr.bf16.vlgmr.msra.gmra.mxu0 %v11857_v1 }
0x12c7   : > { %v12615_v56 = vpop.f32.mrf.mxu0 }
0x12c9   : > { %v12616_v33 = vpop.f32.mrf.mxu0 }
0x12ca   : > { %v12617_v14 = vadd.f32 %v12616_v33, %v12615_v56 }
0x12cb   : > { %v12618_v57 = vpop.f32.mrf.mxu0 }
0x12cc   : > { %v12029_v6 = vadd.f32 %v12617_v14, %v12472_v26 }
0x12cd   : > { %v12619_v4 = vpop.f32.mrf.mxu0 }
0x12ce   : > { %v12620_v31 = vadd.f32 %v12619_v4, %v12618_v57  ;;  %v12035_v22 = vadd.f32 %v12029_v6, %v11699_v60 }
0x12d0   : > { %v12032_v42 = vadd.f32 %v12620_v31, %v12472_v26  ;;  %12039 = vadd.xlane.f32.xlu1 %v12035_v22 }
0x12d2   : > { %v12036_v24 = vadd.f32 %v12032_v42, %v11700_v8 }
0x12d4   : > { %12041 = vadd.xlane.f32.xlu0 %v12036_v24 }
0x1359   : > { %v12040_v46 = vpop.xlane.xlu1 %12039 }
0x135a   : > { %v12043_v29 = vmul.f32 0.0078125, %v12040_v46 }
0x135c   : > { %v12045_v44 = vsub.f32 %v12035_v22, %v12043_v29 }
0x135d   : > { %v12042_v12 = vpop.xlane.xlu0 %12041 }
0x135e   : > { %v12044_v2 = vmul.f32 0.0078125, %v12042_v12  ;;  %v12047_v53 = vmul.f32 %v12045_v44, %v12045_v44  ;;  %v12061_v28 = vmul.f32 %v12489_v45, %v12045_v44 }
0x1360   : > { %v12046_v17 = vsub.f32 %v12036_v24, %v12044_v2  ;;  %12049 = vadd.xlane.f32.xlu1 %v12047_v53 }
0x1362   : > { %v12048_v63 = vmul.f32 %v12046_v17, %v12046_v17  ;;  %v12062_v13 = vmul.f32 %v12489_v45, %v12046_v17 }
0x1364   : > { %12051 = vadd.xlane.f32.xlu0 %v12048_v63 }
0x13e9   : > { %v12050_v21 = vpop.xlane.xlu1 %12049 }
0x13ea   : > { %v12053_v19 = vmul.f32 0.0078125, %v12050_v21 }
0x13ec   : > { %v12063_v52 = vadd.f32 1e-05, %v12053_v19 }
0x13ed   : > { %v12052_v18 = vpop.xlane.xlu0 %12051 }
0x13ee   : > { %13381 = vrsqrt.f32 %v12063_v52  ;;  %v12054_v59 = vmul.f32 0.0078125, %v12052_v18 }
0x13f0   : > { %v12064_v51 = vadd.f32 1e-05, %v12054_v59 }
0x13f2   : > { %13383 = vrsqrt.f32 %v12064_v51 }
0x13fb   : > { %v13382_v41 = vpop.eup %13381 }
0x13fc   : > { %v12067_v3 = vmul.f32 %v13382_v41, %v12061_v28 }
0x13fe   : > { %v12075_v61 = vadd.f32 %v12490_v37, %v12067_v3 }
0x13ff   : > { %v13384_v16 = vpop.eup %13383 }
0x1400   : > { %v12068_v54 = vmul.f32 %v13384_v16, %v12062_v13  ;;  %12077 = vst [vmem:[%s867_s5] sm:$0xff] %v12075_v61 }
0x1402   : > { %v12076_v49 = vadd.f32 %v12490_v37, %v12068_v54 }
0x1404   : > { %12078 = vst [vmem:[%s867_s5 + $0x8] sm:$0xff] %v12076_v49 }
0x1405   : > { %13690 = shalt.err (!%p13687_p5)
}
0x1406   : > { %s13691_s25 = scalar_lea.hbm %s16248_s11, 256  ;;  %s13695_s19 = scalar_lea.hbm %s16399_s8, 512 }
0x1407   : > { %p13692_p9 = scmp.ne.s32.totalorder %s16248_s11, %s13691_s25  ;;  %p13696_p1 = scmp.lt.s32.totalorder %s16248_s11, %s16399_s8 }
0x1408   : > { %p13697_p4 = scmp.lt.s32.totalorder %s13695_s19, %s13691_s25 }
0x1409   : > { %p13693_p10 = pnand %p13692_p9, %p16400_p11 }
0x140a   : > { %p13698_p13 = por %p13697_p4, %p13696_p1 }
0x140b   : > { %p13694_p8 = pneg %p13693_p10 }
0x140d   : > { %p13699_p6 = pnand %p13698_p13, %p13694_p8 }
0x140f   : > { %13702 = shalt.err (!%p13699_p6)
}
0x1410   : > { %s13797_s16 = smov 128   ;;  %s13798_s1 = smov 8  }
0x1411   : > { %12933 = dma.vmem_to_hbm [thread:$0]  (%p16400_p11), %s16250_s2, 256, %s16248_s11, %s12080_s12, %s13797_s16, %s13797_s16, %s13798_s1  }
0x1412 PF: > { %s16401_s29 = sld [smem:[#allocation32_spill]]  ;;  %s12108_s5 = sand.u32 1, %s13753_s3  }
0x1413   : > { %p16403_p3 = scmp.ge.s32.totalorder %s13765_s30, 2  ;;  %s12109_s27 = scalar_lea.sflag [#allocation4], %s12108_s5 }
0x1418   : > { %p16402_p0 = scmp.ne.s32.totalorder %s16401_s29, 0 }
0x141a   : > { %p12971_p12 = pnand %p16403_p3, %p16402_p0 }
0x141c   : > { %p12972_p7 = pneg %p12971_p12 }
0x141e   : > { %13748 = dma.done.wait (%p12972_p7), %s12109_s27, 256  }
0x141f   : > { %13750 = vsyncadd (%p12972_p7), %s12109_s27, 4294967040  ;;  %s16404_s30 = sld [smem:[#allocation30_spill]]  ;;  %s16407_s3 = smov %s13757_s28 }
0x1420   : > { %s16405_s26 = sld [smem:[#allocation29_spill]] }
0x1421   : > { %s16406_s29 = sld [smem:[#allocation31_spill]] }
0x1425   : > { %p42_p2 = scmp.ge.s32.totalorder %s16404_s30, 4  }
0x1426   : > { %s16408_s28 = smov %s16405_s26 }
0x1427   :  { %44 = sbr.rel (!%p42_p2) target bundleno = 30 (0x1e), region = 202 }
0x142c   :  { %12114 = vsyncpa [#allocation3], 1 }
0x142d   :  { %12116 = vsyncpa [#allocation3 + $0x1], 1 }
0x142e   :  { %12117 = vsyncpa [#allocation6], 1 }
0x142f   :  { %12119 = vsyncpa [#allocation6 + $0x1], 1 }
0x1430   :  { %12120 = vsyncpa [#allocation9], 1 }
0x1431   :  { %12121 = vsyncpa [#allocation12], 1 }
0x1432   :  { %12122 = vsyncpa [#allocation15], 1 }
0x1433   :  { %12123 = vsyncpa [#allocation18], 1 }
0x1434   :  { %12124 = vsyncpa [#allocation4], 1 }
0x1435   :  { %12126 = vsyncpa [#allocation4 + $0x1], 1 }

</bundles_post_ra>
